<compile_context>
chip_gen: v7x
topology: tpu7x:2x2x1
jax: 0.10.0
libtpu: 0.0.40
codegen_flags: <defaults>
</compile_context>

<pallas_src>
import functools
import numpy as np
import jax
import jax.numpy as jnp
from jax.experimental import pallas as pl
from jax.experimental.pallas import tpu as pltpu

F32 = jnp.float32
BF16 = jnp.bfloat16
LN_EPS = 1e-5
BN_EPS = 1e-5


# ----------------------------------------------------------------------------------
# Math helpers
# ----------------------------------------------------------------------------------
def _layernorm(x, gamma, beta):
    mu = jnp.mean(x, axis=-1, keepdims=True)
    var = jnp.mean((x - mu) ** 2, axis=-1, keepdims=True)
    return (x - mu) * jax.lax.rsqrt(var + LN_EPS) * gamma + beta


def _bn_cols(x2d, gamma, beta):
    # BatchNorm2d training-mode batch statistics over (B*L) rows of a 2-D (rows, C) view.
    mu = jnp.mean(x2d, axis=0, keepdims=True)
    var = jnp.mean((x2d - mu) ** 2, axis=0, keepdims=True)
    return (x2d - mu) * jax.lax.rsqrt(var + BN_EPS) * gamma + beta


def _softmax(x):
    # Explicit exp/sum + approx reciprocal (EUP) instead of a VALU divide.
    m = jnp.max(x, axis=-1, keepdims=True)
    e = jnp.exp(x - m)
    return e * pl.reciprocal(jnp.sum(e, axis=-1, keepdims=True), approx=True)


def _bn_ref(x, gamma, beta):  # reference-only (3-D input)
    xf = x.reshape(-1, x.shape[-1])
    mu = jnp.mean(xf, axis=0)
    var = jnp.mean((xf - mu) ** 2, axis=0)
    return (x - mu) * jax.lax.rsqrt(var + BN_EPS) * gamma + beta


# ----------------------------------------------------------------------------------
# Single fused kernel: preprocess + router + all experts + gated combine.
#
# Packed operand layout (all row offsets are 8-row (f32) / 16-row (bf16) aligned):
#   cf_ref   (A*Ci+16, Tv*D) bf16 : rows [0,A*Ci) combined conv+fc weight, row A*Ci bias
#   r128_ref (2D+16, 128)    bf16 : rows [0,2D) router W1^T, row 2D b1
#   r32_ref  (128+16+32, 32) bf16 : rows [0,128) W2^T, row 128 b2, rows [144,176) W3^T
#                                   (columns padded E->32 with zeros)
#   mm_ref   (E_mm, TP+2D+16, D) f32 : tok | wd(D,D col-pad) | wu(D,D row-pad) |
#                                      [ln_b g,b, bn2 g,b, ln_p g,b](8,D) | bn1 g,b (8,D)
#   sm_ref   (E_sm, 2D+16, D)    f32 : wd | wu | vecD(8,D) | vecdd(8,D)
#   gates_ref SMEM f32 (2*E_mm+E_sm,) : [gate_av(mm), gate(mm), gate(sm)]
#   nb3_ref  (B, E) f32 : router bias b3 + per-call gaussian noise (folded wrapper-side)
# ----------------------------------------------------------------------------------
def _fused_moe_kernel(x_ref, vis_ref, nb3_ref,
                      cf_ref, r128_ref, r32_ref,
                      mm_ref, sm_ref, gates_ref,
                      out_ref, probs_ref, *, T, TV, E):
    B, L, D = x_ref.shape
    BL = B * L
    E_MM = mm_ref.shape[0]
    E_SM = sm_ref.shape[0]
    H1 = r128_ref.shape[1]            # 128 (router hidden 1)
    H2 = r32_ref.shape[1]             # 32  (router hidden 2)
    KC = vis_ref.shape[1]             # A*Ci

    x = x_ref[...]                    # (B, L, D) f32
    x_bf = x.astype(BF16)             # hoisted matmul-operand cast
    x2 = x.reshape(BL, D)             # copy-free leading-dim merge

    # ---- conv_adapter + fc, collapsed into one matmul (bf16 operands, f32 accum) ----
    wcomb = cf_ref[0:KC, :]                                    # (KC, TV*D) bf16
    biasc = cf_ref[KC:KC + 1, :].astype(F32)                   # (1, TV*D)
    vis_fc = (jnp.dot(vis_ref[...].astype(BF16), wcomb,
                      preferred_element_type=F32) + biasc).reshape(B, TV, D)
    vis_fc_bf = vis_fc.astype(BF16)                            # hoisted cast

    # ---- router: token means -> fused Linear(2D,128) -> 32 -> E (+ b3 + noise) ------
    m = jnp.concatenate([jnp.mean(x, axis=1), jnp.mean(vis_fc, axis=1)], axis=-1)  # (B, 2D)
    w1 = r128_ref[0:2 * D, :]
    b1 = r128_ref[2 * D:2 * D + 1, :].astype(F32)
    h = jnp.maximum(jnp.dot(m.astype(BF16), w1, preferred_element_type=F32) + b1, 0.0)
    w2 = r32_ref[0:H1, :]
    b2 = r32_ref[H1:H1 + 1, :].astype(F32)
    h = jnp.maximum(jnp.dot(h.astype(BF16), w2, preferred_element_type=F32) + b2, 0.0)
    w3 = r32_ref[H1 + 16:H1 + 16 + H2, :]                      # (H2, H2), cols >= E are 0
    logits = jnp.dot(h.astype(BF16), w3,
                     preferred_element_type=F32)[:, 0:E] + nb3_ref[...]
    probs = _softmax(logits)                                   # (B, E)
    probs_ref[...] = probs

    acc = jnp.zeros((B, L, D), dtype=F32)

    # ---- multimodal experts: token cross-attention + bottleneck adapter -------------
    TP = mm_ref.shape[1] - 2 * D - 16                          # padded token rows
    for e in range(E_MM):
        slab = mm_ref[e]                                       # (TP+2D+16, D) f32
        tok = slab[0:T]                                        # (T, D)
        wd = slab[TP:TP + D].astype(BF16)                      # (D, D), cols >= dd zero
        wu = slab[TP + D:TP + 2 * D].astype(BF16)              # (D, D), rows >= dd zero
        vD = slab[TP + 2 * D:TP + 2 * D + 8]                   # (8, D) affine params
        vdd = slab[TP + 2 * D + 8:TP + 2 * D + 16]             # (8, D) bn1 affine (col-pad)
        gav = gates_ref[e]
        gate = gates_ref[E_MM + e]

        rep0 = jnp.broadcast_to(tok[None].astype(BF16), (B, T, D))
        att_v2tk = _softmax(jnp.einsum('btd,bvd->btv', rep0, vis_fc_bf,
                                       preferred_element_type=F32))
        rep = tok[None] + jnp.einsum('btv,bvd->btd', att_v2tk.astype(BF16), vis_fc_bf,
                                     preferred_element_type=F32)            # (B, T, D)
        att_tk2x = _softmax(jnp.einsum('bld,btd->blt', x_bf, rep.astype(BF16),
                                       preferred_element_type=F32))
        x_res = jnp.einsum('blt,btd->bld', att_tk2x.astype(BF16), rep.astype(BF16),
                           preferred_element_type=F32)                      # (B, L, D)

        xx = (x + gav * x_res).reshape(BL, D)                  # gate_av residual, flatten
        xx = _layernorm(xx, vD[0:1], vD[1:2])                  # ln_before
        z = jnp.dot(xx.astype(BF16), wd, preferred_element_type=F32)        # down
        z = jnp.maximum(_bn_cols(z, vdd[0:1], vdd[1:2]), 0.0)  # bn1 + ReLU
        o = jnp.dot(z.astype(BF16), wu, preferred_element_type=F32)         # up
        o = _bn_cols(o, vD[2:3], vD[3:4])                      # bn2
        o = _layernorm(o, vD[4:5], vD[5:6])                    # ln_post
        acc = acc + (gate * probs[:, e:e + 1])[:, :, None] * o.reshape(B, L, D)

    # ---- singlemodal experts (no self-attention; NOTE: no activation after bn1) -----
    for s in range(E_SM):
        slab = sm_ref[s]
        wd = slab[0:D].astype(BF16)
        wu = slab[D:2 * D].astype(BF16)
        vD = slab[2 * D:2 * D + 8]
        vdd = slab[2 * D + 8:2 * D + 16]
        gate = gates_ref[2 * E_MM + s]

        xx = _layernorm(x2, vD[0:1], vD[1:2])                  # ln_before
        z = _bn_cols(jnp.dot(xx.astype(BF16), wd, preferred_element_type=F32),
                     vdd[0:1], vdd[1:2])                       # bn1
        o = jnp.dot(z.astype(BF16), wu, preferred_element_type=F32)
        o = _bn_cols(o, vD[2:3], vD[3:4])                      # bn2
        o = _layernorm(o, vD[4:5], vD[5:6])                    # ln_post
        acc = acc + (gate * probs[:, E_MM + s:E_MM + s + 1])[:, :, None] * o.reshape(B, L, D)

    out_ref[...] = acc.reshape(B, L * D)                       # lane-dense output slab


# ----------------------------------------------------------------------------------
# One-time wrapper-side parameter packing (module params -> padded kernel slabs)
# ----------------------------------------------------------------------------------
def pack_params(params):
    wc, bc = params['wc'], params['bc']          # (Tv, Ci), (1, Tv)
    wfc, bfc = params['wfc'], params['bfc']      # (D, A),  (1, D)
    Tv, Ci = wc.shape
    D, A = wfc.shape
    T = params['mm_tok'].shape[1]
    dd = params['mm_wd_t'].shape[2]
    E = params['w3_t'].shape[1]
    H2 = params['w2_t'].shape[1]
    assert D % 8 == 0 and dd <= D and E <= H2 and (A * Ci) % 16 == 0

    def pad_rows(a, r):
        return jnp.pad(a, ((0, r - a.shape[0]), (0, 0)))

    def ceil8(n):
        return -(-n // 8) * 8

    # conv_adapter + fc collapsed:
    #   vis_fc[b,o,d] = sum_{a,c} vis[b,a,c]*wc[o,c]*wfc[d,a] + (bc[o]*sum_a wfc[d,a]+bfc[d])
    wcomb = jnp.einsum('oc,da->acod', wc, wfc).reshape(A * Ci, Tv * D)
    biasc = (bc[0][:, None] * jnp.sum(wfc, axis=1)[None, :]
             + bfc[0][None, :]).reshape(1, Tv * D)
    convfc = jnp.concatenate([wcomb, pad_rows(biasc, 16)], axis=0).astype(BF16)

    r128 = jnp.concatenate([params['w1_t'], pad_rows(params['b1'], 16)],
                           axis=0).astype(BF16)
    w3p = jnp.pad(params['w3_t'], ((0, 0), (0, H2 - E)))
    r32 = jnp.concatenate([params['w2_t'], pad_rows(params['b2'], 16), w3p],
                          axis=0).astype(BF16)

    def mm_slab(i):
        tok = pad_rows(params['mm_tok'][i], ceil8(T))                          # (TP, D)
        wd = jnp.pad(params['mm_wd_t'][i], ((0, 0), (0, D - dd)))              # (D, D)
        wu = pad_rows(params['mm_wu_t'][i], D)                                 # (D, D)
        vD = pad_rows(params['mm_vecD'][i], 8)                                 # (8, D)
        vdd = pad_rows(jnp.pad(params['mm_vecdd'][i], ((0, 0), (0, D - dd))), 8)
        return jnp.concatenate([tok, wd, wu, vD, vdd], axis=0)

    def sm_slab(i):
        wd = jnp.pad(params['sm_wd_t'][i], ((0, 0), (0, D - dd)))
        wu = pad_rows(params['sm_wu_t'][i], D)
        vD = pad_rows(params['sm_vecD'][i], 8)
        vdd = pad_rows(jnp.pad(params['sm_vecdd'][i], ((0, 0), (0, D - dd))), 8)
        return jnp.concatenate([wd, wu, vD, vdd], axis=0)

    E_mm = params['mm_tok'].shape[0]
    E_sm = params['sm_wd_t'].shape[0]
    packed = {
        'convfc': convfc,
        'r128': r128,
        'r32': r32,
        'mm': jnp.stack([mm_slab(i) for i in range(E_mm)], axis=0).astype(F32),
        'sm': jnp.stack([sm_slab(i) for i in range(E_sm)], axis=0).astype(F32),
        'gates': jnp.concatenate([params['mm_gav'], params['mm_gate'],
                                  params['sm_gate']], axis=0).astype(F32),
        'b3': params['b3'].astype(F32),
    }
    meta = dict(T=T, TV=Tv, E=E)
    return packed, meta


# ----------------------------------------------------------------------------------
# Wrapper: layout plumbing, single pallas_call, argmax / load-balancing loss
# ----------------------------------------------------------------------------------
@functools.partial(jax.jit, static_argnames=('T', 'TV', 'E'))
def moe_adapter_forward(packed, x, vis_token, noise, *, T, TV, E):
    B, D, L, _ = x.shape
    x_cl = jnp.transpose(x[..., 0], (0, 2, 1))                  # (B, L, D)
    vis_flat = vis_token[..., 0].reshape(B, -1)                 # (B, A*Ci)
    nb3 = packed['b3'] + noise                                  # fold router bias + noise

    vmem = pl.BlockSpec(memory_space=pltpu.MemorySpace.VMEM)
    smem = pl.BlockSpec(memory_space=pltpu.MemorySpace.SMEM)
    kernel = functools.partial(_fused_moe_kernel, T=T, TV=TV, E=E)

    out_slab, probs = pl.pallas_call(
        kernel,
        out_shape=(jax.ShapeDtypeStruct((B, L * D), F32),
                   jax.ShapeDtypeStruct((B, E), F32)),
        in_specs=[vmem] * 8 + [smem],
        out_specs=(vmem, vmem),
    )(x_cl, vis_flat, nb3,
      packed['convfc'], packed['r128'], packed['r32'],
      packed['mm'], packed['sm'], packed['gates'])

    final = jnp.transpose(out_slab.reshape(B, L, D), (0, 2, 1))[..., None]   # (B, D, L, 1)
    gating_probs = probs[:, None, :]                                         # (B, 1, E)
    expert_indices = jnp.argmax(gating_probs, axis=-1)                       # (B, 1)

    # load-balancing loss (faithful to the module's F.kl_div quirk: probs_mean is (1,E),
    # so the "uniform" target is 1.0 and batchmean divides by 1).
    probs_mean = jnp.mean(gating_probs, axis=0)
    uniform = jnp.full_like(probs_mean, 1.0 / probs_mean.shape[0])
    load_balancing_loss = (jnp.sum(uniform * (jnp.log(uniform) - jnp.log(probs_mean)))
                           / probs_mean.shape[0])
    return final, expert_indices, gating_probs, load_balancing_loss


# ----------------------------------------------------------------------------------
# Pure-JAX reference of the same forward (HIGHEST precision, two-step conv+fc)
# ----------------------------------------------------------------------------------
def reference_forward(params, x, vis_token, noise):
    hp = jax.lax.Precision.HIGHEST
    x_cl = jnp.transpose(x[..., 0], (0, 2, 1))
    vis_raw = vis_token[..., 0]
    step1 = jnp.einsum('bac,oc->bao', vis_raw, params['wc'], precision=hp) + params['bc'][None]
    vis_fc = jnp.einsum('bao,da->bod', step1, params['wfc'], precision=hp) + params['bfc'][None]
    m1 = jnp.mean(x_cl, axis=1)
    m2 = jnp.mean(vis_fc, axis=1)
    mcat = jnp.concatenate([m1, m2], axis=-1)
    h = jax.nn.relu(jnp.dot(mcat, params['w1_t'], precision=hp) + params['b1'])
    h = jax.nn.relu(jnp.dot(h, params['w2_t'], precision=hp) + params['b2'])
    probs = jax.nn.softmax(jnp.dot(h, params['w3_t'], precision=hp)
                           + params['b3'] + noise, axis=-1)

    B = x_cl.shape[0]
    E_mm = params['mm_tok'].shape[0]
    E_sm = params['sm_wd_t'].shape[0]
    outs = []
    for i in range(E_mm):
        tok = params['mm_tok'][i]
        vd = params['mm_vecD'][i]
        vdd = params['mm_vecdd'][i]
        rep = jnp.broadcast_to(tok[None], (B,) + tok.shape)
        att = jax.nn.softmax(jnp.einsum('btd,bvd->btv', rep, vis_fc, precision=hp), axis=-1)
        rep = rep + jnp.einsum('btv,bvd->btd', att, vis_fc, precision=hp)
        att2 = jax.nn.softmax(jnp.einsum('bld,btd->blt', x_cl, rep, precision=hp), axis=-1)
        x_res = jnp.einsum('blt,btd->bld', att2, rep, precision=hp)
        xx = x_cl + params['mm_gav'][i] * x_res
        xx = _layernorm(xx, vd[0:1], vd[1:2])
        z = jnp.einsum('bld,dc->blc', xx, params['mm_wd_t'][i], precision=hp)
        z = jax.nn.relu(_bn_ref(z, vdd[0:1], vdd[1:2]))
        o = jnp.einsum('blc,cd->bld', z, params['mm_wu_t'][i], precision=hp)
        o = _bn_ref(o, vd[2:3], vd[3:4])
        o = _layernorm(o, vd[4:5], vd[5:6])
        outs.append(params['mm_gate'][i] * o)
    for i in range(E_sm):
        vd = params['sm_vecD'][i]
        vdd = params['sm_vecdd'][i]
        xx = _layernorm(x_cl, vd[0:1], vd[1:2])
        z = jnp.einsum('bld,dc->blc', xx, params['sm_wd_t'][i], precision=hp)
        z = _bn_ref(z, vdd[0:1], vdd[1:2])
        o = jnp.einsum('blc,cd->bld', z, params['sm_wu_t'][i], precision=hp)
        o = _bn_ref(o, vd[2:3], vd[3:4])
        o = _layernorm(o, vd[4:5], vd[5:6])
        outs.append(params['sm_gate'][i] * o)
    stacked = jnp.stack(outs, axis=0)
    final_cl = jnp.einsum('ebld,be->bld', stacked, probs, precision=hp)
    final = jnp.transpose(final_cl, (0, 2, 1))[..., None]
    return final, probs


# ----------------------------------------------------------------------------------
# Deterministic synthetic parameters (module-layout, weights pre-transposed)
# ----------------------------------------------------------------------------------
def init_params(key, *, D, A, Ci, Tv, T, dd, E_mm, E_sm, E):
    ks = jax.random.split(key, 40)
    it = iter(ks)

    def nrm(shape, scale=0.1):
        return (scale * jax.random.normal(next(it), shape)).astype(F32)

    def affine_slab(n_exp, C):
        # rows: [ln_before g, ln_before b, bn2 g, bn2 b, ln_post g, ln_post b]
        parts = []
        for _ in range(3):
            parts.append(1.0 + nrm((n_exp, 1, C), 0.05))
            parts.append(nrm((n_exp, 1, C), 0.05))
        return jnp.concatenate(parts, axis=1)

    p = {}
    p['wc'] = nrm((Tv, Ci))                 # conv_adapter Conv2d(Ci, Tv, 1)
    p['bc'] = nrm((1, Tv), 0.02)
    p['wfc'] = nrm((D, A))                  # fc Linear(A, D)
    p['bfc'] = nrm((1, D), 0.02)
    p['w1_t'] = nrm((2 * D, 128))           # router Linear(2D,128) weight, pre-transposed
    p['b1'] = nrm((1, 128), 0.02)
    p['w2_t'] = nrm((128, 32))
    p['b2'] = nrm((1, 32), 0.02)
    p['w3_t'] = nrm((32, E))
    p['b3'] = nrm((1, E), 0.02)
    p['mm_tok'] = jax.random.uniform(next(it), (E_mm, T, D)).astype(F32)   # torch.rand init
    p['mm_wd_t'] = nrm((E_mm, D, dd))       # down_sampler weight, pre-transposed (D, dd)
    p['mm_wu_t'] = nrm((E_mm, dd, D))       # up_sampler weight, pre-transposed (dd, D)
    p['mm_vecD'] = affine_slab(E_mm, D)
    p['mm_vecdd'] = jnp.concatenate(
        [1.0 + nrm((E_mm, 1, dd), 0.05), nrm((E_mm, 1, dd), 0.05)], axis=1)
    # NOTE: gate/gate_av are zero-initialized in PyTorch; nonzero here so the test
    # exercises the full datapath (the zero-gate path is checked separately below).
    p['mm_gav'] = nrm((E_mm,), 0.5)
    p['mm_gate'] = nrm((E_mm,), 0.5)
    p['sm_wd_t'] = nrm((E_sm, D, dd))
    p['sm_wu_t'] = nrm((E_sm, dd, D))
    p['sm_vecD'] = affine_slab(E_sm, D)
    p['sm_vecdd'] = jnp.concatenate(
        [1.0 + nrm((E_sm, 1, dd), 0.05), nrm((E_sm, 1, dd), 0.05)], axis=1)
    p['sm_gate'] = nrm((E_sm,), 0.5)
    return p


if __name__ == "__main__":
    # small shapes consistent with the module
    B, D, L = 2, 32, 16          # batch, input_dim(=output_dim=linear_out), sequence length
    A, Ci = 16, 8                # linear_in, conv_dim_in
    Tv = 8                       # conv_dim_out (number of visual tokens)
    T = 8                        # num_tk
    dd = D // 4                  # down_sample_size (reduction_factor=4)
    E_mm, E_sm = 2, 1
    E = E_mm + E_sm

    key = jax.random.PRNGKey(0)
    k_x, k_v, k_n, k_p = jax.random.split(key, 4)
    x = jax.random.normal(k_x, (B, D, L, 1), dtype=F32)
    vis_token = jax.random.normal(k_v, (B, A, Ci, 1), dtype=F32)
    # is_training=True path: gaussian router noise * 0.01 (generated deterministically)
    noise = (0.01 * jax.random.normal(k_n, (B, E))).astype(F32)
    params = init_params(k_p, D=D, A=A, Ci=Ci, Tv=Tv, T=T, dd=dd,
                         E_mm=E_mm, E_sm=E_sm, E=E)
    packed, meta = pack_params(params)

    final, expert_indices, gating_probs, lb_loss = moe_adapter_forward(
        packed, x, vis_token, noise, **meta)
    jax.block_until_ready(final)

    assert final.shape == (B, D, L, 1)
    assert expert_indices.shape == (B, 1)
    assert gating_probs.shape == (B, 1, E)

    # numeric check vs HIGHEST-precision f32 reference (kernel matmuls use bf16 operands,
    # hence the looser tolerances)
    ref_final, ref_probs = reference_forward(params, x, vis_token, noise)
    np.testing.assert_allclose(np.asarray(gating_probs[:, 0, :]), np.asarray(ref_probs),
                               atol=1e-2, rtol=1e-2)
    np.testing.assert_allclose(np.asarray(final), np.asarray(ref_final),
                               atol=5e-2, rtol=5e-2)

    # zero-gate path (the real module's initialization): output must be exactly zero
    pz = dict(params)
    pz['mm_gate'] = jnp.zeros_like(params['mm_gate'])
    pz['sm_gate'] = jnp.zeros_like(params['sm_gate'])
    pz['mm_gav'] = jnp.zeros_like(params['mm_gav'])
    packed_z, meta_z = pack_params(pz)
    final_zero, _, _, _ = moe_adapter_forward(packed_z, x, vis_token, noise, **meta_z)
    np.testing.assert_allclose(np.asarray(final_zero), 0.0, atol=1e-6)

    print("KERNEL_OK")
</pallas_src>

<mosaic_0001>
module attributes {stable_mosaic.version = 11 : i64} {
  func.func @_fused_moe_kernel(%arg0: memref<2x16x32xf32, #tpu.memory_space<vmem>>, %arg1: memref<2x128xf32, #tpu.memory_space<vmem>>, %arg2: memref<2x3xf32, #tpu.memory_space<vmem>>, %arg3: memref<144x256xbf16, #tpu.memory_space<vmem>>, %arg4: memref<80x128xbf16, #tpu.memory_space<vmem>>, %arg5: memref<176x32xbf16, #tpu.memory_space<vmem>>, %arg6: memref<2x88x32xf32, #tpu.memory_space<vmem>>, %arg7: memref<1x80x32xf32, #tpu.memory_space<vmem>>, %arg8: memref<5xf32, #tpu.memory_space<smem>>, %arg9: memref<2x512xf32, #tpu.memory_space<vmem>>, %arg10: memref<2x3xf32, #tpu.memory_space<vmem>>) attributes {dimension_semantics = [], scalar_prefetch = 0 : i64, scratch_operands = 0 : i64, tpu.core_type = #tpu.core_type<tc>} {
    %c0 = arith.constant 0 : index
    %c0_0 = arith.constant 0 : index
    %c0_1 = arith.constant 0 : index
    %0 = vector.load %arg0[%c0, %c0_0, %c0_1] : memref<2x16x32xf32, #tpu.memory_space<vmem>>, vector<2x16x32xf32>
    %1 = arith.truncf %0 : vector<2x16x32xf32> to vector<2x16x32xbf16>
    %2 = vector.shape_cast %0 : vector<2x16x32xf32> to vector<32x32xf32>
    %c0_2 = arith.constant 0 : index
    %c0_3 = arith.constant 0 : index
    %3 = vector.load %arg3[%c0_2, %c0_3] : memref<144x256xbf16, #tpu.memory_space<vmem>>, vector<128x256xbf16>
    %c128 = arith.constant 128 : index
    %c0_4 = arith.constant 0 : index
    %4 = vector.load %arg3[%c128, %c0_4] : memref<144x256xbf16, #tpu.memory_space<vmem>>, vector<1x256xbf16>
    %5 = arith.extf %4 : vector<1x256xbf16> to vector<1x256xf32>
    %c0_5 = arith.constant 0 : index
    %c0_6 = arith.constant 0 : index
    %6 = vector.load %arg1[%c0_5, %c0_6] : memref<2x128xf32, #tpu.memory_space<vmem>>, vector<2x128xf32>
    %7 = arith.truncf %6 : vector<2x128xf32> to vector<2x128xbf16>
    %cst = arith.constant dense<0.000000e+00> : vector<2x256xf32>
    %8 = tpu.matmul %7, %3, %cst {dimension_numbers = #tpu.dot_dimension_numbers<[1], [0], [0], [1], [0, 0, 1, 1], [], []>} : vector<2x128xbf16>, vector<128x256xbf16>, vector<2x256xf32> -> vector<2x256xf32>
    %9 = vector.broadcast %5 : vector<1x256xf32> to vector<2x256xf32>
    %10 = arith.addf %8, %9 : vector<2x256xf32>
    %11 = vector.shape_cast %10 : vector<2x256xf32> to vector<2x8x32xf32>
    %12 = arith.truncf %11 : vector<2x8x32xf32> to vector<2x8x32xbf16>
    %cst_7 = arith.constant dense<0.000000e+00> : vector<2x32xf32>
    %13 = vector.multi_reduction <add>, %0, %cst_7 [1] : vector<2x16x32xf32> to vector<2x32xf32>
    %cst_8 = arith.constant 1.600000e+01 : f32
    %14 = vector.broadcast %cst_8 : f32 to vector<2x32xf32>
    %15 = arith.divf %13, %14 : vector<2x32xf32>
    %cst_9 = arith.constant dense<0.000000e+00> : vector<2x32xf32>
    %16 = vector.multi_reduction <add>, %11, %cst_9 [1] : vector<2x8x32xf32> to vector<2x32xf32>
    %cst_10 = arith.constant 8.000000e+00 : f32
    %17 = vector.broadcast %cst_10 : f32 to vector<2x32xf32>
    %18 = arith.divf %16, %17 : vector<2x32xf32>
    %19 = tpu.concatenate %15, %18 in 1 : vector<2x32xf32>, vector<2x32xf32> -> vector<2x64xf32>
    %c0_11 = arith.constant 0 : index
    %c0_12 = arith.constant 0 : index
    %20 = vector.load %arg4[%c0_11, %c0_12] : memref<80x128xbf16, #tpu.memory_space<vmem>>, vector<64x128xbf16>
    %c64 = arith.constant 64 : index
    %c0_13 = arith.constant 0 : index
    %21 = vector.load %arg4[%c64, %c0_13] : memref<80x128xbf16, #tpu.memory_space<vmem>>, vector<1x128xbf16>
    %22 = arith.extf %21 : vector<1x128xbf16> to vector<1x128xf32>
    %23 = arith.truncf %19 : vector<2x64xf32> to vector<2x64xbf16>
    %cst_14 = arith.constant dense<0.000000e+00> : vector<2x128xf32>
    %24 = tpu.matmul %23, %20, %cst_14 {dimension_numbers = #tpu.dot_dimension_numbers<[1], [0], [0], [1], [0, 0, 1, 1], [], []>} : vector<2x64xbf16>, vector<64x128xbf16>, vector<2x128xf32> -> vector<2x128xf32>
    %25 = vector.broadcast %22 : vector<1x128xf32> to vector<2x128xf32>
    %26 = arith.addf %24, %25 : vector<2x128xf32>
    %cst_15 = arith.constant 0.000000e+00 : f32
    %27 = vector.broadcast %cst_15 : f32 to vector<2x128xf32>
    %28 = arith.maximumf %26, %27 : vector<2x128xf32>
    %c0_16 = arith.constant 0 : index
    %c0_17 = arith.constant 0 : index
    %29 = vector.load %arg5[%c0_16, %c0_17] : memref<176x32xbf16, #tpu.memory_space<vmem>>, vector<128x32xbf16>
    %c128_18 = arith.constant 128 : index
    %c0_19 = arith.constant 0 : index
    %30 = vector.load %arg5[%c128_18, %c0_19] : memref<176x32xbf16, #tpu.memory_space<vmem>>, vector<1x32xbf16>
    %31 = arith.extf %30 : vector<1x32xbf16> to vector<1x32xf32>
    %32 = arith.truncf %28 : vector<2x128xf32> to vector<2x128xbf16>
    %cst_20 = arith.constant dense<0.000000e+00> : vector<2x32xf32>
    %33 = tpu.matmul %32, %29, %cst_20 {dimension_numbers = #tpu.dot_dimension_numbers<[1], [0], [0], [1], [0, 0, 1, 1], [], []>} : vector<2x128xbf16>, vector<128x32xbf16>, vector<2x32xf32> -> vector<2x32xf32>
    %34 = vector.broadcast %31 : vector<1x32xf32> to vector<2x32xf32>
    %35 = arith.addf %33, %34 : vector<2x32xf32>
    %cst_21 = arith.constant 0.000000e+00 : f32
    %36 = vector.broadcast %cst_21 : f32 to vector<2x32xf32>
    %37 = arith.maximumf %35, %36 : vector<2x32xf32>
    %c144 = arith.constant 144 : index
    %c0_22 = arith.constant 0 : index
    %38 = vector.load %arg5[%c144, %c0_22] : memref<176x32xbf16, #tpu.memory_space<vmem>>, vector<32x32xbf16>
    %39 = arith.truncf %37 : vector<2x32xf32> to vector<2x32xbf16>
    %cst_23 = arith.constant dense<0.000000e+00> : vector<2x32xf32>
    %40 = tpu.matmul %39, %38, %cst_23 {dimension_numbers = #tpu.dot_dimension_numbers<[1], [0], [0], [1], [0, 0, 1, 1], [], []>} : vector<2x32xbf16>, vector<32x32xbf16>, vector<2x32xf32> -> vector<2x32xf32>
    %41 = vector.extract_strided_slice %40 {offsets = [0, 0], sizes = [2, 3], strides = [1, 1]} : vector<2x32xf32> to vector<2x3xf32>
    %c0_24 = arith.constant 0 : index
    %c0_25 = arith.constant 0 : index
    %42 = vector.load %arg2[%c0_24, %c0_25] : memref<2x3xf32, #tpu.memory_space<vmem>>, vector<2x3xf32>
    %43 = arith.addf %41, %42 : vector<2x3xf32>
    %cst_26 = arith.constant dense<0xFF800000> : vector<2xf32>
    %44 = vector.multi_reduction <maximumf>, %43, %cst_26 [1] : vector<2x3xf32> to vector<2xf32>
    %45 = vector.shape_cast %44 : vector<2xf32> to vector<2x1xf32>
    %46 = vector.broadcast %45 : vector<2x1xf32> to vector<2x3xf32>
    %47 = arith.subf %43, %46 : vector<2x3xf32>
    %48 = math.exp %47 : vector<2x3xf32>
    %cst_27 = arith.constant dense<0.000000e+00> : vector<2xf32>
    %49 = vector.multi_reduction <add>, %48, %cst_27 [1] : vector<2x3xf32> to vector<2xf32>
    %50 = vector.shape_cast %49 : vector<2xf32> to vector<2x1xf32>
    %51 = tpu.reciprocal %50 {approx = true} : vector<2x1xf32> -> vector<2x1xf32>
    %52 = vector.broadcast %51 : vector<2x1xf32> to vector<2x3xf32>
    %53 = arith.mulf %48, %52 : vector<2x3xf32>
    %c0_28 = arith.constant 0 : index
    %c0_29 = arith.constant 0 : index
    %54 = vector.load %arg10[%c0_28, %c0_29] : memref<2x3xf32, #tpu.memory_space<vmem>>, vector<2x3xf32>
    tpu.vector_store %arg10[%c0_28, %c0_29], %53 {strides = array<i32>} : memref<2x3xf32, #tpu.memory_space<vmem>>, vector<2x3xf32>,
    %cst_30 = arith.constant 0.000000e+00 : f32
    %55 = vector.broadcast %cst_30 : f32 to vector<2x16x32xf32>
    %c0_31 = arith.constant 0 : index
    %c0_32 = arith.constant 0 : index
    %c0_33 = arith.constant 0 : index
    %56 = vector.load %arg6[%c0_31, %c0_32, %c0_33] : memref<2x88x32xf32, #tpu.memory_space<vmem>>, vector<1x88x32xf32>
    %57 = vector.shape_cast %56 : vector<1x88x32xf32> to vector<88x32xf32>
    %58 = vector.extract_strided_slice %57 {offsets = [0, 0], sizes = [8, 32], strides = [1, 1]} : vector<88x32xf32> to vector<8x32xf32>
    %59 = vector.extract_strided_slice %57 {offsets = [8, 0], sizes = [32, 32], strides = [1, 1]} : vector<88x32xf32> to vector<32x32xf32>
    %60 = arith.truncf %59 : vector<32x32xf32> to vector<32x32xbf16>
    %61 = vector.extract_strided_slice %57 {offsets = [40, 0], sizes = [32, 32], strides = [1, 1]} : vector<88x32xf32> to vector<32x32xf32>
    %62 = arith.truncf %61 : vector<32x32xf32> to vector<32x32xbf16>
    %63 = vector.extract_strided_slice %57 {offsets = [72, 0], sizes = [8, 32], strides = [1, 1]} : vector<88x32xf32> to vector<8x32xf32>
    %64 = vector.extract_strided_slice %57 {offsets = [80, 0], sizes = [8, 32], strides = [1, 1]} : vector<88x32xf32> to vector<8x32xf32>
    %c0_34 = arith.constant 0 : index
    %65 = memref.load %arg8[%c0_34] : memref<5xf32, #tpu.memory_space<smem>>
    %c2 = arith.constant 2 : index
    %66 = memref.load %arg8[%c2] : memref<5xf32, #tpu.memory_space<smem>>
    %67 = vector.shape_cast %58 : vector<8x32xf32> to vector<1x8x32xf32>
    %68 = arith.truncf %67 : vector<1x8x32xf32> to vector<1x8x32xbf16>
    %69 = vector.shape_cast %68 : vector<1x8x32xbf16> to vector<1x8x32xbf16>
    %70 = vector.broadcast %69 : vector<1x8x32xbf16> to vector<2x8x32xbf16>
    "tpu.trace_start"() <{level = 10 : i32, message = "btd,bvd->btv"}> : () -> ()
    %cst_35 = arith.constant dense<0.000000e+00> : vector<2x8x8xf32>
    %71 = tpu.matmul %70, %12, %cst_35 {dimension_numbers = #tpu.dot_dimension_numbers<[2], [2], [1], [1], [0, 0, 0, 1, 1, 1], [0], [0]>} : vector<2x8x32xbf16>, vector<2x8x32xbf16>, vector<2x8x8xf32> -> vector<2x8x8xf32>
    "tpu.trace_stop"() : () -> ()
    %cst_36 = arith.constant dense<0xFF800000> : vector<2x8xf32>
    %72 = vector.multi_reduction <maximumf>, %71, %cst_36 [2] : vector<2x8x8xf32> to vector<2x8xf32>
    %73 = vector.shape_cast %72 : vector<2x8xf32> to vector<2x8x1xf32>
    %74 = vector.broadcast %73 : vector<2x8x1xf32> to vector<2x8x8xf32>
    %75 = arith.subf %71, %74 : vector<2x8x8xf32>
    %76 = math.exp %75 : vector<2x8x8xf32>
    %cst_37 = arith.constant dense<0.000000e+00> : vector<2x8xf32>
    %77 = vector.multi_reduction <add>, %76, %cst_37 [2] : vector<2x8x8xf32> to vector<2x8xf32>
    %78 = vector.shape_cast %77 : vector<2x8xf32> to vector<2x8x1xf32>
    %79 = tpu.reciprocal %78 {approx = true} : vector<2x8x1xf32> -> vector<2x8x1xf32>
    %80 = vector.broadcast %79 : vector<2x8x1xf32> to vector<2x8x8xf32>
    %81 = arith.mulf %76, %80 : vector<2x8x8xf32>
    %82 = vector.shape_cast %58 : vector<8x32xf32> to vector<1x8x32xf32>
    %83 = arith.truncf %81 : vector<2x8x8xf32> to vector<2x8x8xbf16>
    "tpu.trace_start"() <{level = 10 : i32, message = "btv,bvd->btd"}> : () -> ()
    %cst_38 = arith.constant dense<0.000000e+00> : vector<2x8x32xf32>
    %84 = tpu.matmul %83, %12, %cst_38 {dimension_numbers = #tpu.dot_dimension_numbers<[2], [1], [1], [2], [0, 0, 0, 1, 1, 2], [0], [0]>} : vector<2x8x8xbf16>, vector<2x8x32xbf16>, vector<2x8x32xf32> -> vector<2x8x32xf32>
    "tpu.trace_stop"() : () -> ()
    %85 = vector.broadcast %82 : vector<1x8x32xf32> to vector<2x8x32xf32>
    %86 = arith.addf %85, %84 : vector<2x8x32xf32>
    %87 = arith.truncf %86 : vector<2x8x32xf32> to vector<2x8x32xbf16>
    "tpu.trace_start"() <{level = 10 : i32, message = "bld,btd->blt"}> : () -> ()
    %cst_39 = arith.constant dense<0.000000e+00> : vector<2x16x8xf32>
    %88 = tpu.matmul %1, %87, %cst_39 {dimension_numbers = #tpu.dot_dimension_numbers<[2], [2], [1], [1], [0, 0, 0, 1, 1, 1], [0], [0]>} : vector<2x16x32xbf16>, vector<2x8x32xbf16>, vector<2x16x8xf32> -> vector<2x16x8xf32>
    "tpu.trace_stop"() : () -> ()
    %cst_40 = arith.constant dense<0xFF800000> : vector<2x16xf32>
    %89 = vector.multi_reduction <maximumf>, %88, %cst_40 [2] : vector<2x16x8xf32> to vector<2x16xf32>
    %90 = vector.shape_cast %89 : vector<2x16xf32> to vector<2x16x1xf32>
    %91 = vector.broadcast %90 : vector<2x16x1xf32> to vector<2x16x8xf32>
    %92 = arith.subf %88, %91 : vector<2x16x8xf32>
    %93 = math.exp %92 : vector<2x16x8xf32>
    %cst_41 = arith.constant dense<0.000000e+00> : vector<2x16xf32>
    %94 = vector.multi_reduction <add>, %93, %cst_41 [2] : vector<2x16x8xf32> to vector<2x16xf32>
    %95 = vector.shape_cast %94 : vector<2x16xf32> to vector<2x16x1xf32>
    %96 = tpu.reciprocal %95 {approx = true} : vector<2x16x1xf32> -> vector<2x16x1xf32>
    %97 = vector.broadcast %96 : vector<2x16x1xf32> to vector<2x16x8xf32>
    %98 = arith.mulf %93, %97 : vector<2x16x8xf32>
    %99 = arith.truncf %98 : vector<2x16x8xf32> to vector<2x16x8xbf16>
    %100 = arith.truncf %86 : vector<2x8x32xf32> to vector<2x8x32xbf16>
    "tpu.trace_start"() <{level = 10 : i32, message = "blt,btd->bld"}> : () -> ()
    %cst_42 = arith.constant dense<0.000000e+00> : vector<2x16x32xf32>
    %101 = tpu.matmul %99, %100, %cst_42 {dimension_numbers = #tpu.dot_dimension_numbers<[2], [1], [1], [2], [0, 0, 0, 1, 1, 2], [0], [0]>} : vector<2x16x8xbf16>, vector<2x8x32xbf16>, vector<2x16x32xf32> -> vector<2x16x32xf32>
    "tpu.trace_stop"() : () -> ()
    %102 = vector.broadcast %65 : f32 to vector<2x16x32xf32>
    %103 = arith.mulf %102, %101 : vector<2x16x32xf32>
    %104 = arith.addf %0, %103 : vector<2x16x32xf32>
    %105 = vector.shape_cast %104 : vector<2x16x32xf32> to vector<32x32xf32>
    %106 = vector.extract_strided_slice %63 {offsets = [0, 0], sizes = [1, 32], strides = [1, 1]} : vector<8x32xf32> to vector<1x32xf32>
    %107 = vector.extract_strided_slice %63 {offsets = [1, 0], sizes = [1, 32], strides = [1, 1]} : vector<8x32xf32> to vector<1x32xf32>
    %cst_43 = arith.constant dense<0.000000e+00> : vector<32xf32>
    %108 = vector.multi_reduction <add>, %105, %cst_43 [1] : vector<32x32xf32> to vector<32xf32>
    %109 = vector.shape_cast %108 : vector<32xf32> to vector<32x1xf32>
    %cst_44 = arith.constant 3.200000e+01 : f32
    %110 = vector.broadcast %cst_44 : f32 to vector<32x1xf32>
    %111 = arith.divf %109, %110 : vector<32x1xf32>
    %112 = vector.broadcast %111 : vector<32x1xf32> to vector<32x32xf32>
    %113 = arith.subf %105, %112 : vector<32x32xf32>
    %114 = arith.mulf %113, %113 : vector<32x32xf32>
    %cst_45 = arith.constant dense<0.000000e+00> : vector<32xf32>
    %115 = vector.multi_reduction <add>, %114, %cst_45 [1] : vector<32x32xf32> to vector<32xf32>
    %116 = vector.shape_cast %115 : vector<32xf32> to vector<32x1xf32>
    %cst_46 = arith.constant 3.200000e+01 : f32
    %117 = vector.broadcast %cst_46 : f32 to vector<32x1xf32>
    %118 = arith.divf %116, %117 : vector<32x1xf32>
    %119 = vector.broadcast %111 : vector<32x1xf32> to vector<32x32xf32>
    %120 = arith.subf %105, %119 : vector<32x32xf32>
    %cst_47 = arith.constant 9.99999974E-6 : f32
    %121 = vector.broadcast %cst_47 : f32 to vector<32x1xf32>
    %122 = arith.addf %118, %121 : vector<32x1xf32>
    %123 = math.rsqrt %122 : vector<32x1xf32>
    %124 = vector.broadcast %123 : vector<32x1xf32> to vector<32x32xf32>
    %125 = arith.mulf %120, %124 : vector<32x32xf32>
    %126 = vector.broadcast %106 : vector<1x32xf32> to vector<32x32xf32>
    %127 = arith.mulf %125, %126 : vector<32x32xf32>
    %128 = vector.broadcast %107 : vector<1x32xf32> to vector<32x32xf32>
    %129 = arith.addf %127, %128 : vector<32x32xf32>
    %130 = arith.truncf %129 : vector<32x32xf32> to vector<32x32xbf16>
    %cst_48 = arith.constant dense<0.000000e+00> : vector<32x32xf32>
    %131 = tpu.matmul %130, %60, %cst_48 {dimension_numbers = #tpu.dot_dimension_numbers<[1], [0], [0], [1], [0, 0, 1, 1], [], []>} : vector<32x32xbf16>, vector<32x32xbf16>, vector<32x32xf32> -> vector<32x32xf32>
    %132 = vector.extract_strided_slice %64 {offsets = [0, 0], sizes = [1, 32], strides = [1, 1]} : vector<8x32xf32> to vector<1x32xf32>
    %133 = vector.extract_strided_slice %64 {offsets = [1, 0], sizes = [1, 32], strides = [1, 1]} : vector<8x32xf32> to vector<1x32xf32>
    %cst_49 = arith.constant dense<0.000000e+00> : vector<32xf32>
    %134 = vector.multi_reduction <add>, %131, %cst_49 [0] : vector<32x32xf32> to vector<32xf32>
    %135 = vector.shape_cast %134 : vector<32xf32> to vector<1x32xf32>
    %cst_50 = arith.constant 3.200000e+01 : f32
    %136 = vector.broadcast %cst_50 : f32 to vector<1x32xf32>
    %137 = arith.divf %135, %136 : vector<1x32xf32>
    %138 = vector.broadcast %137 : vector<1x32xf32> to vector<32x32xf32>
    %139 = arith.subf %131, %138 : vector<32x32xf32>
    %140 = arith.mulf %139, %139 : vector<32x32xf32>
    %cst_51 = arith.constant dense<0.000000e+00> : vector<32xf32>
    %141 = vector.multi_reduction <add>, %140, %cst_51 [0] : vector<32x32xf32> to vector<32xf32>
    %142 = vector.shape_cast %141 : vector<32xf32> to vector<1x32xf32>
    %cst_52 = arith.constant 3.200000e+01 : f32
    %143 = vector.broadcast %cst_52 : f32 to vector<1x32xf32>
    %144 = arith.divf %142, %143 : vector<1x32xf32>
    %145 = vector.broadcast %137 : vector<1x32xf32> to vector<32x32xf32>
    %146 = arith.subf %131, %145 : vector<32x32xf32>
    %cst_53 = arith.constant 9.99999974E-6 : f32
    %147 = vector.broadcast %cst_53 : f32 to vector<1x32xf32>
    %148 = arith.addf %144, %147 : vector<1x32xf32>
    %149 = math.rsqrt %148 : vector<1x32xf32>
    %150 = vector.broadcast %149 : vector<1x32xf32> to vector<32x32xf32>
    %151 = arith.mulf %146, %150 : vector<32x32xf32>
    %152 = vector.broadcast %132 : vector<1x32xf32> to vector<32x32xf32>
    %153 = arith.mulf %151, %152 : vector<32x32xf32>
    %154 = vector.broadcast %133 : vector<1x32xf32> to vector<32x32xf32>
    %155 = arith.addf %153, %154 : vector<32x32xf32>
    %cst_54 = arith.constant 0.000000e+00 : f32
    %156 = vector.broadcast %cst_54 : f32 to vector<32x32xf32>
    %157 = arith.maximumf %155, %156 : vector<32x32xf32>
    %158 = arith.truncf %157 : vector<32x32xf32> to vector<32x32xbf16>
    %cst_55 = arith.constant dense<0.000000e+00> : vector<32x32xf32>
    %159 = tpu.matmul %158, %62, %cst_55 {dimension_numbers = #tpu.dot_dimension_numbers<[1], [0], [0], [1], [0, 0, 1, 1], [], []>} : vector<32x32xbf16>, vector<32x32xbf16>, vector<32x32xf32> -> vector<32x32xf32>
    %160 = vector.extract_strided_slice %63 {offsets = [2, 0], sizes = [1, 32], strides = [1, 1]} : vector<8x32xf32> to vector<1x32xf32>
    %161 = vector.extract_strided_slice %63 {offsets = [3, 0], sizes = [1, 32], strides = [1, 1]} : vector<8x32xf32> to vector<1x32xf32>
    %cst_56 = arith.constant dense<0.000000e+00> : vector<32xf32>
    %162 = vector.multi_reduction <add>, %159, %cst_56 [0] : vector<32x32xf32> to vector<32xf32>
    %163 = vector.shape_cast %162 : vector<32xf32> to vector<1x32xf32>
    %cst_57 = arith.constant 3.200000e+01 : f32
    %164 = vector.broadcast %cst_57 : f32 to vector<1x32xf32>
    %165 = arith.divf %163, %164 : vector<1x32xf32>
    %166 = vector.broadcast %165 : vector<1x32xf32> to vector<32x32xf32>
    %167 = arith.subf %159, %166 : vector<32x32xf32>
    %168 = arith.mulf %167, %167 : vector<32x32xf32>
    %cst_58 = arith.constant dense<0.000000e+00> : vector<32xf32>
    %169 = vector.multi_reduction <add>, %168, %cst_58 [0] : vector<32x32xf32> to vector<32xf32>
    %170 = vector.shape_cast %169 : vector<32xf32> to vector<1x32xf32>
    %cst_59 = arith.constant 3.200000e+01 : f32
    %171 = vector.broadcast %cst_59 : f32 to vector<1x32xf32>
    %172 = arith.divf %170, %171 : vector<1x32xf32>
    %173 = vector.broadcast %165 : vector<1x32xf32> to vector<32x32xf32>
    %174 = arith.subf %159, %173 : vector<32x32xf32>
    %cst_60 = arith.constant 9.99999974E-6 : f32
    %175 = vector.broadcast %cst_60 : f32 to vector<1x32xf32>
    %176 = arith.addf %172, %175 : vector<1x32xf32>
    %177 = math.rsqrt %176 : vector<1x32xf32>
    %178 = vector.broadcast %177 : vector<1x32xf32> to vector<32x32xf32>
    %179 = arith.mulf %174, %178 : vector<32x32xf32>
    %180 = vector.broadcast %160 : vector<1x32xf32> to vector<32x32xf32>
    %181 = arith.mulf %179, %180 : vector<32x32xf32>
    %182 = vector.broadcast %161 : vector<1x32xf32> to vector<32x32xf32>
    %183 = arith.addf %181, %182 : vector<32x32xf32>
    %184 = vector.extract_strided_slice %63 {offsets = [4, 0], sizes = [1, 32], strides = [1, 1]} : vector<8x32xf32> to vector<1x32xf32>
    %185 = vector.extract_strided_slice %63 {offsets = [5, 0], sizes = [1, 32], strides = [1, 1]} : vector<8x32xf32> to vector<1x32xf32>
    %cst_61 = arith.constant dense<0.000000e+00> : vector<32xf32>
    %186 = vector.multi_reduction <add>, %183, %cst_61 [1] : vector<32x32xf32> to vector<32xf32>
    %187 = vector.shape_cast %186 : vector<32xf32> to vector<32x1xf32>
    %cst_62 = arith.constant 3.200000e+01 : f32
    %188 = vector.broadcast %cst_62 : f32 to vector<32x1xf32>
    %189 = arith.divf %187, %188 : vector<32x1xf32>
    %190 = vector.broadcast %189 : vector<32x1xf32> to vector<32x32xf32>
    %191 = arith.subf %183, %190 : vector<32x32xf32>
    %192 = arith.mulf %191, %191 : vector<32x32xf32>
    %cst_63 = arith.constant dense<0.000000e+00> : vector<32xf32>
    %193 = vector.multi_reduction <add>, %192, %cst_63 [1] : vector<32x32xf32> to vector<32xf32>
    %194 = vector.shape_cast %193 : vector<32xf32> to vector<32x1xf32>
    %cst_64 = arith.constant 3.200000e+01 : f32
    %195 = vector.broadcast %cst_64 : f32 to vector<32x1xf32>
    %196 = arith.divf %194, %195 : vector<32x1xf32>
    %197 = vector.broadcast %189 : vector<32x1xf32> to vector<32x32xf32>
    %198 = arith.subf %183, %197 : vector<32x32xf32>
    %cst_65 = arith.constant 9.99999974E-6 : f32
    %199 = vector.broadcast %cst_65 : f32 to vector<32x1xf32>
    %200 = arith.addf %196, %199 : vector<32x1xf32>
    %201 = math.rsqrt %200 : vector<32x1xf32>
    %202 = vector.broadcast %201 : vector<32x1xf32> to vector<32x32xf32>
    %203 = arith.mulf %198, %202 : vector<32x32xf32>
    %204 = vector.broadcast %184 : vector<1x32xf32> to vector<32x32xf32>
    %205 = arith.mulf %203, %204 : vector<32x32xf32>
    %206 = vector.broadcast %185 : vector<1x32xf32> to vector<32x32xf32>
    %207 = arith.addf %205, %206 : vector<32x32xf32>
    %208 = vector.extract_strided_slice %53 {offsets = [0, 0], sizes = [2, 1], strides = [1, 1]} : vector<2x3xf32> to vector<2x1xf32>
    %209 = vector.broadcast %66 : f32 to vector<2x1xf32>
    %210 = arith.mulf %209, %208 : vector<2x1xf32>
    %211 = vector.shape_cast %210 : vector<2x1xf32> to vector<2x1x1xf32>
    %212 = vector.shape_cast %207 : vector<32x32xf32> to vector<2x16x32xf32>
    %213 = vector.broadcast %211 : vector<2x1x1xf32> to vector<2x16x32xf32>
    %214 = arith.mulf %213, %212 : vector<2x16x32xf32>
    %215 = arith.addf %55, %214 : vector<2x16x32xf32>
    %c1 = arith.constant 1 : index
    %c0_66 = arith.constant 0 : index
    %c0_67 = arith.constant 0 : index
    %216 = vector.load %arg6[%c1, %c0_66, %c0_67] : memref<2x88x32xf32, #tpu.memory_space<vmem>>, vector<1x88x32xf32>
    %217 = vector.shape_cast %216 : vector<1x88x32xf32> to vector<88x32xf32>
    %218 = vector.extract_strided_slice %217 {offsets = [0, 0], sizes = [8, 32], strides = [1, 1]} : vector<88x32xf32> to vector<8x32xf32>
    %219 = vector.extract_strided_slice %217 {offsets = [8, 0], sizes = [32, 32], strides = [1, 1]} : vector<88x32xf32> to vector<32x32xf32>
    %220 = arith.truncf %219 : vector<32x32xf32> to vector<32x32xbf16>
    %221 = vector.extract_strided_slice %217 {offsets = [40, 0], sizes = [32, 32], strides = [1, 1]} : vector<88x32xf32> to vector<32x32xf32>
    %222 = arith.truncf %221 : vector<32x32xf32> to vector<32x32xbf16>
    %223 = vector.extract_strided_slice %217 {offsets = [72, 0], sizes = [8, 32], strides = [1, 1]} : vector<88x32xf32> to vector<8x32xf32>
    %224 = vector.extract_strided_slice %217 {offsets = [80, 0], sizes = [8, 32], strides = [1, 1]} : vector<88x32xf32> to vector<8x32xf32>
    %c1_68 = arith.constant 1 : index
    %225 = memref.load %arg8[%c1_68] : memref<5xf32, #tpu.memory_space<smem>>
    %c3 = arith.constant 3 : index
    %226 = memref.load %arg8[%c3] : memref<5xf32, #tpu.memory_space<smem>>
    %227 = vector.shape_cast %218 : vector<8x32xf32> to vector<1x8x32xf32>
    %228 = arith.truncf %227 : vector<1x8x32xf32> to vector<1x8x32xbf16>
    %229 = vector.shape_cast %228 : vector<1x8x32xbf16> to vector<1x8x32xbf16>
    %230 = vector.broadcast %229 : vector<1x8x32xbf16> to vector<2x8x32xbf16>
    "tpu.trace_start"() <{level = 10 : i32, message = "btd,bvd->btv"}> : () -> ()
    %cst_69 = arith.constant dense<0.000000e+00> : vector<2x8x8xf32>
    %231 = tpu.matmul %230, %12, %cst_69 {dimension_numbers = #tpu.dot_dimension_numbers<[2], [2], [1], [1], [0, 0, 0, 1, 1, 1], [0], [0]>} : vector<2x8x32xbf16>, vector<2x8x32xbf16>, vector<2x8x8xf32> -> vector<2x8x8xf32>
    "tpu.trace_stop"() : () -> ()
    %cst_70 = arith.constant dense<0xFF800000> : vector<2x8xf32>
    %232 = vector.multi_reduction <maximumf>, %231, %cst_70 [2] : vector<2x8x8xf32> to vector<2x8xf32>
    %233 = vector.shape_cast %232 : vector<2x8xf32> to vector<2x8x1xf32>
    %234 = vector.broadcast %233 : vector<2x8x1xf32> to vector<2x8x8xf32>
    %235 = arith.subf %231, %234 : vector<2x8x8xf32>
    %236 = math.exp %235 : vector<2x8x8xf32>
    %cst_71 = arith.constant dense<0.000000e+00> : vector<2x8xf32>
    %237 = vector.multi_reduction <add>, %236, %cst_71 [2] : vector<2x8x8xf32> to vector<2x8xf32>
    %238 = vector.shape_cast %237 : vector<2x8xf32> to vector<2x8x1xf32>
    %239 = tpu.reciprocal %238 {approx = true} : vector<2x8x1xf32> -> vector<2x8x1xf32>
    %240 = vector.broadcast %239 : vector<2x8x1xf32> to vector<2x8x8xf32>
    %241 = arith.mulf %236, %240 : vector<2x8x8xf32>
    %242 = vector.shape_cast %218 : vector<8x32xf32> to vector<1x8x32xf32>
    %243 = arith.truncf %241 : vector<2x8x8xf32> to vector<2x8x8xbf16>
    "tpu.trace_start"() <{level = 10 : i32, message = "btv,bvd->btd"}> : () -> ()
    %cst_72 = arith.constant dense<0.000000e+00> : vector<2x8x32xf32>
    %244 = tpu.matmul %243, %12, %cst_72 {dimension_numbers = #tpu.dot_dimension_numbers<[2], [1], [1], [2], [0, 0, 0, 1, 1, 2], [0], [0]>} : vector<2x8x8xbf16>, vector<2x8x32xbf16>, vector<2x8x32xf32> -> vector<2x8x32xf32>
    "tpu.trace_stop"() : () -> ()
    %245 = vector.broadcast %242 : vector<1x8x32xf32> to vector<2x8x32xf32>
    %246 = arith.addf %245, %244 : vector<2x8x32xf32>
    %247 = arith.truncf %246 : vector<2x8x32xf32> to vector<2x8x32xbf16>
    "tpu.trace_start"() <{level = 10 : i32, message = "bld,btd->blt"}> : () -> ()
    %cst_73 = arith.constant dense<0.000000e+00> : vector<2x16x8xf32>
    %248 = tpu.matmul %1, %247, %cst_73 {dimension_numbers = #tpu.dot_dimension_numbers<[2], [2], [1], [1], [0, 0, 0, 1, 1, 1], [0], [0]>} : vector<2x16x32xbf16>, vector<2x8x32xbf16>, vector<2x16x8xf32> -> vector<2x16x8xf32>
    "tpu.trace_stop"() : () -> ()
    %cst_74 = arith.constant dense<0xFF800000> : vector<2x16xf32>
    %249 = vector.multi_reduction <maximumf>, %248, %cst_74 [2] : vector<2x16x8xf32> to vector<2x16xf32>
    %250 = vector.shape_cast %249 : vector<2x16xf32> to vector<2x16x1xf32>
    %251 = vector.broadcast %250 : vector<2x16x1xf32> to vector<2x16x8xf32>
    %252 = arith.subf %248, %251 : vector<2x16x8xf32>
    %253 = math.exp %252 : vector<2x16x8xf32>
    %cst_75 = arith.constant dense<0.000000e+00> : vector<2x16xf32>
    %254 = vector.multi_reduction <add>, %253, %cst_75 [2] : vector<2x16x8xf32> to vector<2x16xf32>
    %255 = vector.shape_cast %254 : vector<2x16xf32> to vector<2x16x1xf32>
    %256 = tpu.reciprocal %255 {approx = true} : vector<2x16x1xf32> -> vector<2x16x1xf32>
    %257 = vector.broadcast %256 : vector<2x16x1xf32> to vector<2x16x8xf32>
    %258 = arith.mulf %253, %257 : vector<2x16x8xf32>
    %259 = arith.truncf %258 : vector<2x16x8xf32> to vector<2x16x8xbf16>
    %260 = arith.truncf %246 : vector<2x8x32xf32> to vector<2x8x32xbf16>
    "tpu.trace_start"() <{level = 10 : i32, message = "blt,btd->bld"}> : () -> ()
    %cst_76 = arith.constant dense<0.000000e+00> : vector<2x16x32xf32>
    %261 = tpu.matmul %259, %260, %cst_76 {dimension_numbers = #tpu.dot_dimension_numbers<[2], [1], [1], [2], [0, 0, 0, 1, 1, 2], [0], [0]>} : vector<2x16x8xbf16>, vector<2x8x32xbf16>, vector<2x16x32xf32> -> vector<2x16x32xf32>
    "tpu.trace_stop"() : () -> ()
    %262 = vector.broadcast %225 : f32 to vector<2x16x32xf32>
    %263 = arith.mulf %262, %261 : vector<2x16x32xf32>
    %264 = arith.addf %0, %263 : vector<2x16x32xf32>
    %265 = vector.shape_cast %264 : vector<2x16x32xf32> to vector<32x32xf32>
    %266 = vector.extract_strided_slice %223 {offsets = [0, 0], sizes = [1, 32], strides = [1, 1]} : vector<8x32xf32> to vector<1x32xf32>
    %267 = vector.extract_strided_slice %223 {offsets = [1, 0], sizes = [1, 32], strides = [1, 1]} : vector<8x32xf32> to vector<1x32xf32>
    %cst_77 = arith.constant dense<0.000000e+00> : vector<32xf32>
    %268 = vector.multi_reduction <add>, %265, %cst_77 [1] : vector<32x32xf32> to vector<32xf32>
    %269 = vector.shape_cast %268 : vector<32xf32> to vector<32x1xf32>
    %cst_78 = arith.constant 3.200000e+01 : f32
    %270 = vector.broadcast %cst_78 : f32 to vector<32x1xf32>
    %271 = arith.divf %269, %270 : vector<32x1xf32>
    %272 = vector.broadcast %271 : vector<32x1xf32> to vector<32x32xf32>
    %273 = arith.subf %265, %272 : vector<32x32xf32>
    %274 = arith.mulf %273, %273 : vector<32x32xf32>
    %cst_79 = arith.constant dense<0.000000e+00> : vector<32xf32>
    %275 = vector.multi_reduction <add>, %274, %cst_79 [1] : vector<32x32xf32> to vector<32xf32>
    %276 = vector.shape_cast %275 : vector<32xf32> to vector<32x1xf32>
    %cst_80 = arith.constant 3.200000e+01 : f32
    %277 = vector.broadcast %cst_80 : f32 to vector<32x1xf32>
    %278 = arith.divf %276, %277 : vector<32x1xf32>
    %279 = vector.broadcast %271 : vector<32x1xf32> to vector<32x32xf32>
    %280 = arith.subf %265, %279 : vector<32x32xf32>
    %cst_81 = arith.constant 9.99999974E-6 : f32
    %281 = vector.broadcast %cst_81 : f32 to vector<32x1xf32>
    %282 = arith.addf %278, %281 : vector<32x1xf32>
    %283 = math.rsqrt %282 : vector<32x1xf32>
    %284 = vector.broadcast %283 : vector<32x1xf32> to vector<32x32xf32>
    %285 = arith.mulf %280, %284 : vector<32x32xf32>
    %286 = vector.broadcast %266 : vector<1x32xf32> to vector<32x32xf32>
    %287 = arith.mulf %285, %286 : vector<32x32xf32>
    %288 = vector.broadcast %267 : vector<1x32xf32> to vector<32x32xf32>
    %289 = arith.addf %287, %288 : vector<32x32xf32>
    %290 = arith.truncf %289 : vector<32x32xf32> to vector<32x32xbf16>
    %cst_82 = arith.constant dense<0.000000e+00> : vector<32x32xf32>
    %291 = tpu.matmul %290, %220, %cst_82 {dimension_numbers = #tpu.dot_dimension_numbers<[1], [0], [0], [1], [0, 0, 1, 1], [], []>} : vector<32x32xbf16>, vector<32x32xbf16>, vector<32x32xf32> -> vector<32x32xf32>
    %292 = vector.extract_strided_slice %224 {offsets = [0, 0], sizes = [1, 32], strides = [1, 1]} : vector<8x32xf32> to vector<1x32xf32>
    %293 = vector.extract_strided_slice %224 {offsets = [1, 0], sizes = [1, 32], strides = [1, 1]} : vector<8x32xf32> to vector<1x32xf32>
    %cst_83 = arith.constant dense<0.000000e+00> : vector<32xf32>
    %294 = vector.multi_reduction <add>, %291, %cst_83 [0] : vector<32x32xf32> to vector<32xf32>
    %295 = vector.shape_cast %294 : vector<32xf32> to vector<1x32xf32>
    %cst_84 = arith.constant 3.200000e+01 : f32
    %296 = vector.broadcast %cst_84 : f32 to vector<1x32xf32>
    %297 = arith.divf %295, %296 : vector<1x32xf32>
    %298 = vector.broadcast %297 : vector<1x32xf32> to vector<32x32xf32>
    %299 = arith.subf %291, %298 : vector<32x32xf32>
    %300 = arith.mulf %299, %299 : vector<32x32xf32>
    %cst_85 = arith.constant dense<0.000000e+00> : vector<32xf32>
    %301 = vector.multi_reduction <add>, %300, %cst_85 [0] : vector<32x32xf32> to vector<32xf32>
    %302 = vector.shape_cast %301 : vector<32xf32> to vector<1x32xf32>
    %cst_86 = arith.constant 3.200000e+01 : f32
    %303 = vector.broadcast %cst_86 : f32 to vector<1x32xf32>
    %304 = arith.divf %302, %303 : vector<1x32xf32>
    %305 = vector.broadcast %297 : vector<1x32xf32> to vector<32x32xf32>
    %306 = arith.subf %291, %305 : vector<32x32xf32>
    %cst_87 = arith.constant 9.99999974E-6 : f32
    %307 = vector.broadcast %cst_87 : f32 to vector<1x32xf32>
    %308 = arith.addf %304, %307 : vector<1x32xf32>
    %309 = math.rsqrt %308 : vector<1x32xf32>
    %310 = vector.broadcast %309 : vector<1x32xf32> to vector<32x32xf32>
    %311 = arith.mulf %306, %310 : vector<32x32xf32>
    %312 = vector.broadcast %292 : vector<1x32xf32> to vector<32x32xf32>
    %313 = arith.mulf %311, %312 : vector<32x32xf32>
    %314 = vector.broadcast %293 : vector<1x32xf32> to vector<32x32xf32>
    %315 = arith.addf %313, %314 : vector<32x32xf32>
    %cst_88 = arith.constant 0.000000e+00 : f32
    %316 = vector.broadcast %cst_88 : f32 to vector<32x32xf32>
    %317 = arith.maximumf %315, %316 : vector<32x32xf32>
    %318 = arith.truncf %317 : vector<32x32xf32> to vector<32x32xbf16>
    %cst_89 = arith.constant dense<0.000000e+00> : vector<32x32xf32>
    %319 = tpu.matmul %318, %222, %cst_89 {dimension_numbers = #tpu.dot_dimension_numbers<[1], [0], [0], [1], [0, 0, 1, 1], [], []>} : vector<32x32xbf16>, vector<32x32xbf16>, vector<32x32xf32> -> vector<32x32xf32>
    %320 = vector.extract_strided_slice %223 {offsets = [2, 0], sizes = [1, 32], strides = [1, 1]} : vector<8x32xf32> to vector<1x32xf32>
    %321 = vector.extract_strided_slice %223 {offsets = [3, 0], sizes = [1, 32], strides = [1, 1]} : vector<8x32xf32> to vector<1x32xf32>
    %cst_90 = arith.constant dense<0.000000e+00> : vector<32xf32>
    %322 = vector.multi_reduction <add>, %319, %cst_90 [0] : vector<32x32xf32> to vector<32xf32>
    %323 = vector.shape_cast %322 : vector<32xf32> to vector<1x32xf32>
    %cst_91 = arith.constant 3.200000e+01 : f32
    %324 = vector.broadcast %cst_91 : f32 to vector<1x32xf32>
    %325 = arith.divf %323, %324 : vector<1x32xf32>
    %326 = vector.broadcast %325 : vector<1x32xf32> to vector<32x32xf32>
    %327 = arith.subf %319, %326 : vector<32x32xf32>
    %328 = arith.mulf %327, %327 : vector<32x32xf32>
    %cst_92 = arith.constant dense<0.000000e+00> : vector<32xf32>
    %329 = vector.multi_reduction <add>, %328, %cst_92 [0] : vector<32x32xf32> to vector<32xf32>
    %330 = vector.shape_cast %329 : vector<32xf32> to vector<1x32xf32>
    %cst_93 = arith.constant 3.200000e+01 : f32
    %331 = vector.broadcast %cst_93 : f32 to vector<1x32xf32>
    %332 = arith.divf %330, %331 : vector<1x32xf32>
    %333 = vector.broadcast %325 : vector<1x32xf32> to vector<32x32xf32>
    %334 = arith.subf %319, %333 : vector<32x32xf32>
    %cst_94 = arith.constant 9.99999974E-6 : f32
    %335 = vector.broadcast %cst_94 : f32 to vector<1x32xf32>
    %336 = arith.addf %332, %335 : vector<1x32xf32>
    %337 = math.rsqrt %336 : vector<1x32xf32>
    %338 = vector.broadcast %337 : vector<1x32xf32> to vector<32x32xf32>
    %339 = arith.mulf %334, %338 : vector<32x32xf32>
    %340 = vector.broadcast %320 : vector<1x32xf32> to vector<32x32xf32>
    %341 = arith.mulf %339, %340 : vector<32x32xf32>
    %342 = vector.broadcast %321 : vector<1x32xf32> to vector<32x32xf32>
    %343 = arith.addf %341, %342 : vector<32x32xf32>
    %344 = vector.extract_strided_slice %223 {offsets = [4, 0], sizes = [1, 32], strides = [1, 1]} : vector<8x32xf32> to vector<1x32xf32>
    %345 = vector.extract_strided_slice %223 {offsets = [5, 0], sizes = [1, 32], strides = [1, 1]} : vector<8x32xf32> to vector<1x32xf32>
    %cst_95 = arith.constant dense<0.000000e+00> : vector<32xf32>
    %346 = vector.multi_reduction <add>, %343, %cst_95 [1] : vector<32x32xf32> to vector<32xf32>
    %347 = vector.shape_cast %346 : vector<32xf32> to vector<32x1xf32>
    %cst_96 = arith.constant 3.200000e+01 : f32
    %348 = vector.broadcast %cst_96 : f32 to vector<32x1xf32>
    %349 = arith.divf %347, %348 : vector<32x1xf32>
    %350 = vector.broadcast %349 : vector<32x1xf32> to vector<32x32xf32>
    %351 = arith.subf %343, %350 : vector<32x32xf32>
    %352 = arith.mulf %351, %351 : vector<32x32xf32>
    %cst_97 = arith.constant dense<0.000000e+00> : vector<32xf32>
    %353 = vector.multi_reduction <add>, %352, %cst_97 [1] : vector<32x32xf32> to vector<32xf32>
    %354 = vector.shape_cast %353 : vector<32xf32> to vector<32x1xf32>
    %cst_98 = arith.constant 3.200000e+01 : f32
    %355 = vector.broadcast %cst_98 : f32 to vector<32x1xf32>
    %356 = arith.divf %354, %355 : vector<32x1xf32>
    %357 = vector.broadcast %349 : vector<32x1xf32> to vector<32x32xf32>
    %358 = arith.subf %343, %357 : vector<32x32xf32>
    %cst_99 = arith.constant 9.99999974E-6 : f32
    %359 = vector.broadcast %cst_99 : f32 to vector<32x1xf32>
    %360 = arith.addf %356, %359 : vector<32x1xf32>
    %361 = math.rsqrt %360 : vector<32x1xf32>
    %362 = vector.broadcast %361 : vector<32x1xf32> to vector<32x32xf32>
    %363 = arith.mulf %358, %362 : vector<32x32xf32>
    %364 = vector.broadcast %344 : vector<1x32xf32> to vector<32x32xf32>
    %365 = arith.mulf %363, %364 : vector<32x32xf32>
    %366 = vector.broadcast %345 : vector<1x32xf32> to vector<32x32xf32>
    %367 = arith.addf %365, %366 : vector<32x32xf32>
    %368 = vector.extract_strided_slice %53 {offsets = [0, 1], sizes = [2, 1], strides = [1, 1]} : vector<2x3xf32> to vector<2x1xf32>
    %369 = vector.broadcast %226 : f32 to vector<2x1xf32>
    %370 = arith.mulf %369, %368 : vector<2x1xf32>
    %371 = vector.shape_cast %370 : vector<2x1xf32> to vector<2x1x1xf32>
    %372 = vector.shape_cast %367 : vector<32x32xf32> to vector<2x16x32xf32>
    %373 = vector.broadcast %371 : vector<2x1x1xf32> to vector<2x16x32xf32>
    %374 = arith.mulf %373, %372 : vector<2x16x32xf32>
    %375 = arith.addf %215, %374 : vector<2x16x32xf32>
    %c0_100 = arith.constant 0 : index
    %c0_101 = arith.constant 0 : index
    %c0_102 = arith.constant 0 : index
    %376 = vector.load %arg7[%c0_100, %c0_101, %c0_102] : memref<1x80x32xf32, #tpu.memory_space<vmem>>, vector<1x80x32xf32>
    %377 = vector.shape_cast %376 : vector<1x80x32xf32> to vector<80x32xf32>
    %378 = vector.extract_strided_slice %377 {offsets = [0, 0], sizes = [32, 32], strides = [1, 1]} : vector<80x32xf32> to vector<32x32xf32>
    %379 = arith.truncf %378 : vector<32x32xf32> to vector<32x32xbf16>
    %380 = vector.extract_strided_slice %377 {offsets = [32, 0], sizes = [32, 32], strides = [1, 1]} : vector<80x32xf32> to vector<32x32xf32>
    %381 = arith.truncf %380 : vector<32x32xf32> to vector<32x32xbf16>
    %382 = vector.extract_strided_slice %377 {offsets = [64, 0], sizes = [8, 32], strides = [1, 1]} : vector<80x32xf32> to vector<8x32xf32>
    %383 = vector.extract_strided_slice %377 {offsets = [72, 0], sizes = [8, 32], strides = [1, 1]} : vector<80x32xf32> to vector<8x32xf32>
    %c4 = arith.constant 4 : index
    %384 = memref.load %arg8[%c4] : memref<5xf32, #tpu.memory_space<smem>>
    %385 = vector.extract_strided_slice %382 {offsets = [0, 0], sizes = [1, 32], strides = [1, 1]} : vector<8x32xf32> to vector<1x32xf32>
    %386 = vector.extract_strided_slice %382 {offsets = [1, 0], sizes = [1, 32], strides = [1, 1]} : vector<8x32xf32> to vector<1x32xf32>
    %cst_103 = arith.constant dense<0.000000e+00> : vector<32xf32>
    %387 = vector.multi_reduction <add>, %2, %cst_103 [1] : vector<32x32xf32> to vector<32xf32>
    %388 = vector.shape_cast %387 : vector<32xf32> to vector<32x1xf32>
    %cst_104 = arith.constant 3.200000e+01 : f32
    %389 = vector.broadcast %cst_104 : f32 to vector<32x1xf32>
    %390 = arith.divf %388, %389 : vector<32x1xf32>
    %391 = vector.broadcast %390 : vector<32x1xf32> to vector<32x32xf32>
    %392 = arith.subf %2, %391 : vector<32x32xf32>
    %393 = arith.mulf %392, %392 : vector<32x32xf32>
    %cst_105 = arith.constant dense<0.000000e+00> : vector<32xf32>
    %394 = vector.multi_reduction <add>, %393, %cst_105 [1] : vector<32x32xf32> to vector<32xf32>
    %395 = vector.shape_cast %394 : vector<32xf32> to vector<32x1xf32>
    %cst_106 = arith.constant 3.200000e+01 : f32
    %396 = vector.broadcast %cst_106 : f32 to vector<32x1xf32>
    %397 = arith.divf %395, %396 : vector<32x1xf32>
    %398 = vector.broadcast %390 : vector<32x1xf32> to vector<32x32xf32>
    %399 = arith.subf %2, %398 : vector<32x32xf32>
    %cst_107 = arith.constant 9.99999974E-6 : f32
    %400 = vector.broadcast %cst_107 : f32 to vector<32x1xf32>
    %401 = arith.addf %397, %400 : vector<32x1xf32>
    %402 = math.rsqrt %401 : vector<32x1xf32>
    %403 = vector.broadcast %402 : vector<32x1xf32> to vector<32x32xf32>
    %404 = arith.mulf %399, %403 : vector<32x32xf32>
    %405 = vector.broadcast %385 : vector<1x32xf32> to vector<32x32xf32>
    %406 = arith.mulf %404, %405 : vector<32x32xf32>
    %407 = vector.broadcast %386 : vector<1x32xf32> to vector<32x32xf32>
    %408 = arith.addf %406, %407 : vector<32x32xf32>
    %409 = arith.truncf %408 : vector<32x32xf32> to vector<32x32xbf16>
    %cst_108 = arith.constant dense<0.000000e+00> : vector<32x32xf32>
    %410 = tpu.matmul %409, %379, %cst_108 {dimension_numbers = #tpu.dot_dimension_numbers<[1], [0], [0], [1], [0, 0, 1, 1], [], []>} : vector<32x32xbf16>, vector<32x32xbf16>, vector<32x32xf32> -> vector<32x32xf32>
    %411 = vector.extract_strided_slice %383 {offsets = [0, 0], sizes = [1, 32], strides = [1, 1]} : vector<8x32xf32> to vector<1x32xf32>
    %412 = vector.extract_strided_slice %383 {offsets = [1, 0], sizes = [1, 32], strides = [1, 1]} : vector<8x32xf32> to vector<1x32xf32>
    %cst_109 = arith.constant dense<0.000000e+00> : vector<32xf32>
    %413 = vector.multi_reduction <add>, %410, %cst_109 [0] : vector<32x32xf32> to vector<32xf32>
    %414 = vector.shape_cast %413 : vector<32xf32> to vector<1x32xf32>
    %cst_110 = arith.constant 3.200000e+01 : f32
    %415 = vector.broadcast %cst_110 : f32 to vector<1x32xf32>
    %416 = arith.divf %414, %415 : vector<1x32xf32>
    %417 = vector.broadcast %416 : vector<1x32xf32> to vector<32x32xf32>
    %418 = arith.subf %410, %417 : vector<32x32xf32>
    %419 = arith.mulf %418, %418 : vector<32x32xf32>
    %cst_111 = arith.constant dense<0.000000e+00> : vector<32xf32>
    %420 = vector.multi_reduction <add>, %419, %cst_111 [0] : vector<32x32xf32> to vector<32xf32>
    %421 = vector.shape_cast %420 : vector<32xf32> to vector<1x32xf32>
    %cst_112 = arith.constant 3.200000e+01 : f32
    %422 = vector.broadcast %cst_112 : f32 to vector<1x32xf32>
    %423 = arith.divf %421, %422 : vector<1x32xf32>
    %424 = vector.broadcast %416 : vector<1x32xf32> to vector<32x32xf32>
    %425 = arith.subf %410, %424 : vector<32x32xf32>
    %cst_113 = arith.constant 9.99999974E-6 : f32
    %426 = vector.broadcast %cst_113 : f32 to vector<1x32xf32>
    %427 = arith.addf %423, %426 : vector<1x32xf32>
    %428 = math.rsqrt %427 : vector<1x32xf32>
    %429 = vector.broadcast %428 : vector<1x32xf32> to vector<32x32xf32>
    %430 = arith.mulf %425, %429 : vector<32x32xf32>
    %431 = vector.broadcast %411 : vector<1x32xf32> to vector<32x32xf32>
    %432 = arith.mulf %430, %431 : vector<32x32xf32>
    %433 = vector.broadcast %412 : vector<1x32xf32> to vector<32x32xf32>
    %434 = arith.addf %432, %433 : vector<32x32xf32>
    %435 = arith.truncf %434 : vector<32x32xf32> to vector<32x32xbf16>
    %cst_114 = arith.constant dense<0.000000e+00> : vector<32x32xf32>
    %436 = tpu.matmul %435, %381, %cst_114 {dimension_numbers = #tpu.dot_dimension_numbers<[1], [0], [0], [1], [0, 0, 1, 1], [], []>} : vector<32x32xbf16>, vector<32x32xbf16>, vector<32x32xf32> -> vector<32x32xf32>
    %437 = vector.extract_strided_slice %382 {offsets = [2, 0], sizes = [1, 32], strides = [1, 1]} : vector<8x32xf32> to vector<1x32xf32>
    %438 = vector.extract_strided_slice %382 {offsets = [3, 0], sizes = [1, 32], strides = [1, 1]} : vector<8x32xf32> to vector<1x32xf32>
    %cst_115 = arith.constant dense<0.000000e+00> : vector<32xf32>
    %439 = vector.multi_reduction <add>, %436, %cst_115 [0] : vector<32x32xf32> to vector<32xf32>
    %440 = vector.shape_cast %439 : vector<32xf32> to vector<1x32xf32>
    %cst_116 = arith.constant 3.200000e+01 : f32
    %441 = vector.broadcast %cst_116 : f32 to vector<1x32xf32>
    %442 = arith.divf %440, %441 : vector<1x32xf32>
    %443 = vector.broadcast %442 : vector<1x32xf32> to vector<32x32xf32>
    %444 = arith.subf %436, %443 : vector<32x32xf32>
    %445 = arith.mulf %444, %444 : vector<32x32xf32>
    %cst_117 = arith.constant dense<0.000000e+00> : vector<32xf32>
    %446 = vector.multi_reduction <add>, %445, %cst_117 [0] : vector<32x32xf32> to vector<32xf32>
    %447 = vector.shape_cast %446 : vector<32xf32> to vector<1x32xf32>
    %cst_118 = arith.constant 3.200000e+01 : f32
    %448 = vector.broadcast %cst_118 : f32 to vector<1x32xf32>
    %449 = arith.divf %447, %448 : vector<1x32xf32>
    %450 = vector.broadcast %442 : vector<1x32xf32> to vector<32x32xf32>
    %451 = arith.subf %436, %450 : vector<32x32xf32>
    %cst_119 = arith.constant 9.99999974E-6 : f32
    %452 = vector.broadcast %cst_119 : f32 to vector<1x32xf32>
    %453 = arith.addf %449, %452 : vector<1x32xf32>
    %454 = math.rsqrt %453 : vector<1x32xf32>
    %455 = vector.broadcast %454 : vector<1x32xf32> to vector<32x32xf32>
    %456 = arith.mulf %451, %455 : vector<32x32xf32>
    %457 = vector.broadcast %437 : vector<1x32xf32> to vector<32x32xf32>
    %458 = arith.mulf %456, %457 : vector<32x32xf32>
    %459 = vector.broadcast %438 : vector<1x32xf32> to vector<32x32xf32>
    %460 = arith.addf %458, %459 : vector<32x32xf32>
    %461 = vector.extract_strided_slice %382 {offsets = [4, 0], sizes = [1, 32], strides = [1, 1]} : vector<8x32xf32> to vector<1x32xf32>
    %462 = vector.extract_strided_slice %382 {offsets = [5, 0], sizes = [1, 32], strides = [1, 1]} : vector<8x32xf32> to vector<1x32xf32>
    %cst_120 = arith.constant dense<0.000000e+00> : vector<32xf32>
    %463 = vector.multi_reduction <add>, %460, %cst_120 [1] : vector<32x32xf32> to vector<32xf32>
    %464 = vector.shape_cast %463 : vector<32xf32> to vector<32x1xf32>
    %cst_121 = arith.constant 3.200000e+01 : f32
    %465 = vector.broadcast %cst_121 : f32 to vector<32x1xf32>
    %466 = arith.divf %464, %465 : vector<32x1xf32>
    %467 = vector.broadcast %466 : vector<32x1xf32> to vector<32x32xf32>
    %468 = arith.subf %460, %467 : vector<32x32xf32>
    %469 = arith.mulf %468, %468 : vector<32x32xf32>
    %cst_122 = arith.constant dense<0.000000e+00> : vector<32xf32>
    %470 = vector.multi_reduction <add>, %469, %cst_122 [1] : vector<32x32xf32> to vector<32xf32>
    %471 = vector.shape_cast %470 : vector<32xf32> to vector<32x1xf32>
    %cst_123 = arith.constant 3.200000e+01 : f32
    %472 = vector.broadcast %cst_123 : f32 to vector<32x1xf32>
    %473 = arith.divf %471, %472 : vector<32x1xf32>
    %474 = vector.broadcast %466 : vector<32x1xf32> to vector<32x32xf32>
    %475 = arith.subf %460, %474 : vector<32x32xf32>
    %cst_124 = arith.constant 9.99999974E-6 : f32
    %476 = vector.broadcast %cst_124 : f32 to vector<32x1xf32>
    %477 = arith.addf %473, %476 : vector<32x1xf32>
    %478 = math.rsqrt %477 : vector<32x1xf32>
    %479 = vector.broadcast %478 : vector<32x1xf32> to vector<32x32xf32>
    %480 = arith.mulf %475, %479 : vector<32x32xf32>
    %481 = vector.broadcast %461 : vector<1x32xf32> to vector<32x32xf32>
    %482 = arith.mulf %480, %481 : vector<32x32xf32>
    %483 = vector.broadcast %462 : vector<1x32xf32> to vector<32x32xf32>
    %484 = arith.addf %482, %483 : vector<32x32xf32>
    %485 = vector.extract_strided_slice %53 {offsets = [0, 2], sizes = [2, 1], strides = [1, 1]} : vector<2x3xf32> to vector<2x1xf32>
    %486 = vector.broadcast %384 : f32 to vector<2x1xf32>
    %487 = arith.mulf %486, %485 : vector<2x1xf32>
    %488 = vector.shape_cast %487 : vector<2x1xf32> to vector<2x1x1xf32>
    %489 = vector.shape_cast %484 : vector<32x32xf32> to vector<2x16x32xf32>
    %490 = vector.broadcast %488 : vector<2x1x1xf32> to vector<2x16x32xf32>
    %491 = arith.mulf %490, %489 : vector<2x16x32xf32>
    %492 = arith.addf %375, %491 : vector<2x16x32xf32>
    %493 = vector.shape_cast %492 : vector<2x16x32xf32> to vector<2x512xf32>
    %c0_125 = arith.constant 0 : index
    %c0_126 = arith.constant 0 : index
    %494 = vector.load %arg9[%c0_125, %c0_126] : memref<2x512xf32, #tpu.memory_space<vmem>>, vector<2x512xf32>
    tpu.vector_store %arg9[%c0_125, %c0_126], %493 {strides = array<i32>} : memref<2x512xf32, #tpu.memory_space<vmem>>, vector<2x512xf32>,
    return
  }
}

</mosaic_0001>

<bundles_post_ra>
// kernel: squeeze.3
= control target key start
LH: loop header
LB: loop body
LE: loop exit
PB: predicated region body
PF: predicated region fallthrough
CT: control target
= control target key end

     0   :  { %s7_s6 = smov 3  ;;  %s21_s9 = smov 3  ;;  %vm4_vm0 = vcmask 64512   ;;  %vm11_vm1 = vcmask 1048512   ;;  %vm18_vm2 = vcmask 982912   ;;  %vm25_vm3 = vcmask 917312   ;;  %s223_s0 = inlined_call_operand.vmem [shape: f32[2,16,8,1], index: 0, kind: input, shape index: {}]   ;;  %s224_s1 = inlined_call_operand.vmem [shape: f32[2,128], index: 1, kind: output, shape index: {}]  }
   0x1   :  { %v117_v0 = vld [vmem:[%s223_s0 + $0xf] ss:$16 sm:%s7_s6]   ;;  %s147_s10 = smov 120   ;;  %v119_v1 = vld [vmem:[%s223_s0 + $0xd] ss:$16 sm:%s21_s9]   ;;  %s14_s13 = smov 3 }
   0x2   :  { %9 = vrot.lane.b32.xlu0 %v117_v0, %s147_s10  ;;  %s148_s14 = smov 104   ;;  %v118_v2 = vld [vmem:[%s223_s0 + $0xe] ss:$16 sm:%s14_s13]   ;;  %s28_s17 = smov 3  ;;  %vm32_vm4 = vcmask 851712   ;;  %vm39_vm5 = vcmask 786112  }
   0x3   :  { %23 = vrot.lane.b32.xlu1 %v119_v1, %s148_s14  ;;  %v120_v3 = vld [vmem:[%s223_s0 + $0xc] ss:$16 sm:%s28_s17]   ;;  %s35_s20 = smov 3  ;;  %s42_s21 = smov 3  ;;  %vm46_vm6 = vcmask 720512   ;;  %vm53_vm7 = vcmask 654912  }
   0x4   :  { %s149_s22 = smov 112   ;;  %s150_s23 = smov 96   ;;  %v121_v4 = vld [vmem:[%s223_s0 + $0xb] ss:$16 sm:%s35_s20]   ;;  %v122_v5 = vld [vmem:[%s223_s0 + $0xa] ss:$16 sm:%s42_s21]  }
   0x5   :  { %s49_s28 = smov 3  ;;  %s56_s29 = smov 3  ;;  %vm60_vm8 = vcmask 589312   ;;  %vm67_vm9 = vcmask 523712   ;;  %vm74_vm10 = vcmask 458112   ;;  %vm81_vm11 = vcmask 392512  }
   0x6   :  { %16 = vrot.lane.b32.xlu0 %v118_v2, %s149_s22  ;;  %s151_s30 = smov 88   ;;  %s152_s2 = smov 80   ;;  %v123_v6 = vld [vmem:[%s223_s0 + $0x9] ss:$16 sm:%s49_s28]   ;;  %vm88_vm12 = vcmask 326912   ;;  %vm95_vm13 = vcmask 261312  }
   0x7   :  { %30 = vrot.lane.b32.xlu1 %v120_v3, %s150_s23  ;;  %v124_v7 = vld [vmem:[%s223_s0 + $0x8] ss:$16 sm:%s56_s29]   ;;  %s63_s7 = smov 3  ;;  %s70_s8 = smov 3  ;;  %vm102_vm14 = vcmask 195712   ;;  %vm109_vm15 = vcmask 130112  }
   0x8   :  { %s153_s9 = smov 72   ;;  %s154_s10 = smov 64   ;;  %v125_v8 = vld [vmem:[%s223_s0 + $0x7] ss:$16 sm:%s63_s7]   ;;  %v126_v9 = vld [vmem:[%s223_s0 + $0x6] ss:$16 sm:%s70_s8]  }
   0x9   :  { %s2_s13 = smov 3  ;;  %s77_s16 = smov 3 }
   0xa   :  { %37 = vrot.lane.b32.xlu0 %v121_v4, %s151_s30  ;;  %v3_v10 = vld [vmem:[%s223_s0] ss:$16 sm:%s2_s13]   ;;  %s84_s19 = smov 3  ;;  %s155_s20 = smov 56  }
   0xb   :  { %44 = vrot.lane.b32.xlu1 %v122_v5, %s152_s2  ;;  %5 = vst.msk [vmem:[#allocation0] sm:$0x3] %vm4_vm0, %v3_v10   ;;  %s156_s21 = smov 48   ;;  %v127_v11 = vld [vmem:[%s223_s0 + $0x5] ss:$16 sm:%s77_s16]   ;;  %s91_s26 = smov 3 }
   0xc   :  { %v128_v12 = vld [vmem:[%s223_s0 + $0x4] ss:$16 sm:%s84_s19]   ;;  %s98_s27 = smov 3  ;;  %s157_s28 = smov 40   ;;  %v129_v13 = vld [vmem:[%s223_s0 + $0x3] ss:$16 sm:%s91_s26]  }
   0xd   :  { %s158_s29 = smov 32   ;;  %v130_v14 = vld [vmem:[%s223_s0 + $0x2] ss:$16 sm:%s98_s27]   ;;  %s105_s5 = smov 3 }
   0xe   :  { %51 = vrot.lane.b32.xlu0 %v123_v6, %s153_s9  ;;  %s159_s6 = smov 24   ;;  %s160_s7 = smov 16   ;;  %v131_v15 = vld [vmem:[%s223_s0 + $0x1] ss:$16 sm:%s105_s5]  }
   0xf   :  { %58 = vrot.lane.b32.xlu1 %v124_v7, %s154_s10  ;;  %s161_s0 = smov 8  }
  0x12   :  { %65 = vrot.lane.b32.xlu0 %v125_v8, %s155_s20 }
  0x13   :  { %72 = vrot.lane.b32.xlu1 %v126_v9, %s156_s21 }
  0x16   :  { %79 = vrot.lane.b32.xlu0 %v127_v11, %s157_s28 }
  0x17   :  { %86 = vrot.lane.b32.xlu1 %v128_v12, %s158_s29 }
  0x1a   :  { %93 = vrot.lane.b32.xlu0 %v129_v13, %s159_s6 }
  0x1b   :  { %100 = vrot.lane.b32.xlu1 %v130_v14, %s160_s7 }
  0x1e   :  { %107 = vrot.lane.b32.xlu0 %v131_v15, %s161_s0 }
  0x74   :  { %v10_v16 = vpop.permute.xlu0 %9  }
  0x75   :  { %12 = vst.msk [vmem:[#allocation0] sm:$0x3] %vm11_vm1, %v10_v16   ;;  %v24_v17 = vpop.permute.xlu1 %23  }
  0x78   :  { %v17_v18 = vpop.permute.xlu0 %16  }
  0x79   :  { %19 = vst.msk [vmem:[#allocation0] sm:$0x3] %vm18_vm2, %v17_v18   ;;  %v31_v19 = vpop.permute.xlu1 %30  }
  0x7a   :  { %26 = vst.msk [vmem:[#allocation0] sm:$0x3] %vm25_vm3, %v24_v17  }
  0x7b   :  { %33 = vst.msk [vmem:[#allocation0] sm:$0x3] %vm32_vm4, %v31_v19  }
  0x7c   :  { %v38_v20 = vpop.permute.xlu0 %37  }
  0x7d   :  { %40 = vst.msk [vmem:[#allocation0] sm:$0x3] %vm39_vm5, %v38_v20   ;;  %v45_v21 = vpop.permute.xlu1 %44  }
  0x7e   :  { %47 = vst.msk [vmem:[#allocation0] sm:$0x3] %vm46_vm6, %v45_v21  }
  0x80   :  { %v52_v22 = vpop.permute.xlu0 %51  }
  0x81   :  { %54 = vst.msk [vmem:[#allocation0] sm:$0x3] %vm53_vm7, %v52_v22   ;;  %v59_v23 = vpop.permute.xlu1 %58  }
  0x82   :  { %61 = vst.msk [vmem:[#allocation0] sm:$0x3] %vm60_vm8, %v59_v23  }
  0x84   :  { %v66_v24 = vpop.permute.xlu0 %65  }
  0x85   :  { %68 = vst.msk [vmem:[#allocation0] sm:$0x3] %vm67_vm9, %v66_v24   ;;  %v73_v25 = vpop.permute.xlu1 %72  }
  0x86   :  { %75 = vst.msk [vmem:[#allocation0] sm:$0x3] %vm74_vm10, %v73_v25  }
  0x88   :  { %v80_v26 = vpop.permute.xlu0 %79  }
  0x89   :  { %82 = vst.msk [vmem:[#allocation0] sm:$0x3] %vm81_vm11, %v80_v26   ;;  %v87_v27 = vpop.permute.xlu1 %86  }
  0x8a   :  { %89 = vst.msk [vmem:[#allocation0] sm:$0x3] %vm88_vm12, %v87_v27  }
  0x8c   :  { %v94_v28 = vpop.permute.xlu0 %93  }
  0x8d   :  { %96 = vst.msk [vmem:[#allocation0] sm:$0x3] %vm95_vm13, %v94_v28   ;;  %v101_v29 = vpop.permute.xlu1 %100  }
  0x8e   :  { %103 = vst.msk [vmem:[#allocation0] sm:$0x3] %vm102_vm14, %v101_v29  }
  0x90   :  { %v108_v30 = vpop.permute.xlu0 %107  }
  0x91   :  { %110 = vst.msk [vmem:[#allocation0] sm:$0x3] %vm109_vm15, %v108_v30  }
  0x98   :  { %v114_v31 = vld [vmem:[#allocation0] sm:$0x3] }
  0x99   :  { %116 = vst [vmem:[%s224_s1] sm:$0x3] %v114_v31 }

// kernel: moe_adapter_forward.1
= control target key start
LH: loop header
LB: loop body
LE: loop exit
PB: predicated region body
PF: predicated region fallthrough
CT: control target
= control target key end

     0   :  { %16 = vsyncpa [#allocation3], 0  ;;  %s4510_s0 = inlined_call_operand.vmem [shape: f32[2,16,32], index: 0, kind: input, shape index: {}]   ;;  %s4511_s1 = inlined_call_operand.vmem [shape: f32[2,128], index: 1, kind: input, shape index: {}]   ;;  %s4512_s2 = inlined_call_operand.vmem [shape: f32[2,3], index: 2, kind: input, shape index: {}]   ;;  %s4513_s3 = inlined_call_operand.vmem [shape: bf16[144,256], index: 3, kind: input, shape index: {}]   ;;  %s4514_s4 = inlined_call_operand.vmem [shape: bf16[80,128], index: 4, kind: input, shape index: {}]   ;;  %s4515_s5 = inlined_call_operand.vmem [shape: bf16[176,32], index: 5, kind: input, shape index: {}]   ;;  %s4516_s6 = inlined_call_operand.vmem [shape: f32[2,88,32], index: 6, kind: input, shape index: {}]   ;;  %s4517_s7 = inlined_call_operand.vmem [shape: f32[1,80,32], index: 7, kind: input, shape index: {}]   ;;  %s4518_s8 = inlined_call_operand.vmem [shape: f32[5], index: 8, kind: input, shape index: {}]   ;;  %s4519_s9 = inlined_call_operand.vmem [shape: f32[2,512], index: 9, kind: output, shape index: {0}]   ;;  %s4520_s10 = inlined_call_operand.vmem [shape: f32[2,3], index: 10, kind: output, shape index: {1}]  }
   0x1   :  { %s39_s15 = sshll.u32 %s4518_s8, 4  ;;  %s40_s15 = int_to_ptr.vmem [resolvable:$true] %s39_s15 }
   0x2   :  { %s3512_s16 = scalar_lea.vmem %s40_s15, 16  ;;  %p3517_p1 = scmp.lt.s32.totalorder %s40_s15, %s40_s15 }
   0x3   :  { %p3513_p0 = scmp.ne.s32.totalorder %s40_s15, %s3512_s16  ;;  %p3518_p2 = scmp.lt.s32.totalorder %s3512_s16, %s3512_s16 }
   0x5   :  { %p3519_p3 = por %p3518_p2, %p3517_p1 }
   0x7   :  { %p3520_p4 = pnand %p3519_p3, %p3513_p0 }
   0x9   :  { %3523 = shalt.err (!%p3520_p4)
}
   0xa   :  { %s3526_s17 = smov [#allocation2]  }
   0xb   :  { %42 = dma.vmem_to_smem %s40_s15, 16, %s3526_s17, [#allocation3]  }
   0xc   :  { %3524 = dma.done.wait [#allocation3], 16  }
   0xd   :  { %3525 = vsyncadd [#allocation3], 4294967280 }
   0xe   :  { %46 = sfence }
   0xf   :  { %v3356_v0 = vld [vmem:[%s4513_s3 + $0x4] ss:$8 sps:$4 sm:$0xff]   ;;  %v3358_v1 = vld [vmem:[%s4513_s3] ss:$8 sps:$4 sm:$0xff]   ;;  %v3527_v2 = vmov 0   ;;  %v75_v19 = vlaneseq  ;;  %s3529_s12 = smov 96  }
  0x10   :  { %195 = vmatprep.mubr.bf16.mxu0 %v3527_v2  ;;  %3352 = vset.pattern.permute.xlu1 %v3527_v2  ;;  %v3359_v3 = vld [vmem:[%s4513_s3 + $0x14] ss:$8 sps:$4 sm:$0xff]   ;;  %v3361_v4 = vld [vmem:[%s4513_s3 + $0x10] ss:$8 sps:$4 sm:$0xff]   ;;  %v3362_v5 = vld [vmem:[%s4513_s3 + $0x24] ss:$8 sps:$4 sm:$0xff]  }
  0x11   :  { %163 = vmatprep.subr.bf16.mxu0 %v3356_v0  ;;  %3351 = vset.pattern.permute.xlu0 %v3527_v2  ;;  %v3364_v6 = vld [vmem:[%s4513_s3 + $0x20] ss:$8 sps:$4 sm:$0xff]   ;;  %v3365_v7 = vld [vmem:[%s4513_s3 + $0x34] ss:$8 sps:$4 sm:$0xff]   ;;  %v3367_v8 = vld [vmem:[%s4513_s3 + $0x30] ss:$8 sps:$4 sm:$0xff]  }
  0x12   :  { %164 = vmatpush1.bf16.msra.mxu0 %v3358_v1  ;;  %v3368_v9 = vld [vmem:[%s4513_s3 + $0x44] ss:$8 sps:$4 sm:$0xff]   ;;  %v3370_v10 = vld [vmem:[%s4513_s3 + $0x40] ss:$8 sps:$4 sm:$0xff]   ;;  %v3371_v11 = vld [vmem:[%s4513_s3 + $0x54] ss:$8 sps:$4 sm:$0xff]  }
  0x13   :  { %165 = vmatprep.subr.bf16.mxu0 %v3359_v3  ;;  %v3373_v12 = vld [vmem:[%s4513_s3 + $0x50] ss:$8 sps:$4 sm:$0xff]   ;;  %v3374_v13 = vld [vmem:[%s4513_s3 + $0x64] ss:$8 sps:$4 sm:$0xff]   ;;  %v3376_v14 = vld [vmem:[%s4513_s3 + $0x60] ss:$8 sps:$4 sm:$0xff]  }
  0x14   :  { %v3377_v15 = vld [vmem:[%s4513_s3 + $0x74] ss:$8 sps:$4 sm:$0xff]   ;;  %v3379_v16 = vld [vmem:[%s4513_s3 + $0x70] ss:$8 sps:$4 sm:$0xff]   ;;  %v73_v17 = vld [vmem:[%s4511_s1] sm:$0x3] }
  0x15   :  { %v74_v18 = vpack.c.bf16 %v73_v17, %v73_v17  ;;  %v3647_v20 = vshrl.u32 %v75_v19, 7  ;;  %v70_v21 = vld [vmem:[%s4513_s3 + $0x80] sm:$0x11]  ;;  %s3528_s1 = smov 32   ;;  %s3530_s3 = smov 64   ;;  %v3531_v34 = vmov 0.0  }
  0x16   :  { %166 = vmatpush1.bf16.msra.mxu0 %v3361_v4  ;;  %v71_v22 = vunpack.c.l.bf16 %v70_v21  ;;  %v72_v25 = vunpack.c.h.bf16 %v70_v21  ;;  %v3380_v33 = vld [vmem:[%s4514_s4] sm:$0xff]   ;;  %3155 = vmatprep.subr.bf16.mxu1 %v3531_v34  ;;  %v3381_v35 = vld [vmem:[%s4514_s4 + $0x8] sm:$0xff]   ;;  %v3382_v36 = vld [vmem:[%s4514_s4 + $0x10] sm:$0xff]   ;;  %v3532_v37 = vmov 1983009808   ;;  %vm276_vm0 = vcmask 261120  }
  0x17   :  { %167 = vmatprep.subr.bf16.mxu0 %v3362_v5  ;;  %v3653_v23 = vsub.s32 0, %v3647_v20  ;;  %3156 = vmatpush3.bf16.msra.mxu1 %v3380_v33  ;;  %v226_v38 = vunpack.c.l.s4 %v3532_v37  ;;  %v3533_v42 = vmov 1934713408   ;;  %v3383_v5 = vld [vmem:[%s4514_s4 + $0x18] sm:$0xff]   ;;  %vm3534_vm1 = vmmov 0   ;;  %v3710_v19 = vld [vmem:[%s4510_s0] sm:$0xff] }
  0x18   :  { %3157 = vmatprep.subr.bf16.mxu1 %v3531_v34  ;;  %v258_v43 = vunpack.c.l.s4 %v3533_v42  ;;  %3163 = vmatprep.mubr.msk.bf16.mxu1 %vm3534_vm1, %v3531_v34  ;;  %vm317_vm2 = vcmask 1041409   ;;  %v3715_v21 = vld [vmem:[%s4510_s0 + $0x8] sm:$0xff]  ;;  %vm366_vm3 = vcmask 523264   ;;  %vm733_vm4 = vcmask 1043456   ;;  %s613_s13 = sld [smem:[#allocation2]]  ;;  %s3063_s14 = sld [smem:[#allocation2 + $0x1]] }
  0x19   :  { %v78_v24 = vrot.slane %v71_v22, %v3653_v23  ;;  %v82_v28 = vrot.slane %v72_v25, %v3653_v23  ;;  %v227_v41 = vunpack.c.0.s8 %v226_v38  ;;  %v3720_v22 = vld [vmem:[%s4510_s0 + $0x10] sm:$0xff]  ;;  %v3729_v25 = vsel %vm276_vm0, %v3710_v19, 0.0  ;;  %s3064_s17 = sld [smem:[#allocation2 + $0x3]]  ;;  %s3077_s18 = sld [smem:[#allocation2 + $0x4]] }
  0x1a   :  { %168 = vmatpush1.bf16.msra.mxu0 %v3364_v6  ;;  %v259_v49 = vunpack.c.0.s8 %v258_v43  ;;  %vm705_vm5 = vcmask 64512   ;;  %vm585_vm6 = vcmask 17408   ;;  %vm2964_vm7 = vcmask 785408  }
  0x1b   :  { %169 = vmatprep.subr.bf16.mxu0 %v3365_v7  ;;  %3158 = vmatpush3.bf16.msra.mxu1 %v3381_v35  ;;  %v3678_v46 = vsub.s32 %v227_v41, %v3647_v20 }
  0x1c   :  { %3159 = vmatprep.subr.bf16.mxu1 %v3531_v34  ;;  %v3683_v56 = vsub.s32 %v259_v49, %v3647_v20 }
  0x1e   :  { %170 = vmatpush1.bf16.msra.mxu0 %v3367_v8 }
  0x1f   :  { %171 = vmatprep.subr.bf16.mxu0 %v3368_v9  ;;  %3160 = vmatpush3.bf16.msra.mxu1 %v3382_v36 }
  0x20   :  { %3161 = vmatprep.subr.bf16.mxu1 %v3531_v34 }
  0x22   :  { %172 = vmatpush1.bf16.msra.mxu0 %v3370_v10 }
  0x23   :  { %173 = vmatprep.subr.bf16.mxu0 %v3371_v11  ;;  %3162 = vmatpush3.bf16.msra.mxu1 %v3383_v5 }
  0x24   :  { %3167 = vmatprep.subr.bf16.mxu1 %v3531_v34 }
  0x26   :  { %174 = vmatpush1.bf16.msra.mxu0 %v3373_v12 }
  0x27   :  { %175 = vmatprep.subr.bf16.mxu0 %v3374_v13 }
  0x2a   :  { %176 = vmatpush1.bf16.msra.mxu0 %v3376_v14 }
  0x2b   :  { %177 = vmatprep.subr.bf16.mxu0 %v3377_v15 }
  0x2e   :  { %178 = vmatpush1.bf16.msra.mxu0 %v3379_v16 }
  0x2f   :  { %3187 = vmatprep.subr.bf16.mxu0 %v3531_v34 }
  0x31   :  { %196 = vmatmul.mubr.bf16.vlgmr.msra.gmra.mrb[0].mxu0 %v74_v18 }
  0x32   :  { %3191 = vmatprep.mubr.msk.bf16.mxu0 %vm3534_vm1, %v3531_v34 }
 0x104   :  { %v197_v26 = vpop.f32.mrb[0].mxu0 }
 0x105   :  { %v198_v27 = vadd.f32 %v197_v26, %v78_v24  ;;  %v199_v29 = vpop.f32.mrb[1].mxu0  ;;  %v3725_v24 = vld [vmem:[%s4510_s0 + $0x18] sm:$0xff]  ;;  %v3733_v26 = vsel %vm276_vm0, %v3715_v21, 0.0 }
 0x106   :  { %v201_v30 = vpop.f32.mrb[2].mxu0  ;;  %v200_v32 = vadd.f32 %v199_v29, %v82_v28  ;;  %v3741_v28 = vsel %vm276_vm0, %v3725_v24, 0.0  ;;  %v279_v29 = vadd.f32 %v3733_v26, %v3729_v25 }
 0x107   :  { %v202_v31 = vpop.f32.mrb[3].mxu0  ;;  %211 = vrot.lane.b32.xlu1 %v198_v27, %s3528_s1  ;;  %205 = vrot.lane.b32.xlu0 %v198_v27, %s3529_s12 }
 0x108   :  { %v280_v31 = vrot.slane %v279_v29, 4 }
 0x10a   :  { %v281_v33 = vadd.f32 %v280_v31, %v279_v29 }
 0x10b   :  { %215 = vrot.lane.b32.xlu1 %v200_v32, %s3529_s12  ;;  %208 = vrot.lane.b32.xlu0 %v198_v27, %s3530_s3 }
 0x10c   :  { %v282_v36 = vrot.slane %v281_v33, 2 }
 0x10e   :  { %v283_v38 = vadd.f32 %v282_v36, %v281_v33 }
 0x10f   :  { %221 = vrot.lane.b32.xlu1 %v200_v32, %s3528_s1  ;;  %218 = vrot.lane.b32.xlu0 %v200_v32, %s3530_s3 }
 0x179   :  { %v212_v39 = vpop.permute.xlu1 %211  ;;  %v206_v40 = vpop.permute.xlu0 %205 }
 0x17a   :  { %v232_v47 = vcombine.low %v206_v40, %v212_v39  ;;  %v284_v40 = vrot.slane %v283_v38, 1 }
 0x17c   :  { %v239_v53 = vrot.slane %v232_v47, %v3678_v46  ;;  %v285_v42 = vadd.f32 %v284_v40, %v283_v38 }
 0x17d   :  { %v216_v44 = vpop.permute.xlu1 %215  ;;  %v209_v45 = vpop.permute.xlu0 %208 }
 0x17e   :  { %v224_v48 = vcombine.low %v198_v27, %v209_v45  ;;  %v3737_v27 = vsel %vm276_vm0, %v3720_v22, 0.0 }
 0x17f   :  { %v288_v30 = vadd.f32 %v3741_v28, %v3737_v27 }
 0x180   :  { %v231_v50 = vrot.slane %v224_v48, %v3678_v46 }
 0x181   :  { %v222_v51 = vpop.permute.xlu1 %221  ;;  %v219_v52 = vpop.permute.xlu0 %218 }
 0x182   :  { %v248_v54 = vcombine.low %v216_v44, %v222_v51  ;;  %v240_v55 = vcombine.low %v200_v32, %v219_v52  ;;  %v256_v57 = vcombine.low %v231_v50, %v239_v53  ;;  %v289_v32 = vrot.slane %v288_v30, 4  ;;  %v3384_v50 = vld [vmem:[%s4515_s5] sm:$0xff]   ;;  %v3385_v52 = vld [vmem:[%s4515_s5 + $0x8] sm:$0xff]   ;;  %v3386_v53 = vld [vmem:[%s4515_s5 + $0x10] sm:$0xff]  }
 0x183   :  { %v296_v44 = vmul.f32 0.0625, %v285_v42 }
 0x184   :  { %v255_v58 = vrot.slane %v248_v54, %v3678_v46  ;;  %v247_v59 = vrot.slane %v240_v55, %v3678_v46  ;;  %v263_v61 = vrot.slane %v256_v57, %v3683_v56  ;;  %v290_v35 = vadd.f32 %v289_v32, %v288_v30  ;;  %v3387_v54 = vld [vmem:[%s4515_s5 + $0x18] sm:$0xff]   ;;  %v3388_v55 = vld [vmem:[%s4515_s5 + $0x20] sm:$0xff]   ;;  %v3389_v57 = vld [vmem:[%s4515_s5 + $0x28] sm:$0xff]  }
 0x185   :  { %v3819_v32 = vld [vmem:[%s4516_s6] sm:$0xff] }
 0x186   :  { %v264_v60 = vcombine.low %v247_v59, %v255_v58  ;;  %v291_v37 = vrot.slane %v290_v35, 2  ;;  %v3390_v58 = vld [vmem:[%s4515_s5 + $0x30] sm:$0xff]   ;;  %v3391_v59 = vld [vmem:[%s4515_s5 + $0x38] sm:$0xff]   ;;  %v615_v33 = vpack.c.bf16 %v3819_v32, %v3819_v32 }
 0x188   :  { %v271_v62 = vrot.slane %v264_v60, %v3683_v56  ;;  %v292_v39 = vadd.f32 %v291_v37, %v290_v35  ;;  %v3392_v60 = vld [vmem:[%s4515_s5 + $0x48] sm:$0xff]  }
 0x189   :  { %3188 = vmatpush3.bf16.msra.mxu0 %v3392_v60 }
 0x18a   :  { %v3689_v63 = vcombine.low %v263_v61, %v271_v62  ;;  %v3691_v0 = vcombine.high %v263_v61, %v271_v62  ;;  %v293_v41 = vrot.slane %v292_v39, 1  ;;  %v3393_v61 = vld [vmem:[%s4515_s5 + $0x50] sm:$0xff]   ;;  %3189 = vmatprep.subr.bf16.mxu0 %v3531_v34  ;;  %v335_v62 = vld [vmem:[%s4514_s4 + $0x20] sm:$0x1] }
 0x18c   :  { %v298_v1 = vsel %vm276_vm0, %v3689_v63, 0.0  ;;  %v305_v2 = vsel %vm276_vm0, %v3691_v0, 0.0  ;;  %v294_v43 = vadd.f32 %v293_v41, %v292_v39  ;;  %v275_v35 = vpack.c.bf16 %v3691_v0, %v3691_v0 }
 0x18d   :  { %v299_v3 = vrot.slane %v298_v1, 4  ;;  %v306_v4 = vrot.slane %v305_v2, 4  ;;  %3190 = vmatpush3.bf16.msra.mxu0 %v3393_v61 }
 0x18e   :  { %v297_v45 = vmul.f32 0.0625, %v294_v43  ;;  %3195 = vmatprep.subr.bf16.mxu0 %v3531_v34  ;;  %v3828_v36 = vsel %vm276_vm0, %v275_v35, 0  ;;  %v3836_v37 = vsel %vm733_vm4, %v275_v35, 0 }
 0x18f   :  { %v300_v6 = vadd.f32 %v299_v3, %v298_v1  ;;  %v307_v7 = vadd.f32 %v306_v4, %v305_v2  ;;  %v336_v1 = vunpack.c.l.bf16 %v335_v62 }
 0x190   :  { %v318_v47 = vsel %vm317_vm2, %v297_v45, %v296_v44 }
 0x191   :  { %v301_v8 = vrot.slane %v300_v6, 2  ;;  %v308_v9 = vrot.slane %v307_v7, 2  ;;  %v341_v2 = vrot.slane %v336_v1, %v3653_v23 }
 0x193   :  { %v302_v10 = vadd.f32 %v301_v8, %v300_v6  ;;  %v309_v11 = vadd.f32 %v308_v9, %v307_v7  ;;  %v274_v9 = vpack.c.bf16 %v3689_v63, %v3689_v63 }
 0x195   :  { %v303_v12 = vrot.slane %v302_v10, 1  ;;  %v310_v13 = vrot.slane %v309_v11, 1  ;;  %v3811_v31 = vsel %vm276_vm0, %v274_v9, 0 }
 0x197   :  { %v304_v14 = vadd.f32 %v303_v12, %v302_v10  ;;  %v311_v15 = vadd.f32 %v310_v13, %v309_v11  ;;  %v3799_v11 = vsel %vm733_vm4, %v274_v9, 0  ;;  %v427_v12 = vld [vmem:[%s4515_s5 + $0x40] sm:$0x1] }
 0x198   :  { %v428_v13 = vunpack.c.l.bf16 %v427_v12 }
 0x199   :  { %v313_v16 = vmul.f32 0.125, %v304_v14  ;;  %v314_v17 = vmul.f32 0.125, %v311_v15 }
 0x19a   :  { %v433_v63 = vrot.slane %v428_v13, %v3653_v23 }
 0x19b   :  { %v322_v18 = vsel %vm317_vm2, %v314_v17, %v313_v16 }
 0x19c   :  { %323 = vrot.lane.b32.xlu0 %v322_v18, %s3528_s1 }
 0x20e   :  { %v324_v48 = vpop.permute.xlu0 %323 }
 0x20f   :  { %v326_v49 = vsel %vm276_vm0, %v318_v47, %v324_v48 }
 0x210   :  { %v337_v51 = vpack.c.bf16 %v326_v49, %v326_v49 }
 0x212   :  { %3164 = vmatmul.mubr.msk.bf16.vlgmr.msra.gmra.mrb[0].mxu1 %vm366_vm3, %v337_v51 }
 0x213   :  { %3168 = vmatpush3.bf16.msra.mxu1 %v3384_v50  ;;  %3183 = vmatprep.mubr.msk.bf16.mxu1 %vm3534_vm1, %v3531_v34 }
 0x214   :  { %3169 = vmatprep.subr.bf16.mxu1 %v3531_v34 }
 0x217   :  { %3170 = vmatpush3.bf16.msra.mxu1 %v3385_v52 }
 0x218   :  { %3171 = vmatprep.subr.bf16.mxu1 %v3531_v34 }
 0x21b   :  { %3172 = vmatpush3.bf16.msra.mxu1 %v3386_v53 }
 0x21c   :  { %3173 = vmatprep.subr.bf16.mxu1 %v3531_v34 }
 0x21f   :  { %3174 = vmatpush3.bf16.msra.mxu1 %v3387_v54 }
 0x220   :  { %3175 = vmatprep.subr.bf16.mxu1 %v3531_v34 }
 0x223   :  { %3176 = vmatpush3.bf16.msra.mxu1 %v3388_v55 }
 0x224   :  { %3177 = vmatprep.subr.bf16.mxu1 %v3531_v34 }
 0x227   :  { %3178 = vmatpush3.bf16.msra.mxu1 %v3389_v57 }
 0x228   :  { %3179 = vmatprep.subr.bf16.mxu1 %v3531_v34 }
 0x22b   :  { %3180 = vmatpush3.bf16.msra.mxu1 %v3390_v58 }
 0x22c   :  { %3181 = vmatprep.subr.bf16.mxu1 %v3531_v34 }
 0x22f   :  { %3182 = vmatpush3.bf16.msra.mxu1 %v3391_v59 }
 0x230   :  { %3207 = vmatprep.subr.bf16.mxu1 %v3531_v34 }
 0x2e5   :  { %v404_v3 = vpop.f32.mrb[0].mxu1 }
 0x2e6   :  { %v405_v4 = vadd.f32 %v404_v3, %v341_v2  ;;  %v3165_v5 = vpop.f32.mrb[1].mxu1 }
 0x2e7   :  { %v407_v6 = vpop.f32.mrb[2].mxu1 }
 0x2e8   :  { %v410_v7 = vmax.f32 %v405_v4, 0.0  ;;  %v3166_v8 = vpop.f32.mrb[3].mxu1 }
 0x2ea   :  { %v429_v10 = vpack.c.bf16 %v410_v7, %v410_v7 }
 0x2ec   :  { %3184 = vmatmul.mubr.bf16.vlgmr.msra.gmra.mrb[4].mxu1 %v429_v10 }
 0x2ed   :  { %3208 = vmatpush3.bf16.msra.mxu1 %v3799_v11  ;;  %3209 = vmatprep.mubr.msk.bf16.mxu1 %vm3534_vm1, %v3531_v34 }
 0x2ee   :  { %3219 = vmatprep.subr.bf16.mxu1 %v3531_v34 }
 0x3bf   :  { %v516_v14 = vpop.f32.mrb[4].mxu1 }
 0x3c0   :  { %v517_v15 = vadd.f32 %v516_v14, %v433_v63  ;;  %v3185_v16 = vpop.f32.mrb[5].mxu1 }
 0x3c1   :  { %v519_v17 = vpop.f32.mrb[6].mxu1 }
 0x3c2   :  { %v522_v18 = vmax.f32 %v517_v15, 0.0  ;;  %v3186_v29 = vpop.f32.mrb[7].mxu1 }
 0x3c3   :  { %v3860_v29 = vpack.c.bf16 %v3715_v21, %v3710_v19 }
 0x3c4   :  { %v527_v30 = vpack.c.bf16 %v522_v18, %v522_v18 }
 0x3c6   :  { %3192 = vmatmul.mubr.msk.bf16.vlgmr.msra.gmra.mrb[4].mxu0 %vm276_vm0, %v527_v30 }
 0x3c7   :  { %3196 = vmatpush3.bf16.xpose.msra.mxu0 %v3811_v31  ;;  %3197 = vmatprep.mubr.msk.bf16.mxu0 %vm3534_vm1, %v3531_v34 }
 0x3c8   :  { %3201 = vmatprep.subr.bf16.mxu0 %v3531_v34 }
 0x3ce   :  { %3198 = vmatmul.mubr.msk.bf16.vlgmr.msra.gmra.mrb[8].mxu0 %vm276_vm0, %v615_v33 }
 0x3cf   :  { %3202 = vmatpush3.bf16.xpose.msra.mxu0 %v3828_v36  ;;  %3203 = vmatprep.mubr.msk.bf16.mxu0 %vm3534_vm1, %v3531_v34 }
 0x3d0   :  { %3213 = vmatprep.subr.bf16.mxu0 %v3531_v34 }
 0x3d6   :  { %3204 = vmatmul.mubr.msk.bf16.vlgmr.msra.gmra.mrb[12].mxu0 %vm276_vm0, %v615_v33 }
 0x3d7   :  { %3214 = vmatpush3.bf16.msra.mxu0 %v3836_v37  ;;  %3215 = vmatprep.mubr.msk.bf16.mxu0 %vm3534_vm1, %v3531_v34 }
 0x3d8   :  { %3225 = vmatprep.subr.bf16.mxu0 %v3531_v34 }
 0x499   :  { %v3842_v0 = vpop.f32.mrb[4].mxu0 }
 0x49a   :  { %v3193_v38 = vpop.f32.mrb[5].mxu0 }
 0x49b   :  { %v580_v39 = vpop.f32.mrb[6].mxu0 }
 0x49c   :  { %v3194_v40 = vpop.f32.mrb[7].mxu0 }
 0x4a1   :  { %v656_v41 = vpop.f32.mrb[8].mxu0 }
 0x4a2   :  { %v3199_v42 = vpop.f32.mrb[9].mxu0  ;;  %v706_v43 = vsel %vm705_vm5, %v656_v41, -inf }
 0x4a3   :  { %707 = vmax.xlane.f32.xlu1 %v706_v43  ;;  %v659_v44 = vpop.f32.mrb[10].mxu0 }
 0x4a4   :  { %v3200_v45 = vpop.f32.mrb[11].mxu0 }
 0x4a9   :  { %v699_v47 = vpop.f32.mrb[12].mxu0 }
 0x4aa   :  { %v3205_v48 = vpop.f32.mrb[13].mxu0  ;;  %v709_v49 = vsel %vm705_vm5, %v699_v47, -inf }
 0x4ab   :  { %710 = vmax.xlane.f32.xlu0 %v709_v49  ;;  %v702_v50 = vpop.f32.mrb[14].mxu0 }
 0x4ac   :  { %v3206_v51 = vpop.f32.mrb[15].mxu0 }
 0x530   :  { %v708_v52 = vpop.xlane.xlu1 %707 }
 0x531   :  { %v712_v53 = vsub.f32 %v656_v41, %v708_v52 }
 0x533   :  { %v714_v54 = vmul.f32 1.442695, %v712_v53 }
 0x535   :  { %3394 = vpow2.f32 %v714_v54 }
 0x538   :  { %v711_v55 = vpop.xlane.xlu0 %710 }
 0x539   :  { %v713_v57 = vsub.f32 %v699_v47, %v711_v55 }
 0x53b   :  { %v716_v58 = vmul.f32 1.442695, %v713_v57 }
 0x53d   :  { %3396 = vpow2.f32 %v716_v58 }
 0x53f   :  { %v3395_v59 = vpop.eup %3394 }
 0x540   :  { %v718_v60 = vsel %vm705_vm5, %v3395_v59, 0.0 }
 0x541   :  { %719 = vadd.xlane.f32.xlu0 %v718_v60 }
 0x547   :  { %v3397_v61 = vpop.eup %3396 }
 0x548   :  { %v721_v62 = vsel %vm705_vm5, %v3397_v61, 0.0 }
 0x549   :  { %722 = vadd.xlane.f32.xlu1 %v721_v62 }
 0x5ce   :  { %v720_v1 = vpop.xlane.xlu0 %719 }
 0x5cf   :  { %3398 = vrcp.f32 %v720_v1 }
 0x5d6   :  { %v723_v2 = vpop.xlane.xlu1 %722 }
 0x5d7   :  { %3400 = vrcp.f32 %v723_v2 }
 0x5d9   :  { %v3399_v3 = vpop.eup %3398 }
 0x5da   :  { %v726_v4 = vmul.f32 %v3399_v3, %v3395_v59 }
 0x5dc   :  { %v728_v5 = vpack.c.bf16 %v726_v4, %v726_v4 }
 0x5de   :  { %3210 = vmatmul.mubr.msk.bf16.vlgmr.msra.gmra.mrb[8].mxu1 %vm705_vm5, %v728_v5 }
 0x5df   :  { %3221 = vmatprep.mubr.msk.bf16.mxu1 %vm3534_vm1, %v3531_v34 }
 0x5e1   :  { %v3401_v6 = vpop.eup %3400 }
 0x5e2   :  { %v727_v7 = vmul.f32 %v3401_v6, %v3397_v61 }
 0x5e4   :  { %v729_v8 = vpack.c.bf16 %v727_v7, %v727_v7 }
 0x5e6   :  { %3216 = vmatmul.mubr.msk.bf16.vlgmr.msra.gmra.mrb[16].mxu0 %vm705_vm5, %v729_v8 }
 0x5e7   :  { %3227 = vmatprep.mubr.msk.bf16.mxu0 %vm3534_vm1, %v3531_v34 }
 0x6b1   :  { %v770_v9 = vpop.f32.mrb[8].mxu1 }
 0x6b2   :  { %v821_v10 = vadd.f32 %v770_v9, %v3819_v32  ;;  %v3211_v12 = vpop.f32.mrb[9].mxu1 }
 0x6b3   :  { %v773_v13 = vpop.f32.mrb[10].mxu1 }
 0x6b4   :  { %v823_v63 = vpack.c.bf16 %v821_v10, %v821_v10  ;;  %v3212_v14 = vpop.f32.mrb[11].mxu1 }
 0x6b6   :  { %v829_v15 = vsel %vm276_vm0, %v823_v63, 0  ;;  %v968_v38 = vsel %vm733_vm4, %v823_v63, 0 }
 0x6b7   :  { %3220 = vmatpush3.bf16.xpose.msra.mxu1 %v829_v15 }
 0x6b8   :  { %3231 = vmatprep.subr.bf16.mxu1 %v3531_v34 }
 0x6b9   :  { %v815_v16 = vpop.f32.mrb[16].mxu0 }
 0x6ba   :  { %v822_v17 = vadd.f32 %v815_v16, %v3819_v32  ;;  %v3217_v18 = vpop.f32.mrb[17].mxu0  ;;  %v3871_v32 = vpack.c.bf16 %v3725_v24, %v3720_v22 }
 0x6bb   :  { %v818_v30 = vpop.f32.mrb[18].mxu0 }
 0x6bc   :  { %v824_v33 = vpack.c.bf16 %v822_v17, %v822_v17  ;;  %v3218_v35 = vpop.f32.mrb[19].mxu0 }
 0x6be   :  { %v876_v39 = vsel %vm276_vm0, %v824_v33, 0  ;;  %3222 = vmatmul.mubr.msk.bf16.vlgmr.msra.gmra.mrb[12].mxu1 %vm276_vm0, %v3860_v29  ;;  %v1014_v40 = vsel %vm733_vm4, %v824_v33, 0 }
 0x6bf   :  { %3226 = vmatpush3.bf16.xpose.msra.mxu0 %v876_v39  ;;  %3232 = vmatpush3.bf16.msra.mxu1 %v968_v38 }
 0x6c0   :  { %3237 = vmatprep.subr.bf16.mxu0 %v3531_v34  ;;  %3233 = vmatprep.mubr.msk.bf16.mxu1 %vm3534_vm1, %v3531_v34 }
 0x6c6   :  { %3228 = vmatmul.mubr.msk.bf16.vlgmr.msra.gmra.mrb[20].mxu0 %vm276_vm0, %v3871_v32 }
 0x6c7   :  { %3238 = vmatpush3.bf16.msra.mxu0 %v1014_v40  ;;  %3239 = vmatprep.mubr.msk.bf16.mxu0 %vm3534_vm1, %v3531_v34 }
 0x791   :  { %v865_v41 = vpop.f32.mrb[12].mxu1 }
 0x792   :  { %v3223_v42 = vpop.f32.mrb[13].mxu1  ;;  %v919_v43 = vsel %vm705_vm5, %v865_v41, -inf }
 0x793   :  { %920 = vmax.xlane.f32.xlu0 %v919_v43  ;;  %v868_v44 = vpop.f32.mrb[14].mxu1  ;;  %v1057_v43 = vstv %s613_s13 }
 0x794   :  { %v922_v45 = vsel %vm705_vm5, %v868_v44, -inf  ;;  %v3224_v47 = vpop.f32.mrb[15].mxu1 }
 0x795   :  { %923 = vmax.xlane.f32.xlu1 %v922_v45 }
 0x799   :  { %v912_v48 = vpop.f32.mrb[20].mxu0 }
 0x79a   :  { %v3229_v49 = vpop.f32.mrb[21].mxu0  ;;  %v925_v50 = vsel %vm705_vm5, %v912_v48, -inf }
 0x79b   :  { %v915_v51 = vpop.f32.mrb[22].mxu0  ;;  %926 = vmax.xlane.f32.xlu0 %v925_v50 }
 0x79c   :  { %v3230_v52 = vpop.f32.mrb[23].mxu0  ;;  %v928_v53 = vsel %vm705_vm5, %v915_v51, -inf }
 0x79d   :  { %929 = vmax.xlane.f32.xlu1 %v928_v53 }
 0x820   :  { %v921_v54 = vpop.xlane.xlu0 %920 }
 0x821   :  { %v931_v55 = vsub.f32 %v865_v41, %v921_v54 }
 0x822   :  { %v924_v57 = vpop.xlane.xlu1 %923 }
 0x823   :  { %v935_v58 = vmul.f32 1.442695, %v931_v55  ;;  %v932_v59 = vsub.f32 %v868_v44, %v924_v57 }
 0x825   :  { %3402 = vpow2.f32 %v935_v58  ;;  %v937_v60 = vmul.f32 1.442695, %v932_v59 }
 0x827   :  { %3404 = vpow2.f32 %v937_v60 }
 0x828   :  { %v927_v61 = vpop.xlane.xlu0 %926 }
 0x829   :  { %v933_v62 = vsub.f32 %v912_v48, %v927_v61 }
 0x82a   :  { %v930_v1 = vpop.xlane.xlu1 %929 }
 0x82b   :  { %v939_v2 = vmul.f32 1.442695, %v933_v62  ;;  %v934_v3 = vsub.f32 %v915_v51, %v930_v1 }
 0x82d   :  { %3406 = vpow2.f32 %v939_v2  ;;  %v941_v4 = vmul.f32 1.442695, %v934_v3 }
 0x82f   :  { %v3403_v5 = vpop.eup %3402  ;;  %3408 = vpow2.f32 %v941_v4 }
 0x830   :  { %v943_v6 = vsel %vm705_vm5, %v3403_v5, 0.0 }
 0x831   :  { %v3405_v7 = vpop.eup %3404  ;;  %944 = vadd.xlane.f32.xlu0 %v943_v6 }
 0x832   :  { %v946_v8 = vsel %vm705_vm5, %v3405_v7, 0.0 }
 0x833   :  { %947 = vadd.xlane.f32.xlu1 %v946_v8 }
 0x837   :  { %v3407_v9 = vpop.eup %3406 }
 0x838   :  { %v949_v10 = vsel %vm705_vm5, %v3407_v9, 0.0 }
 0x839   :  { %v3409_v12 = vpop.eup %3408  ;;  %950 = vadd.xlane.f32.xlu0 %v949_v10 }
 0x83a   :  { %v952_v13 = vsel %vm705_vm5, %v3409_v12, 0.0 }
 0x83b   :  { %953 = vadd.xlane.f32.xlu1 %v952_v13 }
 0x8be   :  { %v945_v63 = vpop.xlane.xlu0 %944 }
 0x8bf   :  { %3410 = vrcp.f32 %v945_v63 }
 0x8c0   :  { %v948_v14 = vpop.xlane.xlu1 %947 }
 0x8c1   :  { %3412 = vrcp.f32 %v948_v14 }
 0x8c6   :  { %v951_v15 = vpop.xlane.xlu0 %950 }
 0x8c7   :  { %3414 = vrcp.f32 %v951_v15 }
 0x8c8   :  { %v954_v16 = vpop.xlane.xlu1 %953 }
 0x8c9   :  { %v3411_v17 = vpop.eup %3410  ;;  %3416 = vrcp.f32 %v954_v16 }
 0x8ca   :  { %v959_v30 = vmul.f32 %v3411_v17, %v3403_v5 }
 0x8cb   :  { %v3413_v18 = vpop.eup %3412 }
 0x8cc   :  { %v960_v33 = vmul.f32 %v3413_v18, %v3405_v7 }
 0x8ce   :  { %v963_v35 = vpack.c.bf16 %v960_v33, %v959_v30  ;;  %v599_v33 = vld [vmem:[%s4516_s6 + $0x8] sm:$0xff] }
 0x8d0   :  { %3234 = vmatmul.mubr.msk.bf16.vlgmr.msra.gmra.mrb[16].mxu1 %vm705_vm5, %v963_v35  ;;  %v600_v35 = vld [vmem:[%s4516_s6 + $0x10] sm:$0xff] }
 0x8d1   :  { %v3415_v38 = vpop.eup %3414 }
 0x8d2   :  { %v961_v40 = vmul.f32 %v3415_v38, %v3407_v9  ;;  %v609_v38 = vpack.c.bf16 %v600_v35, %v599_v33 }
 0x8d3   :  { %v3417_v39 = vpop.eup %3416 }
 0x8d4   :  { %v962_v41 = vmul.f32 %v3417_v39, %v3409_v12  ;;  %3243 = vmatprep.subr.bf16.mxu1 %v609_v38  ;;  %v601_v39 = vld [vmem:[%s4516_s6 + $0x18] sm:$0xff] }
 0x8d5   :  { %3244 = vmatpush3.bf16.msra.mxu1 %v609_v38 }
 0x8d6   :  { %v964_v42 = vpack.c.bf16 %v962_v41, %v961_v40  ;;  %v602_v40 = vld [vmem:[%s4516_s6 + $0x20] sm:$0xff] }
 0x8d7   :  { %v610_v41 = vpack.c.bf16 %v602_v40, %v601_v39 }
 0x8d8   :  { %3240 = vmatmul.mubr.msk.bf16.vlgmr.msra.gmra.mrb[24].mxu0 %vm705_vm5, %v964_v42 }
 0x8d9   :  { %3245 = vmatprep.subr.bf16.mxu1 %v610_v41 }
 0x8da   :  { %3246 = vmatpush3.bf16.msra.mxu1 %v610_v41 }
 0x8db   :  { %3259 = vmatprep.subr.bf16.mxu1 %v3531_v34 }
 0x9a3   :  { %v1004_v44 = vpop.f32.mrb[16].mxu1 }
 0x9a4   :  { %v1058_v45 = vmul.f32 %v1057_v43, %v1004_v44  ;;  %v3235_v47 = vpop.f32.mrb[17].mxu1 }
 0x9a5   :  { %v1007_v48 = vpop.f32.mrb[18].mxu1 }
 0x9a6   :  { %v1059_v49 = vmul.f32 %v1057_v43, %v1007_v48  ;;  %v3236_v50 = vpop.f32.mrb[19].mxu1  ;;  %v1062_v51 = vadd.f32 %v1058_v45, %v3710_v19 }
 0x9a8   :  { %v1066_v52 = vsel %vm276_vm0, %v1062_v51, 0.0  ;;  %v1063_v53 = vadd.f32 %v1059_v49, %v3715_v21 }
 0x9a9   :  { %1067 = vadd.xlane.f32.xlu0 %v1066_v52  ;;  %v3916_v52 = vld [vmem:[%s4516_s6 + $0x48] sm:$0xff] }
 0x9aa   :  { %v1069_v54 = vsel %vm276_vm0, %v1063_v53, 0.0 }
 0x9ab   :  { %v1050_v55 = vpop.f32.mrb[24].mxu0  ;;  %1070 = vadd.xlane.f32.xlu1 %v1069_v54 }
 0x9ac   :  { %v1060_v57 = vmul.f32 %v1057_v43, %v1050_v55  ;;  %v3241_v58 = vpop.f32.mrb[25].mxu0 }
 0x9ad   :  { %v1053_v59 = vpop.f32.mrb[26].mxu0  ;;  %v3921_v58 = vsub.s32 1, %v3647_v20 }
 0x9ae   :  { %v1061_v60 = vmul.f32 %v1057_v43, %v1053_v59  ;;  %v3242_v61 = vpop.f32.mrb[27].mxu0  ;;  %v1064_v62 = vadd.f32 %v1060_v57, %v3720_v22  ;;  %v1122_v57 = vrot.slane %v3916_v52, %v3653_v23 }
 0x9b0   :  { %v1072_v1 = vsel %vm276_vm0, %v1064_v62, 0.0  ;;  %v1065_v19 = vadd.f32 %v1061_v60, %v3725_v24 }
 0x9b1   :  { %1073 = vadd.xlane.f32.xlu0 %v1072_v1 }
 0x9b2   :  { %v1075_v2 = vsel %vm276_vm0, %v1065_v19, 0.0 }
 0x9b3   :  { %1076 = vadd.xlane.f32.xlu1 %v1075_v2 }
 0xa36   :  { %v1068_v21 = vpop.xlane.xlu0 %1067 }
 0xa37   :  { %v1079_v3 = vmul.f32 0.03125, %v1068_v21 }
 0xa38   :  { %v1071_v4 = vpop.xlane.xlu1 %1070 }
 0xa39   :  { %v1083_v5 = vsub.f32 %v1062_v51, %v1079_v3  ;;  %v1080_v6 = vmul.f32 0.03125, %v1071_v4 }
 0xa3b   :  { %v1084_v7 = vsub.f32 %v1063_v53, %v1080_v6  ;;  %v1087_v8 = vmul.f32 %v1083_v5, %v1083_v5 }
 0xa3d   :  { %v1091_v9 = vsel %vm276_vm0, %v1087_v8, 0.0  ;;  %v1088_v10 = vmul.f32 %v1084_v7, %v1084_v7 }
 0xa3e   :  { %1092 = vadd.xlane.f32.xlu0 %v1091_v9  ;;  %v1074_v22 = vpop.xlane.xlu0 %1073 }
 0xa3f   :  { %v1081_v12 = vmul.f32 0.03125, %v1074_v22  ;;  %v1094_v13 = vsel %vm276_vm0, %v1088_v10, 0.0 }
 0xa40   :  { %1095 = vadd.xlane.f32.xlu1 %v1094_v13  ;;  %v1077_v24 = vpop.xlane.xlu1 %1076 }
 0xa41   :  { %v1085_v63 = vsub.f32 %v1064_v62, %v1081_v12  ;;  %v1082_v14 = vmul.f32 0.03125, %v1077_v24 }
 0xa43   :  { %v1086_v15 = vsub.f32 %v1065_v19, %v1082_v14  ;;  %v1089_v16 = vmul.f32 %v1085_v63, %v1085_v63  ;;  %v1130_v19 = vrot.slane %v3916_v52, %v3921_v58  ;;  %v604_v14 = vld [vmem:[%s4516_s6 + $0x30] sm:$0xff] }
 0xa45   :  { %v1097_v17 = vsel %vm276_vm0, %v1089_v16, 0.0  ;;  %v1090_v18 = vmul.f32 %v1086_v15, %v1086_v15  ;;  %v606_v16 = vld [vmem:[%s4516_s6 + $0x40] sm:$0xff] }
 0xa46   :  { %1098 = vadd.xlane.f32.xlu0 %v1097_v17 }
 0xa47   :  { %v1100_v30 = vsel %vm276_vm0, %v1090_v18, 0.0 }
 0xa48   :  { %1101 = vadd.xlane.f32.xlu1 %v1100_v30 }
 0xacb   :  { %v1093_v42 = vpop.xlane.xlu0 %1092 }
 0xacc   :  { %v1103_v43 = vmul.f32 0.03125, %v1093_v42 }
 0xacd   :  { %v1096_v44 = vpop.xlane.xlu1 %1095 }
 0xace   :  { %v1107_v45 = vadd.f32 1e-05, %v1103_v43  ;;  %v1104_v47 = vmul.f32 0.03125, %v1096_v44 }
 0xad0   :  { %3418 = vrsqrt.f32 %v1107_v45  ;;  %v1108_v48 = vadd.f32 1e-05, %v1104_v47 }
 0xad2   :  { %3420 = vrsqrt.f32 %v1108_v48 }
 0xad3   :  { %v1099_v49 = vpop.xlane.xlu0 %1098 }
 0xad4   :  { %v1105_v50 = vmul.f32 0.03125, %v1099_v49 }
 0xad5   :  { %v1102_v51 = vpop.xlane.xlu1 %1101 }
 0xad6   :  { %v1109_v53 = vadd.f32 1e-05, %v1105_v50  ;;  %v1106_v54 = vmul.f32 0.03125, %v1102_v51 }
 0xad8   :  { %3422 = vrsqrt.f32 %v1109_v53  ;;  %v1110_v55 = vadd.f32 1e-05, %v1106_v54 }
 0xada   :  { %v3419_v59 = vpop.eup %3418  ;;  %3424 = vrsqrt.f32 %v1110_v55 }
 0xadb   :  { %v1115_v60 = vmul.f32 %v3419_v59, %v1083_v5 }
 0xadc   :  { %v3421_v61 = vpop.eup %3420 }
 0xadd   :  { %v1116_v62 = vmul.f32 %v3421_v61, %v1084_v7  ;;  %v1123_v1 = vmul.f32 %v1122_v57, %v1115_v60  ;;  %v3933_v7 = vld [vmem:[%s4516_s6 + $0x58] sm:$0xff] }
 0xadf   :  { %v1124_v2 = vmul.f32 %v1122_v57, %v1116_v62  ;;  %v1131_v21 = vadd.f32 %v1130_v19, %v1123_v1 }
 0xae1   :  { %v1132_v3 = vadd.f32 %v1130_v19, %v1124_v2 }
 0xae2   :  { %v3423_v4 = vpop.eup %3422 }
 0xae3   :  { %v1117_v6 = vmul.f32 %v3423_v4, %v1085_v63  ;;  %v1135_v8 = vpack.c.bf16 %v1132_v3, %v1131_v21  ;;  %v3938_v63 = vpack.c.bf16 %v3933_v7, %v3933_v7 }
 0xae4   :  { %v3425_v9 = vpop.eup %3424 }
 0xae5   :  { %v1125_v10 = vmul.f32 %v1122_v57, %v1117_v6  ;;  %v1118_v22 = vmul.f32 %v3425_v9, %v1086_v15  ;;  %3247 = vmatprep.mubr.msk.bf16.mxu1 %vm276_vm0, %v1135_v8 }
 0xae7   :  { %v1126_v12 = vmul.f32 %v1122_v57, %v1118_v22  ;;  %v1133_v13 = vadd.f32 %v1130_v19, %v1125_v10 }
 0xae9   :  { %v1134_v5 = vadd.f32 %v1130_v19, %v1126_v12 }
 0xaeb   :  { %v1136_v24 = vpack.c.bf16 %v1134_v5, %v1133_v13 }
 0xaed   :  { %3248 = vmatmul.mubr.msk.bf16.vlgmr.msra.gmra.mrb[20].mxu1 %vm276_vm0, %v1136_v24 }
 0xaee   :  { %3260 = vmatpush3.bf16.xpose.msra.mxu1 %v3811_v31  ;;  %3261 = vmatprep.mubr.msk.bf16.mxu1 %vm3534_vm1, %v3531_v34  ;;  %v603_v31 = vld [vmem:[%s4516_s6 + $0x28] sm:$0xff] }
 0xaef   :  { %3271 = vmatprep.subr.bf16.mxu1 %v3531_v34  ;;  %v611_v15 = vpack.c.bf16 %v604_v14, %v603_v31 }
 0xaf1   :  { %3251 = vmatprep.subr.bf16.mxu0 %v611_v15 }
 0xaf2   :  { %3252 = vmatpush3.bf16.msra.mxu0 %v611_v15 }
 0xaf5   :  { %3262 = vmatmul.mubr.msk.bf16.vlgmr.msra.gmra.mrb[24].mxu1 %vm276_vm0, %v3938_v63 }
 0xaf6   :  { %3272 = vmatpush3.bf16.msra.mxu1 %v3799_v11  ;;  %3273 = vmatprep.mubr.msk.bf16.mxu1 %vm3534_vm1, %v3531_v34  ;;  %v605_v11 = vld [vmem:[%s4516_s6 + $0x38] sm:$0xff] }
 0xaf7   :  { %3283 = vmatprep.subr.bf16.mxu1 %v3531_v34  ;;  %v612_v17 = vpack.c.bf16 %v606_v16, %v605_v11 }
 0xaf9   :  { %3253 = vmatprep.subr.bf16.mxu0 %v612_v17 }
 0xafa   :  { %3254 = vmatpush3.bf16.msra.mxu0 %v612_v17 }
 0xafb   :  { %3265 = vmatprep.subr.bf16.mxu0 %v3531_v34 }
 0xbc0   :  { %v3249_v18 = vpop.f32.mrb[20].mxu1 }
 0xbc1   :  { %v1177_v30 = vpop.f32.mrb[21].mxu1  ;;  %v1195_v41 = vsel %vm276_vm0, %v3249_v18, 0.0 }
 0xbc2   :  { %v3250_v33 = vpop.f32.mrb[22].mxu1  ;;  %v1192_v38 = vsel %vm276_vm0, %v1177_v30, 0.0 }
 0xbc3   :  { %v1180_v35 = vpop.f32.mrb[23].mxu1  ;;  %v1197_v43 = vsel %vm276_vm0, %v3250_v33, 0.0 }
 0xbc4   :  { %v1193_v39 = vsel %vm276_vm0, %v1180_v35, 0.0 }
 0xbc5   :  { %v1194_v40 = vadd.f32 %v1193_v39, %v1192_v38 }
 0xbc7   :  { %v1196_v42 = vadd.f32 %v1195_v41, %v1194_v40 }
 0xbc8   :  { %v3963_v44 = vpop.f32.mrb[24].mxu1 }
 0xbc9   :  { %v1198_v45 = vadd.f32 %v1197_v43, %v1196_v42  ;;  %v1588_v47 = vsel %vm705_vm5, %v3963_v44, -inf  ;;  %v3263_v48 = vpop.f32.mrb[25].mxu1 }
 0xbca   :  { %1589 = vmax.xlane.f32.xlu0 %v1588_v47  ;;  %v1545_v49 = vpop.f32.mrb[26].mxu1 }
 0xbcb   :  { %v1199_v50 = vrot.slane %v1198_v45, 4  ;;  %v3264_v51 = vpop.f32.mrb[27].mxu1 }
 0xbcd   :  { %v1200_v53 = vadd.f32 %v1199_v50, %v1198_v45 }
 0xbcf   :  { %v1201_v54 = vrot.slane %v1200_v53, 2 }
 0xbd1   :  { %v1202_v55 = vadd.f32 %v1201_v54, %v1200_v53 }
 0xbd3   :  { %v1203_v57 = vrot.slane %v1202_v55, 1 }
 0xbd5   :  { %v1204_v59 = vadd.f32 %v1203_v57, %v1202_v55 }
 0xbd7   :  { %v1205_v60 = vmul.f32 0.03125, %v1204_v59 }
 0xbd9   :  { %v1206_v61 = vsub.f32 %v1177_v30, %v1205_v60  ;;  %v1207_v62 = vsub.f32 %v1180_v35, %v1205_v60  ;;  %v1208_v1 = vsub.f32 %v3249_v18, %v1205_v60  ;;  %v1209_v19 = vsub.f32 %v3250_v33, %v1205_v60  ;;  %v608_v18 = vld [vmem:[%s4516_s6 + $0x50] sm:$0xff] }
 0xbda   :  { %v1237_v30 = vrot.slane %v608_v18, %v3653_v23  ;;  %v1245_v35 = vrot.slane %v608_v18, %v3921_v58 }
 0xbdb   :  { %v1210_v2 = vmul.f32 %v1206_v61, %v1206_v61  ;;  %v1211_v21 = vmul.f32 %v1207_v62, %v1207_v62  ;;  %v1212_v3 = vmul.f32 %v1208_v1, %v1208_v1  ;;  %v1213_v4 = vmul.f32 %v1209_v19, %v1209_v19 }
 0xbdd   :  { %v1214_v6 = vsel %vm276_vm0, %v1210_v2, 0.0  ;;  %v1215_v8 = vsel %vm276_vm0, %v1211_v21, 0.0  ;;  %v1217_v10 = vsel %vm276_vm0, %v1212_v3, 0.0  ;;  %v1219_v12 = vsel %vm276_vm0, %v1213_v4, 0.0 }
 0xbde   :  { %v1216_v9 = vadd.f32 %v1215_v8, %v1214_v6 }
 0xbe0   :  { %v1218_v22 = vadd.f32 %v1217_v10, %v1216_v9 }
 0xbe2   :  { %v1220_v13 = vadd.f32 %v1219_v12, %v1218_v22 }
 0xbe4   :  { %v1221_v5 = vrot.slane %v1220_v13, 4 }
 0xbe6   :  { %v1222_v24 = vadd.f32 %v1221_v5, %v1220_v13 }
 0xbe8   :  { %v1223_v31 = vrot.slane %v1222_v24, 2 }
 0xbea   :  { %v1224_v14 = vadd.f32 %v1223_v31, %v1222_v24 }
 0xbec   :  { %v1225_v15 = vrot.slane %v1224_v14, 1 }
 0xbee   :  { %v1226_v11 = vadd.f32 %v1225_v15, %v1224_v14 }
 0xbf0   :  { %v1227_v16 = vmul.f32 0.03125, %v1226_v11 }
 0xbf2   :  { %v1228_v17 = vadd.f32 1e-05, %v1227_v16 }
 0xbf4   :  { %3426 = vrsqrt.f32 %v1228_v17 }
 0xbfe   :  { %v3427_v33 = vpop.eup %3426 }
 0xbff   :  { %v1230_v38 = vmul.f32 %v3427_v33, %v1206_v61  ;;  %v1231_v39 = vmul.f32 %v3427_v33, %v1207_v62  ;;  %v1232_v40 = vmul.f32 %v3427_v33, %v1208_v1  ;;  %v1233_v41 = vmul.f32 %v3427_v33, %v1209_v19 }
 0xc01   :  { %v1239_v42 = vmul.f32 %v1237_v30, %v1231_v39  ;;  %v1238_v43 = vmul.f32 %v1237_v30, %v1230_v38  ;;  %v1240_v45 = vmul.f32 %v1237_v30, %v1232_v40  ;;  %v1241_v47 = vmul.f32 %v1237_v30, %v1233_v41 }
 0xc03   :  { %v1247_v48 = vadd.f32 %v1245_v35, %v1239_v42  ;;  %v1246_v49 = vadd.f32 %v1245_v35, %v1238_v43  ;;  %v1248_v50 = vadd.f32 %v1245_v35, %v1240_v45  ;;  %v1249_v51 = vadd.f32 %v1245_v35, %v1241_v47 }
 0xc05   :  { %v1251_v53 = vmax.f32 %v1247_v48, 0.0  ;;  %v1250_v54 = vmax.f32 %v1246_v49, 0.0  ;;  %v1252_v55 = vmax.f32 %v1248_v50, 0.0  ;;  %v1253_v57 = vmax.f32 %v1249_v51, 0.0 }
 0xc07   :  { %v1254_v59 = vpack.c.bf16 %v1251_v53, %v1250_v54  ;;  %v1255_v60 = vpack.c.bf16 %v1253_v57, %v1252_v55 }
 0xc09   :  { %3255 = vmatprep.mubr.msk.bf16.mxu0 %vm276_vm0, %v1254_v59 }
 0xc0a   :  { %3256 = vmatmul.mubr.msk.bf16.vlgmr.msra.gmra.mrb[28].mxu0 %vm276_vm0, %v1255_v60 }
 0xc0b   :  { %3266 = vmatpush3.bf16.xpose.msra.mxu0 %v3828_v36  ;;  %3267 = vmatprep.mubr.msk.bf16.mxu0 %vm3534_vm1, %v3531_v34 }
 0xc0c   :  { %3277 = vmatprep.subr.bf16.mxu0 %v3531_v34 }
 0xc12   :  { %3268 = vmatmul.mubr.msk.bf16.vlgmr.msra.gmra.mrb[32].mxu0 %vm276_vm0, %v3938_v63 }
 0xc13   :  { %3278 = vmatpush3.bf16.msra.mxu0 %v3836_v37  ;;  %3279 = vmatprep.mubr.msk.bf16.mxu0 %vm3534_vm1, %v3531_v34 }
 0xc14   :  { %3289 = vmatprep.subr.bf16.mxu0 %v3531_v34 }
 0xc57   :  { %v1590_v61 = vpop.xlane.xlu0 %1589 }
 0xc58   :  { %v1594_v62 = vsub.f32 %v3963_v44, %v1590_v61 }
 0xc5a   :  { %v1596_v1 = vmul.f32 1.442695, %v1594_v62 }
 0xc5c   :  { %3428 = vpow2.f32 %v1596_v1 }
 0xc66   :  { %v3429_v36 = vpop.eup %3428 }
 0xc67   :  { %v1600_v19 = vsel %vm705_vm5, %v3429_v36, 0.0 }
 0xc68   :  { %1601 = vadd.xlane.f32.xlu0 %v1600_v19 }
 0xcdd   :  { %v3257_v2 = vpop.f32.mrb[28].mxu0 }
 0xcde   :  { %v1296_v21 = vpop.f32.mrb[29].mxu0  ;;  %v1314_v8 = vsel %vm276_vm0, %v3257_v2, 0.0 }
 0xcdf   :  { %v3258_v3 = vpop.f32.mrb[30].mxu0  ;;  %v1311_v37 = vsel %vm276_vm0, %v1296_v21, 0.0 }
 0xce0   :  { %v1299_v63 = vpop.f32.mrb[31].mxu0  ;;  %v1316_v44 = vsel %vm276_vm0, %v3258_v3, 0.0 }
 0xce1   :  { %v1312_v4 = vsel %vm276_vm0, %v1299_v63, 0.0 }
 0xce2   :  { %v1313_v6 = vadd.f32 %v1312_v4, %v1311_v37 }
 0xce4   :  { %v1315_v9 = vadd.f32 %v1314_v8, %v1313_v6 }
 0xce5   :  { %v1582_v10 = vpop.f32.mrb[32].mxu0 }
 0xce6   :  { %v1317_v22 = vadd.f32 %v1316_v44, %v1315_v9  ;;  %v3269_v12 = vpop.f32.mrb[33].mxu0  ;;  %v1591_v13 = vsel %vm705_vm5, %v1582_v10, -inf }
 0xce7   :  { %1592 = vmax.xlane.f32.xlu1 %v1591_v13  ;;  %v1585_v5 = vpop.f32.mrb[34].mxu0 }
 0xce8   :  { %v1318_v24 = vrot.slane %v1317_v22, 4  ;;  %v3270_v31 = vpop.f32.mrb[35].mxu0 }
 0xcea   :  { %v1319_v14 = vadd.f32 %v1318_v24, %v1317_v22 }
 0xcec   :  { %v1320_v15 = vrot.slane %v1319_v14, 2 }
 0xcee   :  { %v1321_v11 = vadd.f32 %v1320_v15, %v1319_v14 }
 0xcf0   :  { %v1322_v16 = vrot.slane %v1321_v11, 1 }
 0xcf2   :  { %v1323_v17 = vadd.f32 %v1322_v16, %v1321_v11 }
 0xcf4   :  { %v1324_v18 = vmul.f32 0.03125, %v1323_v17 }
 0xcf5   :  { %v1602_v30 = vpop.xlane.xlu0 %1601 }
 0xcf6   :  { %v1325_v33 = vsub.f32 %v1296_v21, %v1324_v18  ;;  %v1326_v35 = vsub.f32 %v1299_v63, %v1324_v18  ;;  %v1327_v38 = vsub.f32 %v3257_v2, %v1324_v18  ;;  %v1328_v39 = vsub.f32 %v3258_v3, %v1324_v18 }
 0xcf7   :  { %3430 = vrcp.f32 %v1602_v30 }
 0xcf8   :  { %v1329_v40 = vmul.f32 %v1325_v33, %v1325_v33  ;;  %v1330_v41 = vmul.f32 %v1326_v35, %v1326_v35  ;;  %v1331_v42 = vmul.f32 %v1327_v38, %v1327_v38  ;;  %v1332_v43 = vmul.f32 %v1328_v39, %v1328_v39 }
 0xcfa   :  { %v1333_v45 = vsel %vm276_vm0, %v1329_v40, 0.0  ;;  %v1334_v47 = vsel %vm276_vm0, %v1330_v41, 0.0  ;;  %v1336_v49 = vsel %vm276_vm0, %v1331_v42, 0.0  ;;  %v1338_v51 = vsel %vm276_vm0, %v1332_v43, 0.0 }
 0xcfb   :  { %v1335_v48 = vadd.f32 %v1334_v47, %v1333_v45 }
 0xcfd   :  { %v1337_v50 = vadd.f32 %v1336_v49, %v1335_v48 }
 0xcff   :  { %v1339_v53 = vadd.f32 %v1338_v51, %v1337_v50 }
 0xd01   :  { %v3431_v54 = vpop.eup %3430  ;;  %v1340_v55 = vrot.slane %v1339_v53, 4 }
 0xd02   :  { %v1608_v57 = vmul.f32 %v3431_v54, %v3429_v36 }
 0xd03   :  { %v1341_v59 = vadd.f32 %v1340_v55, %v1339_v53 }
 0xd04   :  { %v1610_v60 = vpack.c.bf16 %v1608_v57, %v1608_v57 }
 0xd05   :  { %v1342_v61 = vrot.slane %v1341_v59, 2 }
 0xd06   :  { %3274 = vmatmul.mubr.msk.bf16.vlgmr.msra.gmra.mrb[28].mxu1 %vm705_vm5, %v1610_v60 }
 0xd07   :  { %v1343_v62 = vadd.f32 %v1342_v61, %v1341_v59  ;;  %3285 = vmatprep.mubr.msk.bf16.mxu1 %vm3534_vm1, %v3531_v34 }
 0xd09   :  { %v1344_v1 = vrot.slane %v1343_v62, 1 }
 0xd0b   :  { %v1345_v19 = vadd.f32 %v1344_v1, %v1343_v62 }
 0xd0d   :  { %v1346_v2 = vmul.f32 0.03125, %v1345_v19 }
 0xd0f   :  { %v1347_v21 = vadd.f32 1e-05, %v1346_v2 }
 0xd11   :  { %3432 = vrsqrt.f32 %v1347_v21 }
 0xd1b   :  { %v3433_v3 = vpop.eup %3432 }
 0xd1c   :  { %v4002_v63 = vmul.f32 %v3433_v3, %v1326_v35  ;;  %v4004_v37 = vmul.f32 %v3433_v3, %v1325_v33  ;;  %v4006_v36 = vmul.f32 %v3433_v3, %v1327_v38  ;;  %v4008_v4 = vmul.f32 %v3433_v3, %v1328_v39 }
 0xd74   :  { %v1593_v6 = vpop.xlane.xlu1 %1592 }
 0xd75   :  { %v1595_v8 = vsub.f32 %v1582_v10, %v1593_v6 }
 0xd77   :  { %v1598_v9 = vmul.f32 1.442695, %v1595_v8 }
 0xd79   :  { %3434 = vpow2.f32 %v1598_v9 }
 0xd83   :  { %v3435_v44 = vpop.eup %3434 }
 0xd84   :  { %v1603_v22 = vsel %vm705_vm5, %v3435_v44, 0.0 }
 0xd85   :  { %1604 = vadd.xlane.f32.xlu1 %v1603_v22 }
 0xdd9   :  { %v1649_v12 = vpop.f32.mrb[28].mxu1 }
 0xdda   :  { %v1698_v13 = vadd.f32 %v3933_v7, %v1649_v12  ;;  %v3275_v5 = vpop.f32.mrb[29].mxu1 }
 0xddb   :  { %v1652_v24 = vpop.f32.mrb[30].mxu1 }
 0xddc   :  { %v1700_v31 = vpack.c.bf16 %v1698_v13, %v1698_v13  ;;  %v3276_v14 = vpop.f32.mrb[31].mxu1 }
 0xdde   :  { %v1703_v15 = vsel %vm276_vm0, %v1700_v31, 0  ;;  %v1839_v10 = vsel %vm733_vm4, %v1700_v31, 0 }
 0xddf   :  { %3284 = vmatpush3.bf16.xpose.msra.mxu1 %v1703_v15 }
 0xde0   :  { %3295 = vmatprep.subr.bf16.mxu1 %v3531_v34 }
 0xde6   :  { %3286 = vmatmul.mubr.msk.bf16.vlgmr.msra.gmra.mrb[32].mxu1 %vm276_vm0, %v3860_v29 }
 0xde7   :  { %3296 = vmatpush3.bf16.msra.mxu1 %v1839_v10  ;;  %3297 = vmatprep.mubr.msk.bf16.mxu1 %vm3534_vm1, %v3531_v34 }
 0xe12   :  { %v1605_v11 = vpop.xlane.xlu1 %1604 }
 0xe13   :  { %3436 = vrcp.f32 %v1605_v11 }
 0xe1d   :  { %v3437_v16 = vpop.eup %3436 }
 0xe1e   :  { %v1609_v17 = vmul.f32 %v3437_v16, %v3435_v44 }
 0xe20   :  { %v1611_v18 = vpack.c.bf16 %v1609_v17, %v1609_v17 }
 0xe22   :  { %3280 = vmatmul.mubr.msk.bf16.vlgmr.msra.gmra.mrb[36].mxu0 %vm705_vm5, %v1611_v18 }
 0xe23   :  { %3291 = vmatprep.mubr.msk.bf16.mxu0 %vm3534_vm1, %v3531_v34 }
 0xeb9   :  { %v1739_v30 = vpop.f32.mrb[32].mxu1 }
 0xeba   :  { %v3287_v33 = vpop.f32.mrb[33].mxu1  ;;  %v1790_v35 = vsel %vm705_vm5, %v1739_v30, -inf }
 0xebb   :  { %1791 = vmax.xlane.f32.xlu0 %v1790_v35  ;;  %v1742_v29 = vpop.f32.mrb[34].mxu1 }
 0xebc   :  { %v1793_v38 = vsel %vm705_vm5, %v1742_v29, -inf  ;;  %v3288_v39 = vpop.f32.mrb[35].mxu1 }
 0xebd   :  { %1794 = vmax.xlane.f32.xlu1 %v1793_v38 }
 0xef5   :  { %v1692_v40 = vpop.f32.mrb[36].mxu0 }
 0xef6   :  { %v1699_v41 = vadd.f32 %v3933_v7, %v1692_v40  ;;  %v3281_v42 = vpop.f32.mrb[37].mxu0  ;;  %v1928_v40 = vstv %s3063_s14 }
 0xef7   :  { %v1695_v43 = vpop.f32.mrb[38].mxu0 }
 0xef8   :  { %v1701_v45 = vpack.c.bf16 %v1699_v41, %v1699_v41  ;;  %v3282_v47 = vpop.f32.mrb[39].mxu0 }
 0xefa   :  { %v1747_v48 = vsel %vm276_vm0, %v1701_v45, 0  ;;  %v1885_v49 = vsel %vm733_vm4, %v1701_v45, 0 }
 0xefb   :  { %3290 = vmatpush3.bf16.xpose.msra.mxu0 %v1747_v48 }
 0xefc   :  { %3301 = vmatprep.subr.bf16.mxu0 %v3531_v34 }
 0xf02   :  { %3292 = vmatmul.mubr.msk.bf16.vlgmr.msra.gmra.mrb[40].mxu0 %vm276_vm0, %v3871_v32 }
 0xf03   :  { %3302 = vmatpush3.bf16.msra.mxu0 %v1885_v49  ;;  %3303 = vmatprep.mubr.msk.bf16.mxu0 %vm3534_vm1, %v3531_v34  ;;  %v3506_v49 = vld [vmem:[%s4510_s0] sm:$0xff] }
 0xf48   :  { %v1792_v50 = vpop.xlane.xlu0 %1791 }
 0xf49   :  { %v1802_v51 = vsub.f32 %v1739_v30, %v1792_v50 }
 0xf4a   :  { %v1795_v7 = vpop.xlane.xlu1 %1794 }
 0xf4b   :  { %v1803_v53 = vsub.f32 %v1742_v29, %v1795_v7  ;;  %v1806_v54 = vmul.f32 1.442695, %v1802_v51  ;;  %v3507_v51 = vld [vmem:[%s4510_s0 + $0x8] sm:$0xff] }
 0xf4d   :  { %v1808_v55 = vmul.f32 1.442695, %v1803_v53  ;;  %3438 = vpow2.f32 %v1806_v54 }
 0xf4f   :  { %3440 = vpow2.f32 %v1808_v55 }
 0xf57   :  { %v3439_v57 = vpop.eup %3438 }
 0xf58   :  { %v1814_v2 = vsel %vm705_vm5, %v3439_v57, 0.0 }
 0xf59   :  { %v3441_v62 = vpop.eup %3440 }
 0xf5a   :  { %v1817_v21 = vsel %vm705_vm5, %v3441_v62, 0.0 }
 0xfd5   :  { %v1783_v59 = vpop.f32.mrb[40].mxu0 }
 0xfd6   :  { %v3293_v60 = vpop.f32.mrb[41].mxu0  ;;  %v1796_v61 = vsel %vm705_vm5, %v1783_v59, -inf }
 0xfd7   :  { %1797 = vmax.xlane.f32.xlu0 %v1796_v61  ;;  %v1786_v32 = vpop.f32.mrb[42].mxu0 }
 0xfd8   :  { %v3294_v1 = vpop.f32.mrb[43].mxu0  ;;  %v1799_v19 = vsel %vm705_vm5, %v1786_v32, -inf }
 0xfd9   :  { %1800 = vmax.xlane.f32.xlu1 %v1799_v19  ;;  %v3508_v1 = vld [vmem:[%s4510_s0 + $0x10] sm:$0xff] }
 0xfdb   :  { %1815 = vadd.xlane.f32.xlu0 %v1814_v2 }
 0xfdd   :  { %1818 = vadd.xlane.f32.xlu1 %v1817_v21 }
0x1064   :  { %v1798_v3 = vpop.xlane.xlu0 %1797 }
0x1065   :  { %v1804_v6 = vsub.f32 %v1783_v59, %v1798_v3 }
0x1066   :  { %v1801_v8 = vpop.xlane.xlu1 %1800 }
0x1067   :  { %v1810_v9 = vmul.f32 1.442695, %v1804_v6  ;;  %v1805_v44 = vsub.f32 %v1786_v32, %v1801_v8  ;;  %v3509_v6 = vld [vmem:[%s4510_s0 + $0x18] sm:$0xff] }
0x1068   :  { %v1816_v22 = vpop.xlane.xlu0 %1815 }
0x1069   :  { %3442 = vpow2.f32 %v1810_v9  ;;  %v1812_v12 = vmul.f32 1.442695, %v1805_v44 }
0x106a   :  { %3444 = vrcp.f32 %v1816_v22  ;;  %v1819_v13 = vpop.xlane.xlu1 %1818 }
0x106b   :  { %3446 = vpow2.f32 %v1812_v12 }
0x106c   :  { %3448 = vrcp.f32 %v1819_v13 }
0x1073   :  { %v3443_v5 = vpop.eup %3442 }
0x1074   :  { %v3445_v24 = vpop.eup %3444  ;;  %v1820_v31 = vsel %vm705_vm5, %v3443_v5, 0.0 }
0x1075   :  { %v3447_v14 = vpop.eup %3446  ;;  %1821 = vadd.xlane.f32.xlu0 %v1820_v31  ;;  %v1830_v11 = vmul.f32 %v3445_v24, %v3439_v57 }
0x1076   :  { %v3449_v15 = vpop.eup %3448  ;;  %v1823_v10 = vsel %vm705_vm5, %v3447_v14, 0.0 }
0x1077   :  { %v1831_v16 = vmul.f32 %v3449_v15, %v3441_v62  ;;  %1824 = vadd.xlane.f32.xlu1 %v1823_v10 }
0x1079   :  { %v1834_v17 = vpack.c.bf16 %v1831_v16, %v1830_v11 }
0x107b   :  { %3298 = vmatmul.mubr.msk.bf16.vlgmr.msra.gmra.mrb[36].mxu1 %vm705_vm5, %v1834_v17 }
0x1102   :  { %v1822_v18 = vpop.xlane.xlu0 %1821 }
0x1103   :  { %3450 = vrcp.f32 %v1822_v18 }
0x1104   :  { %v1825_v30 = vpop.xlane.xlu1 %1824 }
0x1105   :  { %3452 = vrcp.f32 %v1825_v30 }
0x110d   :  { %v3451_v33 = vpop.eup %3450 }
0x110e   :  { %v1832_v29 = vmul.f32 %v3451_v33, %v3443_v5 }
0x110f   :  { %v3453_v35 = vpop.eup %3452 }
0x1110   :  { %v1833_v38 = vmul.f32 %v3453_v35, %v3447_v14 }
0x1112   :  { %v1835_v39 = vpack.c.bf16 %v1833_v38, %v1832_v29 }
0x1114   :  { %3304 = vmatmul.mubr.msk.bf16.vlgmr.msra.gmra.mrb[44].mxu0 %vm705_vm5, %v1835_v39 }
0x114e   :  { %v1875_v41 = vpop.f32.mrb[36].mxu1 }
0x114f   :  { %v1929_v42 = vmul.f32 %v1928_v40, %v1875_v41  ;;  %v3299_v43 = vpop.f32.mrb[37].mxu1 }
0x1150   :  { %v1878_v45 = vpop.f32.mrb[38].mxu1 }
0x1151   :  { %v1930_v47 = vmul.f32 %v1928_v40, %v1878_v45  ;;  %v3300_v48 = vpop.f32.mrb[39].mxu1  ;;  %v1933_v50 = vadd.f32 %v3506_v49, %v1929_v42 }
0x1152   :  { %v583_v48 = vld [vmem:[%s4512_s2] sm:$0x3] }
0x1153   :  { %v1937_v7 = vsel %vm276_vm0, %v1933_v50, 0.0  ;;  %v1934_v53 = vadd.f32 %v3507_v51, %v1930_v47 }
0x1154   :  { %1938 = vadd.xlane.f32.xlu0 %v1937_v7 }
0x1155   :  { %v1940_v54 = vsel %vm276_vm0, %v1934_v53, 0.0 }
0x1156   :  { %1941 = vadd.xlane.f32.xlu1 %v1940_v54 }
0x11e1   :  { %v1939_v60 = vpop.xlane.xlu0 %1938 }
0x11e2   :  { %v1949_v21 = vmul.f32 0.03125, %v1939_v60 }
0x11e3   :  { %v1942_v2 = vpop.xlane.xlu1 %1941 }
0x11e4   :  { %v1950_v9 = vmul.f32 0.03125, %v1942_v2  ;;  %v4056_v22 = vsub.f32 %v1933_v50, %v1949_v21 }
0x11e6   :  { %v4059_v12 = vsub.f32 %v1934_v53, %v1950_v9  ;;  %v1957_v13 = vmul.f32 %v4056_v22, %v4056_v22 }
0x11e7   :  { %v1921_v55 = vpop.f32.mrb[44].mxu0 }
0x11e8   :  { %v1931_v57 = vmul.f32 %v1928_v40, %v1921_v55  ;;  %v3305_v59 = vpop.f32.mrb[45].mxu0  ;;  %v1958_v5 = vmul.f32 %v4059_v12, %v4059_v12  ;;  %v1961_v24 = vsel %vm276_vm0, %v1957_v13, 0.0 }
0x11e9   :  { %v1924_v61 = vpop.f32.mrb[46].mxu0 }
0x11ea   :  { %v1932_v62 = vmul.f32 %v1928_v40, %v1924_v61  ;;  %v3306_v32 = vpop.f32.mrb[47].mxu0  ;;  %v1935_v19 = vadd.f32 %v3508_v1, %v1931_v57  ;;  %v1964_v31 = vsel %vm276_vm0, %v1958_v5, 0.0  ;;  %v4087_v40 = vsub.s32 3, %v3647_v20 }
0x11ec   :  { %v1943_v3 = vsel %vm276_vm0, %v1935_v19, 0.0  ;;  %v1936_v8 = vadd.f32 %v3509_v6, %v1932_v62  ;;  %v1364_v55 = vrot.slane %v3916_v52, %v4087_v40  ;;  %v4111_v62 = vadd.f32 %v583_v48, %v3842_v0 }
0x11ed   :  { %1944 = vadd.xlane.f32.xlu0 %v1943_v3 }
0x11ee   :  { %v1946_v44 = vsel %vm276_vm0, %v1936_v8, 0.0 }
0x11ef   :  { %1947 = vadd.xlane.f32.xlu1 %v1946_v44 }
0x11f1   :  { %2371 = vadd.xlane.f32.xlu0 %v3729_v25 }
0x11f3   :  { %2373 = vadd.xlane.f32.xlu1 %v3733_v26 }
0x11f5   :  { %2375 = vadd.xlane.f32.xlu0 %v3737_v27  ;;  %v4073_v27 = vsub.s32 2, %v3647_v20 }
0x11f7   :  { %2377 = vadd.xlane.f32.xlu1 %v3741_v28  ;;  %v1356_v39 = vrot.slane %v3916_v52, %v4073_v27 }
0x11f9   :  { %1962 = vadd.xlane.f32.xlu0 %v1961_v24  ;;  %v1357_v54 = vmul.f32 %v1356_v39, %v4004_v37  ;;  %v1359_v21 = vmul.f32 %v1356_v39, %v4006_v36  ;;  %v1360_v9 = vmul.f32 %v1356_v39, %v4008_v4  ;;  %v4137_v24 = vld [vmem:[%s4516_s6 + $0xa0] sm:$0xff] }
0x11fb   :  { %1965 = vadd.xlane.f32.xlu1 %v1964_v31  ;;  %v4128_v36 = vadd.f32 %v1364_v55, %v1359_v21  ;;  %v4132_v5 = vadd.f32 %v1364_v55, %v1360_v9  ;;  %v1992_v31 = vrot.slane %v4137_v24, %v3653_v23  ;;  %v4171_v9 = vld [vmem:[%s4517_s7 + $0x40] sm:$0xff] }
0x11fd   :  { %v1375_v4 = vsel %vm276_vm0, %v4128_v36, 0.0 }
0x127a   :  { %v1945_v25 = vpop.xlane.xlu0 %1944 }
0x127b   :  { %v1951_v14 = vmul.f32 0.03125, %v1945_v25 }
0x127c   :  { %v1948_v15 = vpop.xlane.xlu1 %1947 }
0x127d   :  { %v4070_v26 = vsub.f32 %v1935_v19, %v1951_v14  ;;  %v1952_v10 = vmul.f32 0.03125, %v1948_v15  ;;  %v1378_v14 = vsel %vm276_vm0, %v4132_v5, 0.0 }
0x127e   :  { %v2372_v11 = vpop.xlane.xlu0 %2371 }
0x127f   :  { %v4075_v16 = vsub.f32 %v1936_v8, %v1952_v10  ;;  %v2379_v17 = vmul.f32 0.03125, %v2372_v11  ;;  %v1959_v28 = vmul.f32 %v4070_v26, %v4070_v26 }
0x1280   :  { %v2374_v18 = vpop.xlane.xlu1 %2373 }
0x1281   :  { %v4079_v30 = vsub.f32 %v3506_v49, %v2379_v17  ;;  %v2380_v33 = vmul.f32 0.03125, %v2374_v18  ;;  %v1967_v35 = vsel %vm276_vm0, %v1959_v28, 0.0  ;;  %v1960_v29 = vmul.f32 %v4075_v16, %v4075_v16 }
0x1282   :  { %1968 = vadd.xlane.f32.xlu0 %v1967_v35  ;;  %v2376_v38 = vpop.xlane.xlu0 %2375  ;;  %v2000_v28 = vrot.slane %v4137_v24, %v3921_v58 }
0x1283   :  { %v4089_v41 = vsub.f32 %v3507_v51, %v2380_v33  ;;  %v2381_v42 = vmul.f32 0.03125, %v2376_v38  ;;  %v1970_v43 = vsel %vm276_vm0, %v1960_v29, 0.0  ;;  %v2387_v45 = vmul.f32 %v4079_v30, %v4079_v30  ;;  %v3053_v38 = vld [vmem:[%s4516_s6 + $0x60] sm:$0xff] }
0x1284   :  { %1971 = vadd.xlane.f32.xlu1 %v1970_v43  ;;  %v2378_v47 = vpop.xlane.xlu1 %2377 }
0x1285   :  { %v4097_v49 = vsub.f32 %v3508_v1, %v2381_v42  ;;  %v2382_v50 = vmul.f32 0.03125, %v2378_v47  ;;  %v2391_v7 = vsel %vm276_vm0, %v2387_v45, 0.0  ;;  %v2388_v51 = vmul.f32 %v4089_v41, %v4089_v41  ;;  %v3056_v42 = vld [vmem:[%s4516_s6 + $0x78] sm:$0xff]  ;;  %v2356_v45 = vld [vmem:[%s4517_s7] sm:$0xff]  ;;  %v2357_v47 = vld [vmem:[%s4517_s7 + $0x8] sm:$0xff] }
0x1286   :  { %2392 = vadd.xlane.f32.xlu0 %v2391_v7  ;;  %v1963_v53 = vpop.xlane.xlu0 %1962  ;;  %v1358_v1 = vmul.f32 %v1356_v39, %v4002_v63  ;;  %v586_v63 = vsel %vm585_vm6, %v4111_v62, -inf  ;;  %v2366_v48 = vpack.c.bf16 %v2357_v47, %v2356_v45 }
0x1287   :  { %v4105_v57 = vsub.f32 %v3509_v6, %v2382_v50  ;;  %v1973_v59 = vmul.f32 0.03125, %v1963_v53  ;;  %v2394_v60 = vsel %vm276_vm0, %v2388_v51, 0.0  ;;  %v2389_v61 = vmul.f32 %v4097_v49, %v4097_v49 }
0x1288   :  { %2395 = vadd.xlane.f32.xlu1 %v2394_v60  ;;  %v1966_v32 = vpop.xlane.xlu1 %1965  ;;  %v4119_v6 = vadd.f32 %v1364_v55, %v1357_v54  ;;  %v4123_v8 = vadd.f32 %v1364_v55, %v1358_v1 }
0x1289   :  { %v1977_v19 = vadd.f32 1e-05, %v1973_v59  ;;  %v1974_v37 = vmul.f32 0.03125, %v1966_v32  ;;  %v2397_v2 = vsel %vm276_vm0, %v2389_v61, 0.0  ;;  %v2390_v52 = vmul.f32 %v4105_v57, %v4105_v57 }
0x128a   :  { %2398 = vadd.xlane.f32.xlu0 %v2397_v2  ;;  %v1369_v44 = vsel %vm276_vm0, %v4119_v6, 0.0  ;;  %v1372_v13 = vsel %vm276_vm0, %v4123_v8, 0.0 }
0x128b   :  { %3454 = vrsqrt.f32 %v1977_v19  ;;  %v1978_v3 = vadd.f32 1e-05, %v1974_v37  ;;  %v2400_v0 = vsel %vm276_vm0, %v2390_v52, 0.0 }
0x128c   :  { %2401 = vadd.xlane.f32.xlu1 %v2400_v0 }
0x128d   :  { %3456 = vrsqrt.f32 %v1978_v3 }
0x128e   :  { %587 = vmax.xlane.f32.xlu0 %v586_v63 }
0x1290   :  { %1370 = vadd.xlane.f32.xlu1 %v1369_v44 }
0x1292   :  { %1373 = vadd.xlane.f32.xlu0 %v1372_v13 }
0x1294   :  { %1376 = vadd.xlane.f32.xlu1 %v1375_v4 }
0x1295   :  { %v3455_v25 = vpop.eup %3454 }
0x1296   :  { %v1985_v15 = vmul.f32 %v3455_v25, %v4056_v22  ;;  %1379 = vadd.xlane.f32.xlu0 %v1378_v14  ;;  %v3054_v22 = vld [vmem:[%s4516_s6 + $0x68] sm:$0xff]  ;;  %v2422_v14 = vrot.slane %v4171_v9, %v3653_v23 }
0x1297   :  { %v3457_v10 = vpop.eup %3456  ;;  %v1498_v39 = vpack.c.bf16 %v3054_v22, %v3053_v38 }
0x1298   :  { %v1986_v11 = vmul.f32 %v3457_v10, %v4059_v12  ;;  %v1993_v17 = vmul.f32 %v1992_v31, %v1985_v15  ;;  %v3055_v12 = vld [vmem:[%s4516_s6 + $0x70] sm:$0xff] }
0x1299   :  { %3307 = vmatprep.subr.bf16.mxu1 %v1498_v39  ;;  %v1499_v43 = vpack.c.bf16 %v3056_v42, %v3055_v12 }
0x129a   :  { %v1994_v18 = vmul.f32 %v1992_v31, %v1986_v11  ;;  %v2001_v33 = vadd.f32 %v2000_v28, %v1993_v17  ;;  %3308 = vmatpush3.bf16.msra.mxu1 %v1498_v39 }
0x129b   :  { %3309 = vmatprep.subr.bf16.mxu1 %v1499_v43 }
0x129c   :  { %v2002_v35 = vadd.f32 %v2000_v28, %v1994_v18  ;;  %v2358_v18 = vld [vmem:[%s4517_s7 + $0x10] sm:$0xff] }
0x129e   :  { %v2005_v29 = vpack.c.bf16 %v2002_v35, %v2001_v33  ;;  %3310 = vmatpush3.bf16.msra.mxu1 %v1499_v43  ;;  %v2430_v33 = vrot.slane %v4171_v9, %v3921_v58 }
0x129f   :  { %3323 = vmatprep.subr.bf16.mxu1 %v2366_v48 }
0x12a0   :  { %3311 = vmatprep.mubr.msk.bf16.mxu1 %vm276_vm0, %v2005_v29 }
0x130f   :  { %v1969_v50 = vpop.xlane.xlu0 %1968 }
0x1310   :  { %v1975_v7 = vmul.f32 0.03125, %v1969_v50 }
0x1311   :  { %v1972_v51 = vpop.xlane.xlu1 %1971 }
0x1312   :  { %v1979_v53 = vadd.f32 1e-05, %v1975_v7  ;;  %v1976_v54 = vmul.f32 0.03125, %v1972_v51 }
0x1313   :  { %v2393_v55 = vpop.xlane.xlu0 %2392 }
0x1314   :  { %3458 = vrsqrt.f32 %v1979_v53  ;;  %v1980_v59 = vadd.f32 1e-05, %v1976_v54  ;;  %v2403_v60 = vmul.f32 0.03125, %v2393_v55  ;;  %v3058_v53 = vld [vmem:[%s4516_s6 + $0x88] sm:$0xff]  ;;  %v3059_v54 = vld [vmem:[%s4516_s6 + $0x90] sm:$0xff]  ;;  %v3060_v55 = vld [vmem:[%s4516_s6 + $0x98] sm:$0xff] }
0x1315   :  { %v2396_v61 = vpop.xlane.xlu1 %2395 }
0x1316   :  { %3460 = vrsqrt.f32 %v1980_v59  ;;  %v2407_v32 = vadd.f32 1e-05, %v2403_v60  ;;  %v2404_v1 = vmul.f32 0.03125, %v2396_v61  ;;  %v1501_v59 = vpack.c.bf16 %v3060_v55, %v3059_v54  ;;  %v2360_v60 = vld [vmem:[%s4517_s7 + $0x20] sm:$0xff]  ;;  %v2361_v61 = vld [vmem:[%s4517_s7 + $0x28] sm:$0xff] }
0x1317   :  { %v2399_v19 = vpop.xlane.xlu0 %2398 }
0x1318   :  { %3462 = vrsqrt.f32 %v2407_v32  ;;  %v2408_v37 = vadd.f32 1e-05, %v2404_v1  ;;  %v2405_v2 = vmul.f32 0.03125, %v2399_v19  ;;  %v4210_v32 = vpack.c.bf16 %v2361_v61, %v2360_v60 }
0x1319   :  { %v2402_v52 = vpop.xlane.xlu1 %2401 }
0x131a   :  { %3464 = vrsqrt.f32 %v2408_v37  ;;  %v2409_v21 = vadd.f32 1e-05, %v2405_v2  ;;  %v2406_v3 = vmul.f32 0.03125, %v2402_v52 }
0x131c   :  { %3466 = vrsqrt.f32 %v2409_v21  ;;  %v2410_v0 = vadd.f32 1e-05, %v2406_v3 }
0x131e   :  { %v3459_v63 = vpop.eup %3458  ;;  %3468 = vrsqrt.f32 %v2410_v0 }
0x131f   :  { %v1987_v44 = vmul.f32 %v3459_v63, %v4070_v26  ;;  %v2359_v26 = vld [vmem:[%s4517_s7 + $0x18] sm:$0xff] }
0x1320   :  { %v3461_v13 = vpop.eup %3460  ;;  %v2367_v39 = vpack.c.bf16 %v2359_v26, %v2358_v18 }
0x1321   :  { %v1995_v4 = vmul.f32 %v1992_v31, %v1987_v44  ;;  %v1988_v25 = vmul.f32 %v3461_v13, %v4075_v16 }
0x1322   :  { %v3463_v15 = vpop.eup %3462 }
0x1323   :  { %v1996_v10 = vmul.f32 %v1992_v31, %v1988_v25  ;;  %v2415_v11 = vmul.f32 %v3463_v15, %v4079_v30  ;;  %v2003_v35 = vadd.f32 %v2000_v28, %v1995_v4 }
0x1324   :  { %v3465_v17 = vpop.eup %3464 }
0x1325   :  { %v2416_v16 = vmul.f32 %v3465_v17, %v4089_v41  ;;  %v2004_v29 = vadd.f32 %v2000_v28, %v1996_v10  ;;  %v2423_v38 = vmul.f32 %v2422_v14, %v2415_v11 }
0x1326   :  { %v3467_v31 = vpop.eup %3466 }
0x1327   :  { %v2417_v30 = vmul.f32 %v3467_v31, %v4097_v49  ;;  %v2006_v22 = vpack.c.bf16 %v2004_v29, %v2003_v35  ;;  %v2424_v12 = vmul.f32 %v2422_v14, %v2416_v16  ;;  %v2431_v47 = vadd.f32 %v2430_v33, %v2423_v38 }
0x1328   :  { %v3469_v42 = vpop.eup %3468 }
0x1329   :  { %v2425_v43 = vmul.f32 %v2422_v14, %v2417_v30  ;;  %v2418_v45 = vmul.f32 %v3469_v42, %v4105_v57  ;;  %3312 = vmatmul.mubr.msk.bf16.vlgmr.msra.gmra.mrb[40].mxu1 %vm276_vm0, %v2006_v22  ;;  %v2432_v50 = vadd.f32 %v2430_v33, %v2424_v12  ;;  %v3057_v57 = vld [vmem:[%s4516_s6 + $0x80] sm:$0xff] }
0x132a   :  { %3324 = vmatpush3.bf16.msra.mxu1 %v2366_v48  ;;  %v1500_v48 = vpack.c.bf16 %v3058_v53, %v3057_v57 }
0x132b   :  { %v2426_v7 = vmul.f32 %v2422_v14, %v2418_v45  ;;  %3325 = vmatprep.subr.bf16.mxu1 %v2367_v39  ;;  %v2435_v41 = vpack.c.bf16 %v2432_v50, %v2431_v47  ;;  %v2433_v28 = vadd.f32 %v2430_v33, %v2425_v43 }
0x132c   :  { %3315 = vmatprep.subr.bf16.mxu0 %v1500_v48 }
0x132d   :  { %3327 = vmatprep.mubr.msk.bf16.mxu1 %vm276_vm0, %v2435_v41  ;;  %v2434_v51 = vadd.f32 %v2430_v33, %v2426_v7  ;;  %3316 = vmatpush3.bf16.msra.mxu0 %v1500_v48 }
0x132e   :  { %3326 = vmatpush3.bf16.msra.mxu1 %v2367_v39  ;;  %3317 = vmatprep.subr.bf16.mxu0 %v1501_v59 }
0x132f   :  { %v2436_v49 = vpack.c.bf16 %v2434_v51, %v2433_v28 }
0x1331   :  { %3328 = vmatmul.mubr.msk.bf16.vlgmr.msra.gmra.mrb[44].mxu1 %vm276_vm0, %v2436_v49  ;;  %3318 = vmatpush3.bf16.msra.mxu0 %v1501_v59 }
0x1332   :  { %3331 = vmatprep.subr.bf16.mxu0 %v4210_v32 }
0x13fc   :  { %v3313_v1 = vpop.f32.mrb[40].mxu1 }
0x13fd   :  { %v2047_v19 = vpop.f32.mrb[41].mxu1  ;;  %v2065_v0 = vsel %vm276_vm0, %v3313_v1, 0.0 }
0x13fe   :  { %v3314_v37 = vpop.f32.mrb[42].mxu1  ;;  %v2062_v52 = vsel %vm276_vm0, %v2047_v19, 0.0 }
0x13ff   :  { %v2050_v2 = vpop.f32.mrb[43].mxu1  ;;  %v2067_v44 = vsel %vm276_vm0, %v3314_v37, 0.0 }
0x1400   :  { %v2063_v21 = vsel %vm276_vm0, %v2050_v2, 0.0 }
0x1401   :  { %v2064_v3 = vadd.f32 %v2063_v21, %v2062_v52 }
0x1403   :  { %v2066_v63 = vadd.f32 %v2065_v0, %v2064_v3 }
0x1404   :  { %v3329_v13 = vpop.f32.mrb[44].mxu1 }
0x1405   :  { %v2068_v4 = vadd.f32 %v2067_v44, %v2066_v63  ;;  %v2477_v25 = vpop.f32.mrb[45].mxu1  ;;  %v2495_v33 = vsel %vm276_vm0, %v3329_v13, 0.0 }
0x1406   :  { %v3330_v14 = vpop.f32.mrb[46].mxu1  ;;  %v2492_v11 = vsel %vm276_vm0, %v2477_v25, 0.0 }
0x1407   :  { %v2069_v15 = vrot.slane %v2068_v4, 4  ;;  %v2480_v10 = vpop.f32.mrb[47].mxu1  ;;  %v2497_v29 = vsel %vm276_vm0, %v3330_v14, 0.0 }
0x1408   :  { %v2493_v17 = vsel %vm276_vm0, %v2480_v10, 0.0 }
0x1409   :  { %v2070_v18 = vadd.f32 %v2069_v15, %v2068_v4  ;;  %v2494_v26 = vadd.f32 %v2493_v17, %v2492_v11 }
0x140b   :  { %v2071_v16 = vrot.slane %v2070_v18, 2  ;;  %v2496_v35 = vadd.f32 %v2495_v33, %v2494_v26 }
0x140d   :  { %v2072_v38 = vadd.f32 %v2071_v16, %v2070_v18  ;;  %v2498_v31 = vadd.f32 %v2497_v29, %v2496_v35 }
0x140f   :  { %v2073_v30 = vrot.slane %v2072_v38, 1  ;;  %v2499_v22 = vrot.slane %v2498_v31, 4 }
0x1411   :  { %v2074_v39 = vadd.f32 %v2073_v30, %v2072_v38  ;;  %v2500_v12 = vadd.f32 %v2499_v22, %v2498_v31 }
0x1413   :  { %v2075_v42 = vmul.f32 0.03125, %v2074_v39  ;;  %v2501_v43 = vrot.slane %v2500_v12, 2 }
0x1415   :  { %v2076_v45 = vsub.f32 %v2047_v19, %v2075_v42  ;;  %v2077_v47 = vsub.f32 %v2050_v2, %v2075_v42  ;;  %v2078_v50 = vsub.f32 %v3313_v1, %v2075_v42  ;;  %v2079_v7 = vsub.f32 %v3314_v37, %v2075_v42 }
0x1416   :  { %v2502_v41 = vadd.f32 %v2501_v43, %v2500_v12 }
0x1417   :  { %v2080_v28 = vmul.f32 %v2076_v45, %v2076_v45  ;;  %v2081_v51 = vmul.f32 %v2077_v47, %v2077_v47  ;;  %v2082_v49 = vmul.f32 %v2078_v50, %v2078_v50  ;;  %v2083_v53 = vmul.f32 %v2079_v7, %v2079_v7 }
0x1418   :  { %v2503_v57 = vrot.slane %v2502_v41, 1 }
0x1419   :  { %v2084_v48 = vsel %vm276_vm0, %v2080_v28, 0.0  ;;  %v2085_v54 = vsel %vm276_vm0, %v2081_v51, 0.0  ;;  %v2087_v60 = vsel %vm276_vm0, %v2082_v49, 0.0  ;;  %v2089_v19 = vsel %vm276_vm0, %v2083_v53, 0.0  ;;  %v3062_v28 = vld [vmem:[%s4516_s6 + $0xa8] sm:$0xff] }
0x141a   :  { %v2086_v55 = vadd.f32 %v2085_v54, %v2084_v48  ;;  %v2504_v59 = vadd.f32 %v2503_v57, %v2502_v41  ;;  %v2107_v49 = vrot.slane %v3062_v28, %v3653_v23  ;;  %v2115_v53 = vrot.slane %v3062_v28, %v3921_v58 }
0x141c   :  { %v2088_v61 = vadd.f32 %v2087_v60, %v2086_v55  ;;  %v2505_v52 = vmul.f32 0.03125, %v2504_v59 }
0x141e   :  { %v2090_v1 = vadd.f32 %v2089_v19, %v2088_v61  ;;  %v2506_v37 = vsub.f32 %v2477_v25, %v2505_v52  ;;  %v2507_v2 = vsub.f32 %v2480_v10, %v2505_v52  ;;  %v2508_v21 = vsub.f32 %v3329_v13, %v2505_v52 }
0x141f   :  { %v2509_v3 = vsub.f32 %v3330_v14, %v2505_v52 }
0x1420   :  { %v2091_v0 = vrot.slane %v2090_v1, 4  ;;  %v2510_v63 = vmul.f32 %v2506_v37, %v2506_v37  ;;  %v2511_v44 = vmul.f32 %v2507_v2, %v2507_v2  ;;  %v2512_v4 = vmul.f32 %v2508_v21, %v2508_v21 }
0x1421   :  { %v2513_v11 = vmul.f32 %v2509_v3, %v2509_v3 }
0x1422   :  { %v2092_v15 = vadd.f32 %v2091_v0, %v2090_v1  ;;  %v2514_v17 = vsel %vm276_vm0, %v2510_v63, 0.0  ;;  %v2515_v18 = vsel %vm276_vm0, %v2511_v44, 0.0  ;;  %v2517_v16 = vsel %vm276_vm0, %v2512_v4, 0.0  ;;  %v2365_v0 = vld [vmem:[%s4517_s7 + $0x48] sm:$0xff] }
0x1423   :  { %v2516_v26 = vadd.f32 %v2515_v18, %v2514_v17  ;;  %v2519_v25 = vsel %vm276_vm0, %v2513_v11, 0.0  ;;  %v2537_v17 = vrot.slane %v2365_v0, %v3653_v23 }
0x1424   :  { %v2093_v33 = vrot.slane %v2092_v15, 2 }
0x1425   :  { %v2518_v35 = vadd.f32 %v2517_v16, %v2516_v26  ;;  %v2545_v26 = vrot.slane %v2365_v0, %v3921_v58 }
0x1426   :  { %v2094_v29 = vadd.f32 %v2093_v33, %v2092_v15  ;;  %v2362_v15 = vld [vmem:[%s4517_s7 + $0x30] sm:$0xff] }
0x1427   :  { %v2520_v13 = vadd.f32 %v2519_v25, %v2518_v35 }
0x1428   :  { %v2095_v14 = vrot.slane %v2094_v29, 1 }
0x1429   :  { %v2521_v10 = vrot.slane %v2520_v13, 4 }
0x142a   :  { %v2096_v38 = vadd.f32 %v2095_v14, %v2094_v29 }
0x142b   :  { %v2522_v31 = vadd.f32 %v2521_v10, %v2520_v13 }
0x142c   :  { %v2097_v30 = vmul.f32 0.03125, %v2096_v38 }
0x142d   :  { %v2523_v22 = vrot.slane %v2522_v31, 2 }
0x142e   :  { %v2098_v39 = vadd.f32 1e-05, %v2097_v30 }
0x142f   :  { %v2524_v12 = vadd.f32 %v2523_v22, %v2522_v31 }
0x1430   :  { %3470 = vrsqrt.f32 %v2098_v39 }
0x1431   :  { %v2525_v42 = vrot.slane %v2524_v12, 1 }
0x1433   :  { %v2526_v43 = vadd.f32 %v2525_v42, %v2524_v12 }
0x1435   :  { %v2527_v41 = vmul.f32 0.03125, %v2526_v43 }
0x1437   :  { %v2528_v51 = vadd.f32 1e-05, %v2527_v41 }
0x1439   :  { %3472 = vrsqrt.f32 %v2528_v51 }
0x143a   :  { %v3471_v57 = vpop.eup %3470 }
0x143b   :  { %v2100_v48 = vmul.f32 %v3471_v57, %v2076_v45  ;;  %v2101_v54 = vmul.f32 %v3471_v57, %v2077_v47  ;;  %v2102_v55 = vmul.f32 %v3471_v57, %v2078_v50  ;;  %v2103_v59 = vmul.f32 %v3471_v57, %v2079_v7  ;;  %v2363_v45 = vld [vmem:[%s4517_s7 + $0x38] sm:$0xff]  ;;  %s3039_s7 = sld [smem:[#allocation2 + $0x2]] }
0x143c   :  { %v2369_v35 = vpack.c.bf16 %v2363_v45, %v2362_v15 }
0x143d   :  { %v2109_v60 = vmul.f32 %v2107_v49, %v2101_v54  ;;  %v2108_v61 = vmul.f32 %v2107_v49, %v2100_v48  ;;  %v2110_v52 = vmul.f32 %v2107_v49, %v2102_v55  ;;  %v2111_v19 = vmul.f32 %v2107_v49, %v2103_v59 }
0x143f   :  { %v2117_v1 = vadd.f32 %v2115_v53, %v2109_v60  ;;  %v2116_v63 = vadd.f32 %v2115_v53, %v2108_v61  ;;  %v2118_v44 = vadd.f32 %v2115_v53, %v2110_v52  ;;  %v2119_v4 = vadd.f32 %v2115_v53, %v2111_v19 }
0x1441   :  { %v2121_v47 = vmax.f32 %v2117_v1, 0.0  ;;  %v2120_v50 = vmax.f32 %v2116_v63, 0.0  ;;  %v2122_v7 = vmax.f32 %v2118_v44, 0.0  ;;  %v2123_v11 = vmax.f32 %v2119_v4, 0.0 }
0x1443   :  { %v3473_v18 = vpop.eup %3472  ;;  %v2124_v33 = vpack.c.bf16 %v2121_v47, %v2120_v50  ;;  %v2125_v16 = vpack.c.bf16 %v2123_v11, %v2122_v7 }
0x1444   :  { %v2530_v29 = vmul.f32 %v3473_v18, %v2506_v37  ;;  %v2531_v25 = vmul.f32 %v3473_v18, %v2507_v2  ;;  %v2532_v13 = vmul.f32 %v3473_v18, %v2508_v21  ;;  %v2533_v14 = vmul.f32 %v3473_v18, %v2509_v3 }
0x1445   :  { %3319 = vmatprep.mubr.msk.bf16.mxu0 %vm276_vm0, %v2124_v33 }
0x1446   :  { %v2539_v10 = vmul.f32 %v2537_v17, %v2531_v25  ;;  %3320 = vmatmul.mubr.msk.bf16.vlgmr.msra.gmra.mrb[48].mxu0 %vm276_vm0, %v2125_v16  ;;  %v2538_v38 = vmul.f32 %v2537_v17, %v2530_v29  ;;  %v2540_v31 = vmul.f32 %v2537_v17, %v2532_v13  ;;  %v2541_v30 = vmul.f32 %v2537_v17, %v2533_v14 }
0x1447   :  { %3332 = vmatpush3.bf16.msra.mxu0 %v4210_v32 }
0x1448   :  { %v2547_v22 = vadd.f32 %v2545_v26, %v2539_v10  ;;  %3333 = vmatprep.subr.bf16.mxu0 %v2369_v35  ;;  %v2546_v58 = vadd.f32 %v2545_v26, %v2538_v38  ;;  %v2548_v39 = vadd.f32 %v2545_v26, %v2540_v31  ;;  %v2549_v12 = vadd.f32 %v2545_v26, %v2541_v30 }
0x144a   :  { %v2550_v42 = vpack.c.bf16 %v2547_v22, %v2546_v58  ;;  %v2551_v37 = vpack.c.bf16 %v2549_v12, %v2548_v39 }
0x144b   :  { %3334 = vmatpush3.bf16.msra.mxu0 %v2369_v35 }
0x144c   :  { %3335 = vmatprep.mubr.msk.bf16.mxu0 %vm276_vm0, %v2550_v42 }
0x144e   :  { %3336 = vmatmul.mubr.msk.bf16.vlgmr.msra.gmra.mrb[52].mxu0 %vm276_vm0, %v2551_v37 }
0x1519   :  { %v3321_v2 = vpop.f32.mrb[48].mxu0 }
0x151a   :  { %v2166_v21 = vpop.f32.mrb[49].mxu0  ;;  %v2184_v51 = vsel %vm276_vm0, %v3321_v2, 0.0 }
0x151b   :  { %v3322_v3 = vpop.f32.mrb[50].mxu0  ;;  %v2181_v41 = vsel %vm276_vm0, %v2166_v21, 0.0 }
0x151c   :  { %v2169_v43 = vpop.f32.mrb[51].mxu0  ;;  %v2186_v57 = vsel %vm276_vm0, %v3322_v3, 0.0 }
0x151d   :  { %v2182_v32 = vsel %vm276_vm0, %v2169_v43, 0.0 }
0x151e   :  { %v2183_v28 = vadd.f32 %v2182_v32, %v2181_v41 }
0x1520   :  { %v2185_v49 = vadd.f32 %v2184_v51, %v2183_v28 }
0x1521   :  { %v3337_v53 = vpop.f32.mrb[52].mxu0 }
0x1522   :  { %v2187_v48 = vadd.f32 %v2186_v57, %v2185_v49  ;;  %v2592_v54 = vpop.f32.mrb[53].mxu0  ;;  %v2610_v0 = vsel %vm276_vm0, %v3337_v53, 0.0 }
0x1523   :  { %v3338_v55 = vpop.f32.mrb[54].mxu0  ;;  %v2607_v61 = vsel %vm276_vm0, %v2592_v54, 0.0 }
0x1524   :  { %v2188_v59 = vrot.slane %v2187_v48, 4  ;;  %v2595_v60 = vpop.f32.mrb[55].mxu0  ;;  %v2612_v4 = vsel %vm276_vm0, %v3338_v55, 0.0 }
0x1525   :  { %v2608_v52 = vsel %vm276_vm0, %v2595_v60, 0.0 }
0x1526   :  { %v2189_v19 = vadd.f32 %v2188_v59, %v2187_v48  ;;  %v2609_v1 = vadd.f32 %v2608_v52, %v2607_v61 }
0x1528   :  { %v2190_v63 = vrot.slane %v2189_v19, 2  ;;  %v2611_v44 = vadd.f32 %v2610_v0, %v2609_v1 }
0x152a   :  { %v2191_v15 = vadd.f32 %v2190_v63, %v2189_v19  ;;  %v2613_v45 = vadd.f32 %v2612_v4, %v2611_v44 }
0x152c   :  { %v2192_v47 = vrot.slane %v2191_v15, 1  ;;  %v2614_v50 = vrot.slane %v2613_v45, 4 }
0x152e   :  { %v2193_v7 = vadd.f32 %v2192_v47, %v2191_v15  ;;  %v2615_v11 = vadd.f32 %v2614_v50, %v2613_v45 }
0x1530   :  { %v2194_v17 = vmul.f32 0.03125, %v2193_v7  ;;  %v2616_v18 = vrot.slane %v2615_v11, 2 }
0x1532   :  { %v2195_v26 = vsub.f32 %v2166_v21, %v2194_v17  ;;  %v2196_v33 = vsub.f32 %v2169_v43, %v2194_v17  ;;  %v2197_v16 = vsub.f32 %v3321_v2, %v2194_v17  ;;  %v2198_v35 = vsub.f32 %v3322_v3, %v2194_v17 }
0x1533   :  { %v2617_v29 = vadd.f32 %v2616_v18, %v2615_v11 }
0x1534   :  { %v2199_v25 = vmul.f32 %v2195_v26, %v2195_v26  ;;  %v2200_v13 = vmul.f32 %v2196_v33, %v2196_v33  ;;  %v2201_v14 = vmul.f32 %v2197_v16, %v2197_v16  ;;  %v2202_v38 = vmul.f32 %v2198_v35, %v2198_v35 }
0x1535   :  { %v2618_v10 = vrot.slane %v2617_v29, 1 }
0x1536   :  { %v2203_v31 = vsel %vm276_vm0, %v2199_v25, 0.0  ;;  %v2204_v30 = vsel %vm276_vm0, %v2200_v13, 0.0  ;;  %v2206_v39 = vsel %vm276_vm0, %v2201_v14, 0.0  ;;  %v2208_v37 = vsel %vm276_vm0, %v2202_v38, 0.0 }
0x1537   :  { %v2205_v22 = vadd.f32 %v2204_v30, %v2203_v31  ;;  %v2619_v58 = vadd.f32 %v2618_v10, %v2617_v29  ;;  %v588_v29 = vpop.xlane.xlu0 %587  ;;  %v2226_v25 = vrot.slane %v4137_v24, %v4073_v27  ;;  %v2234_v14 = vrot.slane %v4137_v24, %v4087_v40 }
0x1539   :  { %v2207_v12 = vadd.f32 %v2206_v39, %v2205_v22  ;;  %v2620_v42 = vmul.f32 0.03125, %v2619_v58  ;;  %v589_v22 = vsub.f32 %v4111_v62, %v588_v29  ;;  %v2652_v62 = vrot.slane %v4171_v9, %v4073_v27 }
0x153b   :  { %v2209_v2 = vadd.f32 %v2208_v37, %v2207_v12  ;;  %v2621_v21 = vsub.f32 %v2592_v54, %v2620_v42  ;;  %v2622_v3 = vsub.f32 %v2595_v60, %v2620_v42  ;;  %v2623_v43 = vsub.f32 %v3337_v53, %v2620_v42 }
0x153c   :  { %v2624_v41 = vsub.f32 %v3338_v55, %v2620_v42 }
0x153d   :  { %v2210_v32 = vrot.slane %v2209_v2, 4  ;;  %v2625_v28 = vmul.f32 %v2621_v21, %v2621_v21  ;;  %v2626_v51 = vmul.f32 %v2622_v3, %v2622_v3  ;;  %v2627_v49 = vmul.f32 %v2623_v43, %v2623_v43 }
0x153e   :  { %v2628_v48 = vmul.f32 %v2624_v41, %v2624_v41 }
0x153f   :  { %v2211_v57 = vadd.f32 %v2210_v32, %v2209_v2  ;;  %v2629_v59 = vsel %vm276_vm0, %v2625_v28, 0.0  ;;  %v2630_v61 = vsel %vm276_vm0, %v2626_v51, 0.0  ;;  %v2632_v1 = vsel %vm276_vm0, %v2627_v49, 0.0  ;;  %v1371_v28 = vpop.xlane.xlu1 %1370 }
0x1540   :  { %v2631_v52 = vadd.f32 %v2630_v61, %v2629_v59  ;;  %v2634_v54 = vsel %vm276_vm0, %v2628_v48, 0.0  ;;  %v590_v32 = vmul.f32 1.442695, %v589_v22  ;;  %v1381_v61 = vmul.f32 0.03125, %v1371_v28 }
0x1541   :  { %v2212_v19 = vrot.slane %v2211_v57, 2 }
0x1542   :  { %v2633_v0 = vadd.f32 %v2632_v1, %v2631_v52  ;;  %v1374_v52 = vpop.xlane.xlu0 %1373 }
0x1543   :  { %v2213_v63 = vadd.f32 %v2212_v19, %v2211_v57 }
0x1544   :  { %v2635_v53 = vadd.f32 %v2634_v54, %v2633_v0  ;;  %v1377_v0 = vpop.xlane.xlu1 %1376 }
0x1545   :  { %v2214_v55 = vrot.slane %v2213_v63, 1 }
0x1546   :  { %v2636_v60 = vrot.slane %v2635_v53, 4 }
0x1547   :  { %v2215_v44 = vadd.f32 %v2214_v55, %v2213_v63 }
0x1548   :  { %v2637_v4 = vadd.f32 %v2636_v60, %v2635_v53  ;;  %v1383_v53 = vmul.f32 0.03125, %v1377_v0 }
0x1549   :  { %v2216_v15 = vmul.f32 0.03125, %v2215_v44 }
0x154a   :  { %v2638_v45 = vrot.slane %v2637_v4, 2 }
0x154b   :  { %v2217_v47 = vadd.f32 1e-05, %v2216_v15  ;;  %v1380_v15 = vpop.xlane.xlu0 %1379 }
0x154c   :  { %v2639_v50 = vadd.f32 %v2638_v45, %v2637_v4 }
0x154d   :  { %3474 = vrsqrt.f32 %v2217_v47 }
0x154e   :  { %v2640_v7 = vrot.slane %v2639_v50, 1 }
0x1550   :  { %v2641_v11 = vadd.f32 %v2640_v7, %v2639_v50  ;;  %v1384_v50 = vmul.f32 0.03125, %v1380_v15 }
0x1552   :  { %v2642_v17 = vmul.f32 0.03125, %v2641_v11 }
0x1554   :  { %v2643_v18 = vadd.f32 1e-05, %v2642_v17 }
0x1556   :  { %3476 = vrsqrt.f32 %v2643_v18 }
0x1557   :  { %v3475_v13 = vpop.eup %3474  ;;  %3478 = vpow2.f32 %v590_v32 }
0x1558   :  { %v2220_v10 = vmul.f32 %v3475_v13, %v2196_v33  ;;  %v2219_v38 = vmul.f32 %v3475_v13, %v2195_v26  ;;  %v2222_v31 = vmul.f32 %v3475_v13, %v2198_v35  ;;  %v2221_v30 = vmul.f32 %v3475_v13, %v2197_v16 }
0x1559   :  { %v2660_v35 = vrot.slane %v4171_v9, %v4087_v40 }
0x155a   :  { %v2228_v58 = vmul.f32 %v2226_v25, %v2220_v10  ;;  %v2227_v39 = vmul.f32 %v2226_v25, %v2219_v38  ;;  %v2230_v12 = vmul.f32 %v2226_v25, %v2222_v31  ;;  %v2229_v42 = vmul.f32 %v2226_v25, %v2221_v30 }
0x155c   :  { %v4271_v37 = vadd.f32 %v2234_v14, %v2228_v58  ;;  %v4273_v2 = vadd.f32 %v2234_v14, %v2227_v39  ;;  %v4279_v26 = vadd.f32 %v2234_v14, %v2230_v12  ;;  %v4281_v33 = vadd.f32 %v2234_v14, %v2229_v42 }
0x155e   :  { %v2242_v51 = vsel %vm276_vm0, %v4271_v37, 0.0  ;;  %v2239_v24 = vsel %vm276_vm0, %v4273_v2, 0.0  ;;  %v2248_v19 = vsel %vm276_vm0, %v4279_v26, 0.0  ;;  %v2245_v1 = vsel %vm276_vm0, %v4281_v33, 0.0 }
0x155f   :  { %2243 = vadd.xlane.f32.xlu0 %v2242_v51  ;;  %2240 = vadd.xlane.f32.xlu1 %v2239_v24 }
0x1560   :  { %v3477_v16 = vpop.eup %3476 }
0x1561   :  { %v2646_v49 = vmul.f32 %v3477_v16, %v2622_v3  ;;  %v2645_v57 = vmul.f32 %v3477_v16, %v2621_v21  ;;  %v2648_v48 = vmul.f32 %v3477_v16, %v2624_v41  ;;  %v2647_v59 = vmul.f32 %v3477_v16, %v2623_v43  ;;  %v4309_v17 = vpop.eup %3478 }
0x1562   :  { %v4292_v43 = vsub.f32 %v4119_v6, %v1381_v61  ;;  %v1382_v41 = vmul.f32 0.03125, %v1374_v52  ;;  %v4304_v6 = vsub.f32 %v4128_v36, %v1383_v53  ;;  %v592_v29 = vsel %vm585_vm6, %v4309_v17, 0.0 }
0x1563   :  { %2249 = vadd.xlane.f32.xlu0 %v2248_v19  ;;  %2246 = vadd.xlane.f32.xlu1 %v2245_v1  ;;  %v2654_v27 = vmul.f32 %v2652_v62, %v2646_v49  ;;  %v2653_v63 = vmul.f32 %v2652_v62, %v2645_v57  ;;  %v2656_v54 = vmul.f32 %v2652_v62, %v2648_v48 }
0x1564   :  { %v2655_v40 = vmul.f32 %v2652_v62, %v2647_v59  ;;  %v4299_v45 = vsub.f32 %v4123_v8, %v1382_v41  ;;  %v1389_v47 = vmul.f32 %v4292_v43, %v4292_v43  ;;  %v4313_v8 = vsub.f32 %v4132_v5, %v1384_v50 }
0x1565   :  { %v2662_v3 = vadd.f32 %v2660_v35, %v2654_v27  ;;  %v2661_v21 = vadd.f32 %v2660_v35, %v2653_v63  ;;  %v4296_v44 = vadd.f32 %v2660_v35, %v2656_v54  ;;  %v1391_v25 = vmul.f32 %v4304_v6, %v4304_v6 }
0x1566   :  { %v2663_v4 = vadd.f32 %v2660_v35, %v2655_v40  ;;  %v1393_v18 = vsel %vm276_vm0, %v1389_v47, 0.0  ;;  %v1390_v36 = vmul.f32 %v4299_v45, %v4299_v45  ;;  %v1392_v10 = vmul.f32 %v4313_v8, %v4313_v8 }
0x1567   :  { %v2668_v55 = vsel %vm276_vm0, %v2662_v3, 0.0  ;;  %v2665_v60 = vsel %vm276_vm0, %v2661_v21, 0.0  ;;  %v2674_v7 = vsel %vm276_vm0, %v4296_v44, 0.0  ;;  %v1399_v14 = vsel %vm276_vm0, %v1391_v25, 0.0 }
0x1568   :  { %2669 = vadd.xlane.f32.xlu0 %v2668_v55  ;;  %2666 = vadd.xlane.f32.xlu1 %v2665_v60  ;;  %v2671_v11 = vsel %vm276_vm0, %v2663_v4, 0.0  ;;  %v1396_v13 = vsel %vm276_vm0, %v1390_v36, 0.0  ;;  %v1402_v5 = vsel %vm276_vm0, %v1392_v10, 0.0  ;;  %v3535_v55 = vmov 1966171168  }
0x1569   :  { %v1441_v60 = vunpack.c.l.s4 %v3535_v55  ;;  %v1437_v47 = vstv %s3039_s7 }
0x156c   :  { %2675 = vadd.xlane.f32.xlu0 %v2674_v7  ;;  %2672 = vadd.xlane.f32.xlu1 %v2671_v11  ;;  %v2307_v11 = vstv %s3064_s17 }
0x1570   :  { %593 = vadd.xlane.f32.xlu1 %v592_v29  ;;  %1394 = vadd.xlane.f32.xlu0 %v1393_v18 }
0x1574   :  { %1397 = vadd.xlane.f32.xlu1 %v1396_v13  ;;  %1400 = vadd.xlane.f32.xlu0 %v1399_v14 }
0x1578   :  { %1403 = vadd.xlane.f32.xlu1 %v1402_v5  ;;  %v2733_v5 = vstv %s3077_s18 }
0x15ec   :  { %v2244_v38 = vpop.xlane.xlu0 %2243  ;;  %v2241_v31 = vpop.xlane.xlu1 %2240 }
0x15ed   :  { %v2252_v30 = vmul.f32 0.03125, %v2244_v38  ;;  %v2251_v22 = vmul.f32 0.03125, %v2241_v31 }
0x15ef   :  { %v4327_v58 = vsub.f32 %v4271_v37, %v2252_v30  ;;  %v4330_v39 = vsub.f32 %v4273_v2, %v2251_v22 }
0x15f0   :  { %v2250_v12 = vpop.xlane.xlu0 %2249  ;;  %v2247_v42 = vpop.xlane.xlu1 %2246 }
0x15f1   :  { %v2254_v32 = vmul.f32 0.03125, %v2250_v12  ;;  %v2253_v28 = vmul.f32 0.03125, %v2247_v42  ;;  %v2260_v51 = vmul.f32 %v4327_v58, %v4327_v58  ;;  %v2259_v24 = vmul.f32 %v4330_v39, %v4330_v39 }
0x15f3   :  { %v4337_v62 = vsub.f32 %v4279_v26, %v2254_v32  ;;  %v4340_v16 = vsub.f32 %v4281_v33, %v2253_v28  ;;  %v2266_v37 = vsel %vm276_vm0, %v2260_v51, 0.0  ;;  %v2263_v2 = vsel %vm276_vm0, %v2259_v24, 0.0 }
0x15f4   :  { %2267 = vadd.xlane.f32.xlu1 %v2266_v37  ;;  %2264 = vadd.xlane.f32.xlu0 %v2263_v2  ;;  %v3536_v32 = vmov 1   ;;  %v3537_v51 = vmov 2  }
0x15f5   :  { %v2670_v35 = vpop.xlane.xlu0 %2669  ;;  %v2667_v49 = vpop.xlane.xlu1 %2666  ;;  %v2262_v57 = vmul.f32 %v4337_v62, %v4337_v62  ;;  %v2261_v48 = vmul.f32 %v4340_v16, %v4340_v16 }
0x15f6   :  { %v2678_v59 = vmul.f32 0.03125, %v2670_v35  ;;  %v2677_v26 = vmul.f32 0.03125, %v2667_v49 }
0x15f7   :  { %v2272_v61 = vsel %vm276_vm0, %v2262_v57, 0.0  ;;  %v2269_v33 = vsel %vm276_vm0, %v2261_v48, 0.0 }
0x15f8   :  { %v4350_v52 = vsub.f32 %v2662_v3, %v2678_v59  ;;  %v4352_v19 = vsub.f32 %v2661_v21, %v2677_v26  ;;  %2273 = vadd.xlane.f32.xlu1 %v2272_v61  ;;  %2270 = vadd.xlane.f32.xlu0 %v2269_v33 }
0x15f9   :  { %v2673_v1 = vpop.xlane.xlu1 %2672  ;;  %v2676_v35 = vpop.xlane.xlu0 %2675 }
0x15fa   :  { %v2679_v0 = vmul.f32 0.03125, %v2673_v1  ;;  %v2686_v27 = vmul.f32 %v4350_v52, %v4350_v52  ;;  %v2685_v63 = vmul.f32 %v4352_v19, %v4352_v19  ;;  %v2680_v49 = vmul.f32 0.03125, %v2676_v35 }
0x15fc   :  { %v4358_v54 = vsub.f32 %v2663_v4, %v2679_v0  ;;  %v2692_v40 = vsel %vm276_vm0, %v2686_v27, 0.0  ;;  %v2689_v41 = vsel %vm276_vm0, %v2685_v63, 0.0  ;;  %v1442_v4 = vunpack.c.0.s8 %v1441_v60 }
0x15fd   :  { %2693 = vadd.xlane.f32.xlu1 %v2692_v40  ;;  %2690 = vadd.xlane.f32.xlu0 %v2689_v41  ;;  %v594_v3 = vpop.xlane.xlu1 %593  ;;  %v4377_v57 = vsub.f32 %v4296_v44, %v2680_v49  ;;  %v1395_v1 = vpop.xlane.xlu0 %1394 }
0x15fe   :  { %3480 = vrcp.f32 %v594_v3  ;;  %v2687_v21 = vmul.f32 %v4358_v54, %v4358_v54  ;;  %v1445_v7 = vsub.s32 %v1442_v4, %v3647_v20 }
0x15ff   :  { %v2688_v48 = vmul.f32 %v4377_v57, %v4377_v57 }
0x1600   :  { %v2695_v53 = vsel %vm276_vm0, %v2687_v21, 0.0  ;;  %v1405_v21 = vmul.f32 0.03125, %v1395_v1 }
0x1601   :  { %2696 = vadd.xlane.f32.xlu0 %v2695_v53  ;;  %v2698_v59 = vsel %vm276_vm0, %v2688_v48, 0.0  ;;  %v1401_v0 = vpop.xlane.xlu0 %1400  ;;  %v1398_v27 = vpop.xlane.xlu1 %1397  ;;  %v3511_v48 = vld [vmem:[%s4516_s6 + $0x48] sm:$0xff] }
0x1605   :  { %v1404_v40 = vpop.xlane.xlu1 %1403 }
0x1608   :  { %v3481_v15 = vpop.eup %3480 }
0x1609   :  { %v596_v50 = vmul.f32 %v3481_v15, %v4309_v17  ;;  %v1409_v15 = vadd.f32 1e-05, %v1405_v21 }
0x160b   :  { %597 = vst.msk [vmem:[%s4520_s10] sm:$0x3] %vm585_vm6, %v596_v50  ;;  %v1438_v18 = vmul.f32 %v1437_v47, %v596_v50  ;;  %v2308_v29 = vmul.f32 %v2307_v11, %v596_v50  ;;  %v2734_v22 = vmul.f32 %v2733_v5, %v596_v50  ;;  %v1407_v47 = vmul.f32 0.03125, %v1401_v0 }
0x160c   :  { %3482 = vrsqrt.f32 %v1409_v15 }
0x160d   :  { %v1446_v36 = vrot.slane %v1438_v18, %v1445_v7  ;;  %v2316_v13 = vrot.slane %v2308_v29, %v1445_v7  ;;  %v2742_v28 = vrot.slane %v2734_v22, %v1445_v7 }
0x160f   :  { %v1447_v25 = vcombine.high %v1446_v36, %v1446_v36  ;;  %v1454_v10 = vrot.slane %v1446_v36, %v1445_v7  ;;  %v2324_v17 = vrot.slane %v2316_v13, %v1445_v7  ;;  %v2317_v31 = vcombine.high %v2316_v13, %v2316_v13 }
0x1610   :  { %v2750_v37 = vrot.slane %v2742_v28, %v1445_v7  ;;  %v2743_v26 = vcombine.high %v2742_v28, %v2742_v28  ;;  %v1411_v36 = vadd.f32 1e-05, %v1407_v47  ;;  %v1408_v28 = vmul.f32 0.03125, %v1404_v40 }
0x1611   :  { %v1461_v14 = vrot.slane %v1447_v25, %v1445_v7  ;;  %v1465_v30 = vrot.slane %v1454_v10, %v3653_v23  ;;  %v2335_v12 = vrot.slane %v2324_v17, %v3653_v23  ;;  %v2331_v42 = vrot.slane %v2317_v31, %v1445_v7 }
0x1612   :  { %v2761_v2 = vrot.slane %v2750_v37, %v3653_v23  ;;  %v2757_v61 = vrot.slane %v2743_v26, %v1445_v7  ;;  %v1431_v26 = vsub.s32 5, %v3647_v20  ;;  %v1412_v40 = vadd.f32 1e-05, %v1408_v28 }
0x1613   :  { %v1469_v38 = vrot.slane %v1461_v14, %v3653_v23  ;;  %v2339_v24 = vrot.slane %v2331_v42, %v3653_v23  ;;  %v1406_v14 = vmul.f32 0.03125, %v1398_v27 }
0x1614   :  { %v2765_v33 = vrot.slane %v2757_v61, %v3653_v23 }
0x1615   :  { %1475 = vperm.xlu1 %3352, %v1469_v38  }
0x1616   :  { %v3483_v5 = vpop.eup %3482 }
0x1617   :  { %1471 = vperm.xlu0 %3351, %v1465_v30   ;;  %v1423_v30 = vsub.s32 4, %v3647_v20  ;;  %v1417_v61 = vmul.f32 %v3483_v5, %v4292_v43  ;;  %v4412_v43 = vrot.slane %v3511_v48, %v1431_v26 }
0x1619   :  { %3353 = vset.pattern.permute.xlu1 %v3536_v32  ;;  %v1410_v32 = vadd.f32 1e-05, %v1406_v14  ;;  %v4406_v27 = vrot.slane %v4171_v9, %v1423_v30 }
0x161a   :  { %2341 = vperm.xlu1 %3353, %v2335_v12  }
0x161b   :  { %3355 = vset.pattern.permute.xlu0 %v3537_v51 }
0x161e   :  { %2345 = vperm.xlu1 %3353, %v2339_v24  }
0x1622   :  { %3354 = vset.pattern.permute.xlu1 %v3537_v51 }
0x1623   :  { %2767 = vperm.xlu1 %3354, %v2761_v2   ;;  %v3510_v2 = vld [vmem:[%s4516_s6 + $0xa0] sm:$0xff] }
0x1624   :  { %v4392_v35 = vrot.slane %v3510_v2, %v1423_v30 }
0x1647   :  { %2699 = vadd.xlane.f32.xlu1 %v2698_v59  ;;  %v4397_v59 = vrot.slane %v3511_v48, %v1423_v30 }
0x1658   :  { %2771 = vperm.xlu1 %3354, %v2765_v33  }
0x1681   :  { %v2265_v63 = vpop.xlane.xlu0 %2264  ;;  %v2268_v3 = vpop.xlane.xlu1 %2267 }
0x1682   :  { %v2275_v53 = vmul.f32 0.03125, %v2265_v63  ;;  %v2276_v38 = vmul.f32 0.03125, %v2268_v3  ;;  %v4410_v3 = vrot.slane %v3510_v2, %v1431_v26 }
0x1684   :  { %v2279_v7 = vadd.f32 1e-05, %v2275_v53  ;;  %v2280_v24 = vadd.f32 1e-05, %v2276_v38 }
0x1685   :  { %v2271_v41 = vpop.xlane.xlu0 %2270  ;;  %v2274_v55 = vpop.xlane.xlu1 %2273 }
0x1686   :  { %v2277_v60 = vmul.f32 0.03125, %v2271_v41  ;;  %3484 = vrsqrt.f32 %v2279_v7  ;;  %v2278_v31 = vmul.f32 0.03125, %v2274_v55 }
0x1688   :  { %v2281_v11 = vadd.f32 1e-05, %v2277_v60  ;;  %v2282_v49 = vadd.f32 1e-05, %v2278_v31 }
0x168a   :  { %v2691_v44 = vpop.xlane.xlu0 %2690  ;;  %v2694_v18 = vpop.xlane.xlu1 %2693  ;;  %3486 = vrsqrt.f32 %v2281_v11 }
0x168b   :  { %v2701_v4 = vmul.f32 0.03125, %v2691_v44  ;;  %v2702_v12 = vmul.f32 0.03125, %v2694_v18 }
0x168d   :  { %v2705_v23 = vadd.f32 1e-05, %v2701_v4 }
0x168e   :  { %v2697_v50 = vpop.xlane.xlu0 %2696 }
0x168f   :  { %v2703_v29 = vmul.f32 0.03125, %v2697_v50  ;;  %3488 = vrsqrt.f32 %v2705_v23 }
0x1690   :  { %3490 = vrsqrt.f32 %v1411_v36  ;;  %v3485_v17 = vpop.eup %3484 }
0x1691   :  { %v2707_v25 = vadd.f32 1e-05, %v2703_v29  ;;  %v2287_v37 = vmul.f32 %v3485_v17, %v4330_v39  ;;  %v2706_v39 = vadd.f32 1e-05, %v2702_v12 }
0x1693   :  { %3492 = vrsqrt.f32 %v2707_v25  ;;  %v2295_v20 = vmul.f32 %v4392_v35, %v2287_v37 }
0x1694   :  { %v4383_v13 = vpop.permute.xlu1 %1475  ;;  %v3487_v22 = vpop.eup %3486  ;;  %3494 = vrsqrt.f32 %v1410_v32 }
0x1695   :  { %v2289_v1 = vmul.f32 %v3487_v22, %v4340_v16  ;;  %3496 = vrsqrt.f32 %v2280_v24  ;;  %v1425_v16 = vmul.f32 %v4397_v59, %v1417_v61  ;;  %v2303_v60 = vadd.f32 %v4410_v3, %v2295_v20 }
0x1696   :  { %3498 = vrsqrt.f32 %v2282_v49  ;;  %v1472_v15 = vpop.permute.xlu0 %1471 }
0x1697   :  { %3500 = vrsqrt.f32 %v2706_v39  ;;  %v2297_v44 = vmul.f32 %v4392_v35, %v2289_v1  ;;  %v1433_v4 = vadd.f32 %v4412_v43, %v1425_v16 }
0x1698   :  { %3502 = vrsqrt.f32 %v1412_v40 }
0x1699   :  { %v4385_v10 = vpop.permute.xlu1 %2341  ;;  %v3489_v42 = vpop.eup %3488  ;;  %v1478_v23 = vmul.f32 %v1472_v15, %v1433_v4 }
0x169a   :  { %v3491_v51 = vpop.eup %3490  ;;  %v2713_v0 = vmul.f32 %v3489_v42, %v4352_v19  ;;  %v4416_v19 = vrot.slane %v4171_v9, %v1431_v26  ;;  %v2348_v47 = vmul.f32 %v4385_v10, %v2303_v60  ;;  %v2305_v9 = vadd.f32 %v4410_v3, %v2297_v44 }
0x169b   :  { %v1419_v41 = vmul.f32 %v3491_v51, %v4304_v6 }
0x169c   :  { %v2721_v21 = vmul.f32 %v4406_v27, %v2713_v0  ;;  %v2352_v38 = vadd.f32 %v2348_v47, %v1478_v23 }
0x169d   :  { %v4401_v33 = vpop.permute.xlu1 %2345  ;;  %v3493_v63 = vpop.eup %3492  ;;  %v1427_v53 = vmul.f32 %v4397_v59, %v1419_v41 }
0x169e   :  { %v2715_v6 = vmul.f32 %v3493_v63, %v4358_v54  ;;  %v2729_v50 = vadd.f32 %v4416_v19, %v2721_v21  ;;  %v2350_v18 = vmul.f32 %v4401_v33, %v2305_v9  ;;  %v3495_v25 = vpop.eup %3494 }
0x169f   :  { %v1435_v11 = vadd.f32 %v4412_v43, %v1427_v53  ;;  %v3497_v14 = vpop.eup %3496  ;;  %v1418_v37 = vmul.f32 %v3495_v25, %v4299_v45 }
0x16a0   :  { %v2723_v7 = vmul.f32 %v4406_v27, %v2715_v6  ;;  %v3499_v30 = vpop.eup %3498  ;;  %v2288_v24 = vmul.f32 %v3497_v14, %v4327_v58 }
0x16a1   :  { %v1480_v5 = vmul.f32 %v4383_v13, %v1435_v11  ;;  %v3501_v12 = vpop.eup %3500  ;;  %v2290_v49 = vmul.f32 %v3499_v30, %v4337_v62  ;;  %v1426_v0 = vmul.f32 %v4397_v59, %v1418_v37 }
0x16a2   :  { %v2768_v55 = vpop.permute.xlu1 %2767  ;;  %v2731_v31 = vadd.f32 %v4416_v19, %v2723_v7  ;;  %v3503_v51 = vpop.eup %3502  ;;  %v2714_v48 = vmul.f32 %v3501_v12, %v4350_v52  ;;  %v2296_v1 = vmul.f32 %v4392_v35, %v2288_v24 }
0x16a3   :  { %v2774_v29 = vmul.f32 %v2768_v55, %v2729_v50  ;;  %v2354_v42 = vadd.f32 %v2350_v18, %v1480_v5  ;;  %v1420_v26 = vmul.f32 %v3503_v51, %v4313_v8  ;;  %v2298_v58 = vmul.f32 %v4392_v35, %v2290_v49 }
0x16a4   :  { %v2722_v45 = vmul.f32 %v4406_v27, %v2714_v48  ;;  %v2304_v20 = vadd.f32 %v4410_v3, %v2296_v1  ;;  %v1434_v44 = vadd.f32 %v4412_v43, %v1426_v0 }
0x16a5   :  { %v2778_v32 = vadd.f32 %v2774_v29, %v2352_v38  ;;  %v1428_v62 = vmul.f32 %v4397_v59, %v1420_v26  ;;  %v2306_v59 = vadd.f32 %v4410_v3, %v2298_v58 }
0x16a6   :  { %v2349_v35 = vmul.f32 %v4385_v10, %v2304_v20  ;;  %v2730_v6 = vadd.f32 %v4416_v19, %v2722_v45  ;;  %v1479_v9 = vmul.f32 %v1472_v15, %v1434_v44 }
0x16a7   :  { %v2789_v61 = vrot.slane %v2778_v32, %v3678_v46  ;;  %v2782_v21 = vcombine.high %v2778_v32, %v3531_v34  ;;  %v1436_v60 = vadd.f32 %v4412_v43, %v1428_v62  ;;  %v2351_v50 = vmul.f32 %v4401_v33, %v2306_v59 }
0x16a8   :  { %v2775_v7 = vmul.f32 %v2768_v55, %v2730_v6 }
0x16a9   :  { %v2796_v10 = vrot.slane %v2782_v21, %v3678_v46  ;;  %v1481_v3 = vmul.f32 %v4383_v13, %v1436_v60 }
0x16ab   :  { %v2355_v18 = vadd.f32 %v2351_v50, %v1481_v3 }
0x16d4   :  { %v2700_v54 = vpop.xlane.xlu1 %2699 }
0x16d5   :  { %v2704_v36 = vmul.f32 0.03125, %v2700_v54 }
0x16d7   :  { %v2708_v17 = vadd.f32 1e-05, %v2704_v36 }
0x16d8   :  { %v2772_v22 = vpop.permute.xlu1 %2771 }
0x16d9   :  { %3504 = vrsqrt.f32 %v2708_v17  ;;  %v2776_v28 = vmul.f32 %v2772_v22, %v2731_v31 }
0x16db   :  { %v2780_v2 = vadd.f32 %v2776_v28, %v2354_v42 }
0x16dd   :  { %v2804_v39 = vrot.slane %v2780_v2, %v3678_v46  ;;  %v2797_v52 = vcombine.high %v2780_v2, %v3531_v34 }
0x16df   :  { %v2812_v63 = vcombine.low %v2789_v61, %v2804_v39  ;;  %v2813_v40 = vcombine.high %v2789_v61, %v2804_v39  ;;  %v2811_v4 = vrot.slane %v2797_v52, %v3678_v46 }
0x16e1   :  { %v2827_v8 = vrot.slane %v2813_v40, %v3683_v56  ;;  %v4447_v41 = vrot.slane %v2812_v63, %v3683_v56  ;;  %v2829_v23 = vcombine.high %v2796_v10, %v2811_v4  ;;  %v2828_v25 = vcombine.low %v2796_v10, %v2811_v4 }
0x16e3   :  { %v3505_v16 = vpop.eup %3504  ;;  %2919 = vrot.lane.b32.xlu1 %v2827_v8, %s3530_s3  ;;  %v2844_v47 = vcombine.high %v4447_v41, %v3531_v34  ;;  %v2845_v54 = vcombine.high %v2827_v8, %v3531_v34  ;;  %v2836_v30 = vrot.slane %v2828_v25, %v3683_v56 }
0x16e4   :  { %v2716_v53 = vmul.f32 %v3505_v16, %v4377_v57  ;;  %v2353_v57 = vadd.f32 %v2349_v35, %v1479_v9 }
0x16e5   :  { %v2846_v42 = vcombine.high %v2836_v30, %v3531_v34 }
0x16e6   :  { %v2724_v11 = vmul.f32 %v4406_v27, %v2716_v53  ;;  %v2779_v29 = vadd.f32 %v2775_v7, %v2353_v57  ;;  %v2843_v27 = vrot.slane %v2829_v23, %v3683_v56 }
0x16e7   :  { %2915 = vrot.lane.b32.xlu1 %v2844_v47, %s3528_s1 }
0x16e8   :  { %v2732_v43 = vadd.f32 %v4416_v19, %v2724_v11  ;;  %v2855_v55 = vrot.slane %v2779_v29, %v3678_v46  ;;  %v2848_v19 = vcombine.high %v2779_v29, %v3531_v34  ;;  %v2847_v24 = vcombine.high %v2843_v27, %v3531_v34 }
0x16ea   :  { %v2777_v15 = vmul.f32 %v2772_v22, %v2732_v43  ;;  %v2862_v22 = vrot.slane %v2848_v19, %v3678_v46 }
0x16eb   :  { %2923 = vrot.lane.b32.xlu1 %v2845_v54, %s3529_s12 }
0x16ec   :  { %v2781_v33 = vadd.f32 %v2777_v15, %v2355_v18 }
0x16ee   :  { %v2863_v36 = vcombine.high %v2781_v33, %v3531_v34  ;;  %v2870_v13 = vrot.slane %v2781_v33, %v3678_v46 }
0x16ef   :  { %2931 = vrot.lane.b32.xlu1 %v2843_v27, %s3530_s3 }
0x16f0   :  { %v2878_v14 = vcombine.low %v2855_v55, %v2870_v13  ;;  %v2879_v5 = vcombine.high %v2855_v55, %v2870_v13  ;;  %v2877_v38 = vrot.slane %v2863_v36, %v3678_v46 }
0x16f2   :  { %v2893_v17 = vrot.slane %v2879_v5, %v3683_v56  ;;  %v2886_v31 = vrot.slane %v2878_v14, %v3683_v56  ;;  %v2894_v32 = vcombine.low %v2862_v22, %v2877_v38  ;;  %v2895_v51 = vcombine.high %v2862_v22, %v2877_v38 }
0x16f4   :  { %2943 = vrot.lane.b32.xlu0 %v2893_v17, %s3530_s3  ;;  %v2910_v12 = vcombine.high %v2886_v31, %v3531_v34  ;;  %v2911_v28 = vcombine.high %v2893_v17, %v3531_v34  ;;  %v2902_v37 = vrot.slane %v2894_v32, %v3683_v56  ;;  %v2909_v2 = vrot.slane %v2895_v51, %v3683_v56 }
0x16f6   :  { %2939 = vrot.lane.b32.xlu1 %v2910_v12, %s3528_s1  ;;  %v2912_v49 = vcombine.high %v2902_v37, %v3531_v34  ;;  %v2913_v48 = vcombine.high %v2909_v2, %v3531_v34 }
0x16f8   :  { %2927 = vrot.lane.b32.xlu0 %v2846_v42, %s3528_s1 }
0x16fa   :  { %2947 = vrot.lane.b32.xlu1 %v2911_v28, %s3529_s12 }
0x16fc   :  { %2935 = vrot.lane.b32.xlu0 %v2847_v24, %s3529_s12 }
0x16fe   :  { %2955 = vrot.lane.b32.xlu1 %v2909_v2, %s3530_s3 }
0x1700   :  { %2951 = vrot.lane.b32.xlu0 %v2912_v49, %s3528_s1 }
0x1704   :  { %2959 = vrot.lane.b32.xlu0 %v2913_v48, %s3529_s12 }
0x1755   :  { %v2920_v26 = vpop.permute.xlu1 %2919 }
0x1759   :  { %v2916_v61 = vpop.permute.xlu1 %2915 }
0x175a   :  { %v2962_v62 = vsel %vm276_vm0, %v4447_v41, %v2916_v61 }
0x175b   :  { %v2963_v44 = vsel %vm366_vm3, %v2962_v62, %v2920_v26 }
0x175d   :  { %v2924_v39 = vpop.permute.xlu1 %2923 }
0x175e   :  { %v2965_v21 = vsel %vm2964_vm7, %v2963_v44, %v2924_v39 }
0x1761   :  { %v2932_v1 = vpop.permute.xlu1 %2931 }
0x1766   :  { %v2944_v0 = vpop.permute.xlu0 %2943 }
0x1768   :  { %v2940_v63 = vpop.permute.xlu1 %2939 }
0x1769   :  { %v2969_v8 = vsel %vm276_vm0, %v2886_v31, %v2940_v63 }
0x176a   :  { %v2928_v40 = vpop.permute.xlu0 %2927  ;;  %v2970_v59 = vsel %vm366_vm3, %v2969_v8, %v2944_v0 }
0x176b   :  { %v2966_v56 = vsel %vm276_vm0, %v2836_v30, %v2928_v40 }
0x176c   :  { %v2948_v45 = vpop.permute.xlu1 %2947  ;;  %v2967_v52 = vsel %vm366_vm3, %v2966_v56, %v2932_v1 }
0x176d   :  { %v2971_v41 = vsel %vm2964_vm7, %v2970_v59, %v2948_v45 }
0x176e   :  { %v2936_v58 = vpop.permute.xlu0 %2935 }
0x176f   :  { %v2968_v20 = vsel %vm2964_vm7, %v2967_v52, %v2936_v58 }
0x1770   :  { %v2956_v35 = vpop.permute.xlu1 %2955  ;;  %v2979_v6 = vcombine.low %v2965_v21, %v2968_v20 }
0x1772   :  { %v2952_v34 = vpop.permute.xlu0 %2951  ;;  %v2987_v9 = vrot.slane %v2979_v6, %v3678_v46 }
0x1773   :  { %v2972_v16 = vsel %vm276_vm0, %v2902_v37, %v2952_v34 }
0x1774   :  { %v2973_v53 = vsel %vm366_vm3, %v2972_v16, %v2956_v35 }
0x1776   :  { %v2960_v60 = vpop.permute.xlu0 %2959 }
0x1777   :  { %v2974_v4 = vsel %vm2964_vm7, %v2973_v53, %v2960_v60 }
0x1778   :  { %v2980_v47 = vcombine.low %v2971_v41, %v2974_v4 }
0x177a   :  { %v2994_v50 = vrot.slane %v2980_v47, %v3678_v46 }
0x177c   :  { %v2995_v7 = vcombine.low %v2987_v9, %v2994_v50 }
0x177e   :  { %2997 = vst [vmem:[%s4519_s9] sm:$0xff] %v2995_v7 }
0x177f   :  { %3006 = vsyncpa [#allocation3], 1 }

</bundles_post_ra>
